<compile_context>
chip_gen: v7x
topology: tpu7x:2x2x1
jax: 0.10.0
libtpu: 0.0.40
codegen_flags: <defaults>
</compile_context>

<pallas_src>
import math
from functools import partial

import jax
import jax.numpy as jnp
from jax.experimental import pallas as pl
from jax.experimental.pallas import tpu as pltpu

# ---- model hyper-parameters (small, consistent with the module) ----
MAX_P_OUT = 7      # vocab size / number of output classes
D_MODEL = 32       # input_proj_dim
NHEAD = 4
D_HEAD = D_MODEL // NHEAD
NUM_LAYERS = 2
DIM_FF = 64        # dim_feedforward (scaled down from 256 for a small test)
SEQ = 3            # [CLS, tok_a, tok_b]
LN_EPS = 1e-5

# packed-slab layout constants (everything lane-padded to 128)
_LROWS = 6 * 128 + 16          # 6 weight matrices + 16 rows of biases per layer
_BT_CAP = 64                   # caps the [BT*S, BT*S] masked score matrix


def _round_up(x, m):
    return ((x + m - 1) // m) * m


def _cdiv(a, b):
    return -(-a // b)


# ---------------------------------------------------------------------------
# Pallas kernel: 2 post-norm transformer encoder layers + output head, all on
# a flattened, 128-lane-padded [BT*S, 128] activation slab.
# ---------------------------------------------------------------------------
def transformer_kernel(x_ref, w_ref, bias_ref, o_ref, *,
                       n_layers, nhead, d_model, d_head):
    n_rows = x_ref.shape[0]                      # BT * SEQ
    scale = 1.0 / math.sqrt(d_head)
    inv_d = 1.0 / d_model

    head_w_off = n_layers * _LROWS
    head_b_off = head_w_off + 128
    mask_off = head_b_off + 8

    x = x_ref[...]                               # [n, 128]; lanes >= d_model are 0
    attn_bias = bias_ref[...]                    # [n, n] block-diag additive mask

    def layer_norm(y, w, b):
        # mean/var over the d_model real lanes; padded lanes are exactly zero,
        # and w/b are zero-padded, so padded lanes stay zero after LN.
        mean = jnp.sum(y, axis=-1, keepdims=True) * inv_d
        ex2 = jnp.sum(y * y, axis=-1, keepdims=True) * inv_d
        var = ex2 - mean * mean
        return (y - mean) * jax.lax.rsqrt(var + LN_EPS) * w + b

    for l in range(n_layers):
        base = l * _LROWS
        wq = w_ref[base + 0 * 128: base + 1 * 128, :]
        wk = w_ref[base + 1 * 128: base + 2 * 128, :]
        wv = w_ref[base + 2 * 128: base + 3 * 128, :]
        wo = w_ref[base + 3 * 128: base + 4 * 128, :]
        w1 = w_ref[base + 4 * 128: base + 5 * 128, :]
        w2 = w_ref[base + 5 * 128: base + 6 * 128, :]
        pb = base + 6 * 128
        bq = w_ref[pb + 0: pb + 1, :]
        bk = w_ref[pb + 1: pb + 2, :]
        bv = w_ref[pb + 2: pb + 3, :]
        bo = w_ref[pb + 3: pb + 4, :]
        g1 = w_ref[pb + 4: pb + 5, :]
        b1 = w_ref[pb + 5: pb + 6, :]
        g2 = w_ref[pb + 6: pb + 7, :]
        b2 = w_ref[pb + 7: pb + 8, :]
        fb1 = w_ref[pb + 8: pb + 9, :]
        fb2 = w_ref[pb + 9: pb + 10, :]

        # ---- self attention: full-width 2-D matmuls, no lane slicing ----
        q = jnp.dot(x, wq, preferred_element_type=jnp.float32) + bq
        k = jnp.dot(x, wk, preferred_element_type=jnp.float32) + bk
        v = jnp.dot(x, wv, preferred_element_type=jnp.float32) + bv

        ctx = jnp.zeros((n_rows, 128), jnp.float32)
        for h in range(nhead):
            mh = w_ref[mask_off + h: mask_off + h + 1, :]       # [1,128] head mask
            # masking q restricts the 128-lane contraction to this head's lanes
            s = jax.lax.dot_general(q * mh, k, (((1,), (1,)), ((), ())),
                                    preferred_element_type=jnp.float32)
            s = s * scale + attn_bias                           # block-diag over batch
            s = s - jnp.max(s, axis=-1, keepdims=True)
            p = jnp.exp(s)
            denom = jnp.sum(p, axis=-1, keepdims=True)
            r = pl.reciprocal(denom, approx=True)               # EUP
            r = r * (2.0 - denom * r)                           # one Newton step
            p = p * r
            # masking v keeps this head's contribution in its own lane group:
            # summing heads reproduces the concatenated context with no concat.
            ctx = ctx + jnp.dot(p, v * mh, preferred_element_type=jnp.float32)

        attn = jnp.dot(ctx, wo, preferred_element_type=jnp.float32) + bo
        x = layer_norm(x + attn, g1, b1)

        # ---- feed-forward ----
        hid = jnp.maximum(jnp.dot(x, w1, preferred_element_type=jnp.float32) + fb1, 0.0)
        ffn = jnp.dot(hid, w2, preferred_element_type=jnp.float32) + fb2
        x = layer_norm(x + ffn, g2, b2)

    # ---- output head, lane-dense (128-padded) store; CLS rows picked in wrapper
    hw = w_ref[head_w_off: head_w_off + 128, :]
    hb = w_ref[head_b_off: head_b_off + 1, :]
    o_ref[...] = (jnp.dot(x, hw, preferred_element_type=jnp.float32) + hb
                  ).astype(o_ref.dtype)


# ---------------------------------------------------------------------------
# Glue: params, positional encoding, weight packing, pallas_call.
# ---------------------------------------------------------------------------
def make_pos_encoding(max_len, d_model):
    position = jnp.arange(max_len, dtype=jnp.float32)[:, None]
    div_term = jnp.exp(jnp.arange(0, d_model, 2, dtype=jnp.float32)
                       * (-math.log(10000.0) / d_model))
    pe = jnp.zeros((max_len, d_model), jnp.float32)
    pe = pe.at[:, 0::2].set(jnp.sin(position * div_term))
    pe = pe.at[:, 1::2].set(jnp.cos(position * div_term))
    return pe


def init_params(key):
    D, P, F, L = D_MODEL, MAX_P_OUT, DIM_FF, NUM_LAYERS
    ks = jax.random.split(key, 9)

    def n(k, shape, std):
        return std * jax.random.normal(k, shape, dtype=jnp.float32)

    return {
        'token_emb': n(ks[0], (P, D), 1.0),
        'cls_token': n(ks[1], (D,), 0.02),
        'in_proj_w': n(ks[2], (L, 3 * D, D), 0.05),
        'in_proj_b': jnp.zeros((L, 3 * D), jnp.float32),
        'out_proj_w': n(ks[3], (L, D, D), 0.05),
        'out_proj_b': jnp.zeros((L, D), jnp.float32),
        'ln1_w': jnp.ones((L, D), jnp.float32),
        'ln1_b': jnp.zeros((L, D), jnp.float32),
        'ln2_w': jnp.ones((L, D), jnp.float32),
        'ln2_b': jnp.zeros((L, D), jnp.float32),
        'ff1_w': n(ks[4], (L, F, D), 0.05),
        'ff1_b': n(ks[5], (L, F), 0.02),
        'ff2_w': n(ks[6], (L, D, F), 0.05),
        'ff2_b': n(ks[7], (L, D), 0.02),
        'head_w': n(ks[8], (P, D), 0.05),
        'head_b': jnp.zeros((P,), jnp.float32),
    }


def pack_weights(params):
    """Pack all weights/biases into one [rows, 128] f32 slab (single DMA)."""
    D, F, L, P = D_MODEL, DIM_FF, NUM_LAYERS, MAX_P_OUT

    def padmat(w):                       # [r, c] -> [128, 128], zero padded
        r, c = w.shape
        return jnp.pad(w.astype(jnp.float32), ((0, 128 - r), (0, 128 - c)))

    def padrow(v):                       # [c] -> [1, 128]
        return jnp.pad(v.astype(jnp.float32), (0, 128 - v.shape[0]))[None, :]

    blocks = []
    for l in range(L):
        inw, inb = params['in_proj_w'][l], params['in_proj_b'][l]
        blocks += [
            padmat(inw[0:D].T), padmat(inw[D:2 * D].T), padmat(inw[2 * D:3 * D].T),
            padmat(params['out_proj_w'][l].T),
            padmat(params['ff1_w'][l].T), padmat(params['ff2_w'][l].T),
            jnp.concatenate([
                padrow(inb[0:D]), padrow(inb[D:2 * D]), padrow(inb[2 * D:3 * D]),
                padrow(params['out_proj_b'][l]),
                padrow(params['ln1_w'][l]), padrow(params['ln1_b'][l]),
                padrow(params['ln2_w'][l]), padrow(params['ln2_b'][l]),
                padrow(params['ff1_b'][l]), padrow(params['ff2_b'][l]),
                jnp.zeros((6, 128), jnp.float32)], axis=0),
        ]
    blocks += [
        padmat(params['head_w'].T),                              # [D, P] -> [128,128]
        jnp.concatenate([padrow(params['head_b']),
                         jnp.zeros((7, 128), jnp.float32)], axis=0),
    ]
    lane = jnp.arange(128)
    head_masks = ((lane[None, :] // D_HEAD) == jnp.arange(NHEAD)[:, None]) \
        & (lane[None, :] < D)
    blocks.append(jnp.concatenate([head_masks.astype(jnp.float32),
                                   jnp.zeros((8 - NHEAD, 128), jnp.float32)], axis=0))
    return jnp.concatenate(blocks, axis=0)


def make_block_diag_bias(bt, s):
    """Additive mask: rows i,j of the flattened [bt*s] axis attend iff same example."""
    n = bt * s
    g = jnp.arange(n) // s
    return jnp.where(g[:, None] == g[None, :], 0.0, -1e30).astype(jnp.float32)


def forward_pallas(x_tokens, params):
    B = x_tokens.shape[0]
    D, P, S = D_MODEL, MAX_P_OUT, SEQ

    # embedding gather + CLS prepend + positional encoding (glue, outside kernel)
    emb = params['token_emb'][x_tokens]                              # [B, 2, D]
    cls = jnp.broadcast_to(params['cls_token'][None, None, :], (B, 1, D))
    src = jnp.concatenate([cls, emb], axis=1).astype(jnp.float32)    # [B, 3, D]
    src = src + make_pos_encoding(S, D)[None]                        # PE folded here

    # batch tile: multiple of 8, >=2 grid steps when B is large (v7x megacore),
    # capped so the [BT*S, BT*S] block-diag score matrix stays small.
    bt = max(8, min(_BT_CAP, _round_up(_cdiv(B, 2), 8)))
    grid_n = _cdiv(B, bt)
    b_pad = grid_n * bt
    n = bt * S

    src = jnp.pad(src, ((0, b_pad - B), (0, 0), (0, 0)))             # pad batch
    x2d = jnp.pad(src.reshape(b_pad * S, D), ((0, 0), (0, 128 - D))) # lane-pad to 128

    slab = pack_weights(params)                                      # [rows, 128]
    bias = make_block_diag_bias(bt, S)                               # [n, n]

    kernel = partial(transformer_kernel, n_layers=NUM_LAYERS, nhead=NHEAD,
                     d_model=D, d_head=D_HEAD)

    out = pl.pallas_call(
        kernel,
        out_shape=jax.ShapeDtypeStruct((b_pad * S, 128), jnp.float32),
        grid=(grid_n,),
        in_specs=[
            pl.BlockSpec((n, 128), lambda i: (i, 0)),      # activations: batch-tiled
            pl.BlockSpec(slab.shape, lambda i: (0, 0)),    # packed weights: resident
            pl.BlockSpec(bias.shape, lambda i: (0, 0)),    # block-diag mask: resident
        ],
        out_specs=pl.BlockSpec((n, 128), lambda i: (i, 0)),
        compiler_params=pltpu.CompilerParams(
            dimension_semantics=("parallel",),
            vmem_limit_bytes=32 * 1024 * 1024),
    )(x2d, slab, bias)

    # CLS rows + un-pad the 128-wide lane-dense logits
    return out.reshape(b_pad, S, 128)[:B, 0, :P]


# ---------------------------------------------------------------------------
# Pure-JAX reference (mirrors nn.TransformerEncoderLayer post-norm semantics)
# ---------------------------------------------------------------------------
def _ln_ref(x, w, b):
    mean = jnp.mean(x, axis=-1, keepdims=True)
    var = jnp.mean((x - mean) ** 2, axis=-1, keepdims=True)
    return (x - mean) * jax.lax.rsqrt(var + LN_EPS) * w + b


def forward_ref(x_tokens, params):
    B = x_tokens.shape[0]
    D, P = D_MODEL, MAX_P_OUT
    dh = D // NHEAD
    emb = params['token_emb'][x_tokens]
    cls = jnp.broadcast_to(params['cls_token'][None, None, :], (B, 1, D))
    x = jnp.concatenate([cls, emb], axis=1).astype(jnp.float32)
    x = x + make_pos_encoding(SEQ, D)[None]
    for l in range(NUM_LAYERS):
        qkv = x @ params['in_proj_w'][l].T + params['in_proj_b'][l]
        q, k, v = qkv[..., :D], qkv[..., D:2 * D], qkv[..., 2 * D:]
        qh = q.reshape(B, SEQ, NHEAD, dh).transpose(0, 2, 1, 3)
        kh = k.reshape(B, SEQ, NHEAD, dh).transpose(0, 2, 1, 3)
        vh = v.reshape(B, SEQ, NHEAD, dh).transpose(0, 2, 1, 3)
        s = (qh @ kh.transpose(0, 1, 3, 2)) / math.sqrt(dh)
        p = jax.nn.softmax(s, axis=-1)
        ctx = (p @ vh).transpose(0, 2, 1, 3).reshape(B, SEQ, D)
        attn_out = ctx @ params['out_proj_w'][l].T + params['out_proj_b'][l]
        x = _ln_ref(x + attn_out, params['ln1_w'][l], params['ln1_b'][l])
        h1 = jax.nn.relu(x @ params['ff1_w'][l].T + params['ff1_b'][l])
        h2 = h1 @ params['ff2_w'][l].T + params['ff2_b'][l]
        x = _ln_ref(x + h2, params['ln2_w'][l], params['ln2_b'][l])
    return x[:, 0, :] @ params['head_w'].T + params['head_b']


if __name__ == "__main__":
    key = jax.random.PRNGKey(0)
    pkey, xkey = jax.random.split(key)
    params = init_params(pkey)

    B = 2
    x = jax.random.randint(xkey, (B, 2), 0, MAX_P_OUT, dtype=jnp.int32)

    out = forward_pallas(x, params)
    out = jax.block_until_ready(out)

    ref = forward_ref(x, params)
    assert out.shape == (B, MAX_P_OUT)
    assert jnp.allclose(out, ref, atol=1e-3, rtol=1e-3), (out, ref)
    print("KERNEL_OK")
</pallas_src>

<mosaic_0001>
module attributes {stable_mosaic.version = 11 : i64} {
  func.func @transformer_kernel(%arg0: i32, %arg1: memref<24x128xf32, #tpu.memory_space<vmem>>, %arg2: memref<1712x128xf32, #tpu.memory_space<vmem>>, %arg3: memref<24x24xf32, #tpu.memory_space<vmem>>, %arg4: memref<24x128xf32, #tpu.memory_space<vmem>>) attributes {dimension_semantics = [#tpu.dimension_semantics<parallel>], iteration_bounds = array<i64: 1>, scalar_prefetch = 0 : i64, scratch_operands = 0 : i64, tpu.core_type = #tpu.core_type<tc>, window_params = [{transform_indices = @transform_0, window_bounds = array<i64: 24, 128>}, {pipeline_mode = #tpu.pipeline_mode<synchronous>, transform_indices = @transform_1, window_bounds = array<i64: 1712, 128>}, {pipeline_mode = #tpu.pipeline_mode<synchronous>, transform_indices = @transform_2, window_bounds = array<i64: 24, 24>}, {transform_indices = @transform_3, window_bounds = array<i64: 24, 128>}]} {
    %c0 = arith.constant 0 : index
    %c0_0 = arith.constant 0 : index
    %0 = vector.load %arg1[%c0, %c0_0] : memref<24x128xf32, #tpu.memory_space<vmem>>, vector<24x128xf32>
    %c0_1 = arith.constant 0 : index
    %c0_2 = arith.constant 0 : index
    %1 = vector.load %arg3[%c0_1, %c0_2] : memref<24x24xf32, #tpu.memory_space<vmem>>, vector<24x24xf32>
    %c0_3 = arith.constant 0 : index
    %c0_4 = arith.constant 0 : index
    %2 = vector.load %arg2[%c0_3, %c0_4] : memref<1712x128xf32, #tpu.memory_space<vmem>>, vector<128x128xf32>
    %c128 = arith.constant 128 : index
    %c0_5 = arith.constant 0 : index
    %3 = vector.load %arg2[%c128, %c0_5] : memref<1712x128xf32, #tpu.memory_space<vmem>>, vector<128x128xf32>
    %c256 = arith.constant 256 : index
    %c0_6 = arith.constant 0 : index
    %4 = vector.load %arg2[%c256, %c0_6] : memref<1712x128xf32, #tpu.memory_space<vmem>>, vector<128x128xf32>
    %c384 = arith.constant 384 : index
    %c0_7 = arith.constant 0 : index
    %5 = vector.load %arg2[%c384, %c0_7] : memref<1712x128xf32, #tpu.memory_space<vmem>>, vector<128x128xf32>
    %c512 = arith.constant 512 : index
    %c0_8 = arith.constant 0 : index
    %6 = vector.load %arg2[%c512, %c0_8] : memref<1712x128xf32, #tpu.memory_space<vmem>>, vector<128x128xf32>
    %c640 = arith.constant 640 : index
    %c0_9 = arith.constant 0 : index
    %7 = vector.load %arg2[%c640, %c0_9] : memref<1712x128xf32, #tpu.memory_space<vmem>>, vector<128x128xf32>
    %c768 = arith.constant 768 : index
    %c0_10 = arith.constant 0 : index
    %8 = vector.load %arg2[%c768, %c0_10] : memref<1712x128xf32, #tpu.memory_space<vmem>>, vector<1x128xf32>
    %c769 = arith.constant 769 : index
    %c0_11 = arith.constant 0 : index
    %9 = vector.load %arg2[%c769, %c0_11] : memref<1712x128xf32, #tpu.memory_space<vmem>>, vector<1x128xf32>
    %c770 = arith.constant 770 : index
    %c0_12 = arith.constant 0 : index
    %10 = vector.load %arg2[%c770, %c0_12] : memref<1712x128xf32, #tpu.memory_space<vmem>>, vector<1x128xf32>
    %c771 = arith.constant 771 : index
    %c0_13 = arith.constant 0 : index
    %11 = vector.load %arg2[%c771, %c0_13] : memref<1712x128xf32, #tpu.memory_space<vmem>>, vector<1x128xf32>
    %c772 = arith.constant 772 : index
    %c0_14 = arith.constant 0 : index
    %12 = vector.load %arg2[%c772, %c0_14] : memref<1712x128xf32, #tpu.memory_space<vmem>>, vector<1x128xf32>
    %c773 = arith.constant 773 : index
    %c0_15 = arith.constant 0 : index
    %13 = vector.load %arg2[%c773, %c0_15] : memref<1712x128xf32, #tpu.memory_space<vmem>>, vector<1x128xf32>
    %c774 = arith.constant 774 : index
    %c0_16 = arith.constant 0 : index
    %14 = vector.load %arg2[%c774, %c0_16] : memref<1712x128xf32, #tpu.memory_space<vmem>>, vector<1x128xf32>
    %c775 = arith.constant 775 : index
    %c0_17 = arith.constant 0 : index
    %15 = vector.load %arg2[%c775, %c0_17] : memref<1712x128xf32, #tpu.memory_space<vmem>>, vector<1x128xf32>
    %c776 = arith.constant 776 : index
    %c0_18 = arith.constant 0 : index
    %16 = vector.load %arg2[%c776, %c0_18] : memref<1712x128xf32, #tpu.memory_space<vmem>>, vector<1x128xf32>
    %c777 = arith.constant 777 : index
    %c0_19 = arith.constant 0 : index
    %17 = vector.load %arg2[%c777, %c0_19] : memref<1712x128xf32, #tpu.memory_space<vmem>>, vector<1x128xf32>
    %cst = arith.constant dense<0.000000e+00> : vector<24x128xf32>
    %18 = tpu.matmul %0, %2, %cst {dimension_numbers = #tpu.dot_dimension_numbers<[1], [0], [0], [1], [0, 0, 1, 1], [], []>} : vector<24x128xf32>, vector<128x128xf32>, vector<24x128xf32> -> vector<24x128xf32>
    %19 = vector.broadcast %8 : vector<1x128xf32> to vector<24x128xf32>
    %20 = arith.addf %18, %19 : vector<24x128xf32>
    %cst_20 = arith.constant dense<0.000000e+00> : vector<24x128xf32>
    %21 = tpu.matmul %0, %3, %cst_20 {dimension_numbers = #tpu.dot_dimension_numbers<[1], [0], [0], [1], [0, 0, 1, 1], [], []>} : vector<24x128xf32>, vector<128x128xf32>, vector<24x128xf32> -> vector<24x128xf32>
    %22 = vector.broadcast %9 : vector<1x128xf32> to vector<24x128xf32>
    %23 = arith.addf %21, %22 : vector<24x128xf32>
    %cst_21 = arith.constant dense<0.000000e+00> : vector<24x128xf32>
    %24 = tpu.matmul %0, %4, %cst_21 {dimension_numbers = #tpu.dot_dimension_numbers<[1], [0], [0], [1], [0, 0, 1, 1], [], []>} : vector<24x128xf32>, vector<128x128xf32>, vector<24x128xf32> -> vector<24x128xf32>
    %25 = vector.broadcast %10 : vector<1x128xf32> to vector<24x128xf32>
    %26 = arith.addf %24, %25 : vector<24x128xf32>
    %cst_22 = arith.constant 0.000000e+00 : f32
    %27 = vector.broadcast %cst_22 : f32 to vector<24x128xf32>
    %c1704 = arith.constant 1704 : index
    %c0_23 = arith.constant 0 : index
    %28 = vector.load %arg2[%c1704, %c0_23] : memref<1712x128xf32, #tpu.memory_space<vmem>>, vector<1x128xf32>
    %29 = vector.broadcast %28 : vector<1x128xf32> to vector<24x128xf32>
    %30 = arith.mulf %20, %29 : vector<24x128xf32>
    %cst_24 = arith.constant dense<0.000000e+00> : vector<24x24xf32>
    %31 = tpu.matmul %30, %23, %cst_24 {dimension_numbers = #tpu.dot_dimension_numbers<[1], [1], [0], [0], [0, 0, 1, 0], [], []>} : vector<24x128xf32>, vector<24x128xf32>, vector<24x24xf32> -> vector<24x24xf32>
    %cst_25 = arith.constant 0.353553385 : f32
    %32 = vector.broadcast %cst_25 : f32 to vector<24x24xf32>
    %33 = arith.mulf %31, %32 : vector<24x24xf32>
    %34 = arith.addf %33, %1 : vector<24x24xf32>
    %cst_26 = arith.constant dense<0xFF800000> : vector<24xf32>
    %35 = vector.multi_reduction <maximumf>, %34, %cst_26 [1] : vector<24x24xf32> to vector<24xf32>
    %36 = vector.shape_cast %35 : vector<24xf32> to vector<24x1xf32>
    %37 = vector.broadcast %36 : vector<24x1xf32> to vector<24x24xf32>
    %38 = arith.subf %34, %37 : vector<24x24xf32>
    %39 = math.exp %38 : vector<24x24xf32>
    %cst_27 = arith.constant dense<0.000000e+00> : vector<24xf32>
    %40 = vector.multi_reduction <add>, %39, %cst_27 [1] : vector<24x24xf32> to vector<24xf32>
    %41 = vector.shape_cast %40 : vector<24xf32> to vector<24x1xf32>
    %42 = tpu.reciprocal %41 {approx = true} : vector<24x1xf32> -> vector<24x1xf32>
    %43 = arith.mulf %41, %42 : vector<24x1xf32>
    %cst_28 = arith.constant 2.000000e+00 : f32
    %44 = vector.broadcast %cst_28 : f32 to vector<24x1xf32>
    %45 = arith.subf %44, %43 : vector<24x1xf32>
    %46 = arith.mulf %42, %45 : vector<24x1xf32>
    %47 = vector.broadcast %46 : vector<24x1xf32> to vector<24x24xf32>
    %48 = arith.mulf %39, %47 : vector<24x24xf32>
    %49 = vector.broadcast %28 : vector<1x128xf32> to vector<24x128xf32>
    %50 = arith.mulf %26, %49 : vector<24x128xf32>
    %cst_29 = arith.constant dense<0.000000e+00> : vector<24x128xf32>
    %51 = tpu.matmul %48, %50, %cst_29 {dimension_numbers = #tpu.dot_dimension_numbers<[1], [0], [0], [1], [0, 0, 1, 1], [], []>} : vector<24x24xf32>, vector<24x128xf32>, vector<24x128xf32> -> vector<24x128xf32>
    %52 = arith.addf %27, %51 : vector<24x128xf32>
    %c1705 = arith.constant 1705 : index
    %c0_30 = arith.constant 0 : index
    %53 = vector.load %arg2[%c1705, %c0_30] : memref<1712x128xf32, #tpu.memory_space<vmem>>, vector<1x128xf32>
    %54 = vector.broadcast %53 : vector<1x128xf32> to vector<24x128xf32>
    %55 = arith.mulf %20, %54 : vector<24x128xf32>
    %cst_31 = arith.constant dense<0.000000e+00> : vector<24x24xf32>
    %56 = tpu.matmul %55, %23, %cst_31 {dimension_numbers = #tpu.dot_dimension_numbers<[1], [1], [0], [0], [0, 0, 1, 0], [], []>} : vector<24x128xf32>, vector<24x128xf32>, vector<24x24xf32> -> vector<24x24xf32>
    %cst_32 = arith.constant 0.353553385 : f32
    %57 = vector.broadcast %cst_32 : f32 to vector<24x24xf32>
    %58 = arith.mulf %56, %57 : vector<24x24xf32>
    %59 = arith.addf %58, %1 : vector<24x24xf32>
    %cst_33 = arith.constant dense<0xFF800000> : vector<24xf32>
    %60 = vector.multi_reduction <maximumf>, %59, %cst_33 [1] : vector<24x24xf32> to vector<24xf32>
    %61 = vector.shape_cast %60 : vector<24xf32> to vector<24x1xf32>
    %62 = vector.broadcast %61 : vector<24x1xf32> to vector<24x24xf32>
    %63 = arith.subf %59, %62 : vector<24x24xf32>
    %64 = math.exp %63 : vector<24x24xf32>
    %cst_34 = arith.constant dense<0.000000e+00> : vector<24xf32>
    %65 = vector.multi_reduction <add>, %64, %cst_34 [1] : vector<24x24xf32> to vector<24xf32>
    %66 = vector.shape_cast %65 : vector<24xf32> to vector<24x1xf32>
    %67 = tpu.reciprocal %66 {approx = true} : vector<24x1xf32> -> vector<24x1xf32>
    %68 = arith.mulf %66, %67 : vector<24x1xf32>
    %cst_35 = arith.constant 2.000000e+00 : f32
    %69 = vector.broadcast %cst_35 : f32 to vector<24x1xf32>
    %70 = arith.subf %69, %68 : vector<24x1xf32>
    %71 = arith.mulf %67, %70 : vector<24x1xf32>
    %72 = vector.broadcast %71 : vector<24x1xf32> to vector<24x24xf32>
    %73 = arith.mulf %64, %72 : vector<24x24xf32>
    %74 = vector.broadcast %53 : vector<1x128xf32> to vector<24x128xf32>
    %75 = arith.mulf %26, %74 : vector<24x128xf32>
    %cst_36 = arith.constant dense<0.000000e+00> : vector<24x128xf32>
    %76 = tpu.matmul %73, %75, %cst_36 {dimension_numbers = #tpu.dot_dimension_numbers<[1], [0], [0], [1], [0, 0, 1, 1], [], []>} : vector<24x24xf32>, vector<24x128xf32>, vector<24x128xf32> -> vector<24x128xf32>
    %77 = arith.addf %52, %76 : vector<24x128xf32>
    %c1706 = arith.constant 1706 : index
    %c0_37 = arith.constant 0 : index
    %78 = vector.load %arg2[%c1706, %c0_37] : memref<1712x128xf32, #tpu.memory_space<vmem>>, vector<1x128xf32>
    %79 = vector.broadcast %78 : vector<1x128xf32> to vector<24x128xf32>
    %80 = arith.mulf %20, %79 : vector<24x128xf32>
    %cst_38 = arith.constant dense<0.000000e+00> : vector<24x24xf32>
    %81 = tpu.matmul %80, %23, %cst_38 {dimension_numbers = #tpu.dot_dimension_numbers<[1], [1], [0], [0], [0, 0, 1, 0], [], []>} : vector<24x128xf32>, vector<24x128xf32>, vector<24x24xf32> -> vector<24x24xf32>
    %cst_39 = arith.constant 0.353553385 : f32
    %82 = vector.broadcast %cst_39 : f32 to vector<24x24xf32>
    %83 = arith.mulf %81, %82 : vector<24x24xf32>
    %84 = arith.addf %83, %1 : vector<24x24xf32>
    %cst_40 = arith.constant dense<0xFF800000> : vector<24xf32>
    %85 = vector.multi_reduction <maximumf>, %84, %cst_40 [1] : vector<24x24xf32> to vector<24xf32>
    %86 = vector.shape_cast %85 : vector<24xf32> to vector<24x1xf32>
    %87 = vector.broadcast %86 : vector<24x1xf32> to vector<24x24xf32>
    %88 = arith.subf %84, %87 : vector<24x24xf32>
    %89 = math.exp %88 : vector<24x24xf32>
    %cst_41 = arith.constant dense<0.000000e+00> : vector<24xf32>
    %90 = vector.multi_reduction <add>, %89, %cst_41 [1] : vector<24x24xf32> to vector<24xf32>
    %91 = vector.shape_cast %90 : vector<24xf32> to vector<24x1xf32>
    %92 = tpu.reciprocal %91 {approx = true} : vector<24x1xf32> -> vector<24x1xf32>
    %93 = arith.mulf %91, %92 : vector<24x1xf32>
    %cst_42 = arith.constant 2.000000e+00 : f32
    %94 = vector.broadcast %cst_42 : f32 to vector<24x1xf32>
    %95 = arith.subf %94, %93 : vector<24x1xf32>
    %96 = arith.mulf %92, %95 : vector<24x1xf32>
    %97 = vector.broadcast %96 : vector<24x1xf32> to vector<24x24xf32>
    %98 = arith.mulf %89, %97 : vector<24x24xf32>
    %99 = vector.broadcast %78 : vector<1x128xf32> to vector<24x128xf32>
    %100 = arith.mulf %26, %99 : vector<24x128xf32>
    %cst_43 = arith.constant dense<0.000000e+00> : vector<24x128xf32>
    %101 = tpu.matmul %98, %100, %cst_43 {dimension_numbers = #tpu.dot_dimension_numbers<[1], [0], [0], [1], [0, 0, 1, 1], [], []>} : vector<24x24xf32>, vector<24x128xf32>, vector<24x128xf32> -> vector<24x128xf32>
    %102 = arith.addf %77, %101 : vector<24x128xf32>
    %c1707 = arith.constant 1707 : index
    %c0_44 = arith.constant 0 : index
    %103 = vector.load %arg2[%c1707, %c0_44] : memref<1712x128xf32, #tpu.memory_space<vmem>>, vector<1x128xf32>
    %104 = vector.broadcast %103 : vector<1x128xf32> to vector<24x128xf32>
    %105 = arith.mulf %20, %104 : vector<24x128xf32>
    %cst_45 = arith.constant dense<0.000000e+00> : vector<24x24xf32>
    %106 = tpu.matmul %105, %23, %cst_45 {dimension_numbers = #tpu.dot_dimension_numbers<[1], [1], [0], [0], [0, 0, 1, 0], [], []>} : vector<24x128xf32>, vector<24x128xf32>, vector<24x24xf32> -> vector<24x24xf32>
    %cst_46 = arith.constant 0.353553385 : f32
    %107 = vector.broadcast %cst_46 : f32 to vector<24x24xf32>
    %108 = arith.mulf %106, %107 : vector<24x24xf32>
    %109 = arith.addf %108, %1 : vector<24x24xf32>
    %cst_47 = arith.constant dense<0xFF800000> : vector<24xf32>
    %110 = vector.multi_reduction <maximumf>, %109, %cst_47 [1] : vector<24x24xf32> to vector<24xf32>
    %111 = vector.shape_cast %110 : vector<24xf32> to vector<24x1xf32>
    %112 = vector.broadcast %111 : vector<24x1xf32> to vector<24x24xf32>
    %113 = arith.subf %109, %112 : vector<24x24xf32>
    %114 = math.exp %113 : vector<24x24xf32>
    %cst_48 = arith.constant dense<0.000000e+00> : vector<24xf32>
    %115 = vector.multi_reduction <add>, %114, %cst_48 [1] : vector<24x24xf32> to vector<24xf32>
    %116 = vector.shape_cast %115 : vector<24xf32> to vector<24x1xf32>
    %117 = tpu.reciprocal %116 {approx = true} : vector<24x1xf32> -> vector<24x1xf32>
    %118 = arith.mulf %116, %117 : vector<24x1xf32>
    %cst_49 = arith.constant 2.000000e+00 : f32
    %119 = vector.broadcast %cst_49 : f32 to vector<24x1xf32>
    %120 = arith.subf %119, %118 : vector<24x1xf32>
    %121 = arith.mulf %117, %120 : vector<24x1xf32>
    %122 = vector.broadcast %121 : vector<24x1xf32> to vector<24x24xf32>
    %123 = arith.mulf %114, %122 : vector<24x24xf32>
    %124 = vector.broadcast %103 : vector<1x128xf32> to vector<24x128xf32>
    %125 = arith.mulf %26, %124 : vector<24x128xf32>
    %cst_50 = arith.constant dense<0.000000e+00> : vector<24x128xf32>
    %126 = tpu.matmul %123, %125, %cst_50 {dimension_numbers = #tpu.dot_dimension_numbers<[1], [0], [0], [1], [0, 0, 1, 1], [], []>} : vector<24x24xf32>, vector<24x128xf32>, vector<24x128xf32> -> vector<24x128xf32>
    %127 = arith.addf %102, %126 : vector<24x128xf32>
    %cst_51 = arith.constant dense<0.000000e+00> : vector<24x128xf32>
    %128 = tpu.matmul %127, %5, %cst_51 {dimension_numbers = #tpu.dot_dimension_numbers<[1], [0], [0], [1], [0, 0, 1, 1], [], []>} : vector<24x128xf32>, vector<128x128xf32>, vector<24x128xf32> -> vector<24x128xf32>
    %129 = vector.broadcast %11 : vector<1x128xf32> to vector<24x128xf32>
    %130 = arith.addf %128, %129 : vector<24x128xf32>
    %131 = arith.addf %0, %130 : vector<24x128xf32>
    %cst_52 = arith.constant dense<0.000000e+00> : vector<24xf32>
    %132 = vector.multi_reduction <add>, %131, %cst_52 [1] : vector<24x128xf32> to vector<24xf32>
    %133 = vector.shape_cast %132 : vector<24xf32> to vector<24x1xf32>
    %cst_53 = arith.constant 3.125000e-02 : f32
    %134 = vector.broadcast %cst_53 : f32 to vector<24x1xf32>
    %135 = arith.mulf %133, %134 : vector<24x1xf32>
    %136 = arith.mulf %131, %131 : vector<24x128xf32>
    %cst_54 = arith.constant dense<0.000000e+00> : vector<24xf32>
    %137 = vector.multi_reduction <add>, %136, %cst_54 [1] : vector<24x128xf32> to vector<24xf32>
    %138 = vector.shape_cast %137 : vector<24xf32> to vector<24x1xf32>
    %cst_55 = arith.constant 3.125000e-02 : f32
    %139 = vector.broadcast %cst_55 : f32 to vector<24x1xf32>
    %140 = arith.mulf %138, %139 : vector<24x1xf32>
    %141 = arith.mulf %135, %135 : vector<24x1xf32>
    %142 = arith.subf %140, %141 : vector<24x1xf32>
    %143 = vector.broadcast %135 : vector<24x1xf32> to vector<24x128xf32>
    %144 = arith.subf %131, %143 : vector<24x128xf32>
    %cst_56 = arith.constant 9.99999974E-6 : f32
    %145 = vector.broadcast %cst_56 : f32 to vector<24x1xf32>
    %146 = arith.addf %142, %145 : vector<24x1xf32>
    %147 = math.rsqrt %146 : vector<24x1xf32>
    %148 = vector.broadcast %147 : vector<24x1xf32> to vector<24x128xf32>
    %149 = arith.mulf %144, %148 : vector<24x128xf32>
    %150 = vector.broadcast %12 : vector<1x128xf32> to vector<24x128xf32>
    %151 = arith.mulf %149, %150 : vector<24x128xf32>
    %152 = vector.broadcast %13 : vector<1x128xf32> to vector<24x128xf32>
    %153 = arith.addf %151, %152 : vector<24x128xf32>
    %cst_57 = arith.constant dense<0.000000e+00> : vector<24x128xf32>
    %154 = tpu.matmul %153, %6, %cst_57 {dimension_numbers = #tpu.dot_dimension_numbers<[1], [0], [0], [1], [0, 0, 1, 1], [], []>} : vector<24x128xf32>, vector<128x128xf32>, vector<24x128xf32> -> vector<24x128xf32>
    %155 = vector.broadcast %16 : vector<1x128xf32> to vector<24x128xf32>
    %156 = arith.addf %154, %155 : vector<24x128xf32>
    %cst_58 = arith.constant 0.000000e+00 : f32
    %157 = vector.broadcast %cst_58 : f32 to vector<24x128xf32>
    %158 = arith.maximumf %156, %157 : vector<24x128xf32>
    %cst_59 = arith.constant dense<0.000000e+00> : vector<24x128xf32>
    %159 = tpu.matmul %158, %7, %cst_59 {dimension_numbers = #tpu.dot_dimension_numbers<[1], [0], [0], [1], [0, 0, 1, 1], [], []>} : vector<24x128xf32>, vector<128x128xf32>, vector<24x128xf32> -> vector<24x128xf32>
    %160 = vector.broadcast %17 : vector<1x128xf32> to vector<24x128xf32>
    %161 = arith.addf %159, %160 : vector<24x128xf32>
    %162 = arith.addf %153, %161 : vector<24x128xf32>
    %cst_60 = arith.constant dense<0.000000e+00> : vector<24xf32>
    %163 = vector.multi_reduction <add>, %162, %cst_60 [1] : vector<24x128xf32> to vector<24xf32>
    %164 = vector.shape_cast %163 : vector<24xf32> to vector<24x1xf32>
    %cst_61 = arith.constant 3.125000e-02 : f32
    %165 = vector.broadcast %cst_61 : f32 to vector<24x1xf32>
    %166 = arith.mulf %164, %165 : vector<24x1xf32>
    %167 = arith.mulf %162, %162 : vector<24x128xf32>
    %cst_62 = arith.constant dense<0.000000e+00> : vector<24xf32>
    %168 = vector.multi_reduction <add>, %167, %cst_62 [1] : vector<24x128xf32> to vector<24xf32>
    %169 = vector.shape_cast %168 : vector<24xf32> to vector<24x1xf32>
    %cst_63 = arith.constant 3.125000e-02 : f32
    %170 = vector.broadcast %cst_63 : f32 to vector<24x1xf32>
    %171 = arith.mulf %169, %170 : vector<24x1xf32>
    %172 = arith.mulf %166, %166 : vector<24x1xf32>
    %173 = arith.subf %171, %172 : vector<24x1xf32>
    %174 = vector.broadcast %166 : vector<24x1xf32> to vector<24x128xf32>
    %175 = arith.subf %162, %174 : vector<24x128xf32>
    %cst_64 = arith.constant 9.99999974E-6 : f32
    %176 = vector.broadcast %cst_64 : f32 to vector<24x1xf32>
    %177 = arith.addf %173, %176 : vector<24x1xf32>
    %178 = math.rsqrt %177 : vector<24x1xf32>
    %179 = vector.broadcast %178 : vector<24x1xf32> to vector<24x128xf32>
    %180 = arith.mulf %175, %179 : vector<24x128xf32>
    %181 = vector.broadcast %14 : vector<1x128xf32> to vector<24x128xf32>
    %182 = arith.mulf %180, %181 : vector<24x128xf32>
    %183 = vector.broadcast %15 : vector<1x128xf32> to vector<24x128xf32>
    %184 = arith.addf %182, %183 : vector<24x128xf32>
    %c784 = arith.constant 784 : index
    %c0_65 = arith.constant 0 : index
    %185 = vector.load %arg2[%c784, %c0_65] : memref<1712x128xf32, #tpu.memory_space<vmem>>, vector<128x128xf32>
    %c912 = arith.constant 912 : index
    %c0_66 = arith.constant 0 : index
    %186 = vector.load %arg2[%c912, %c0_66] : memref<1712x128xf32, #tpu.memory_space<vmem>>, vector<128x128xf32>
    %c1040 = arith.constant 1040 : index
    %c0_67 = arith.constant 0 : index
    %187 = vector.load %arg2[%c1040, %c0_67] : memref<1712x128xf32, #tpu.memory_space<vmem>>, vector<128x128xf32>
    %c1168 = arith.constant 1168 : index
    %c0_68 = arith.constant 0 : index
    %188 = vector.load %arg2[%c1168, %c0_68] : memref<1712x128xf32, #tpu.memory_space<vmem>>, vector<128x128xf32>
    %c1296 = arith.constant 1296 : index
    %c0_69 = arith.constant 0 : index
    %189 = vector.load %arg2[%c1296, %c0_69] : memref<1712x128xf32, #tpu.memory_space<vmem>>, vector<128x128xf32>
    %c1424 = arith.constant 1424 : index
    %c0_70 = arith.constant 0 : index
    %190 = vector.load %arg2[%c1424, %c0_70] : memref<1712x128xf32, #tpu.memory_space<vmem>>, vector<128x128xf32>
    %c1552 = arith.constant 1552 : index
    %c0_71 = arith.constant 0 : index
    %191 = vector.load %arg2[%c1552, %c0_71] : memref<1712x128xf32, #tpu.memory_space<vmem>>, vector<1x128xf32>
    %c1553 = arith.constant 1553 : index
    %c0_72 = arith.constant 0 : index
    %192 = vector.load %arg2[%c1553, %c0_72] : memref<1712x128xf32, #tpu.memory_space<vmem>>, vector<1x128xf32>
    %c1554 = arith.constant 1554 : index
    %c0_73 = arith.constant 0 : index
    %193 = vector.load %arg2[%c1554, %c0_73] : memref<1712x128xf32, #tpu.memory_space<vmem>>, vector<1x128xf32>
    %c1555 = arith.constant 1555 : index
    %c0_74 = arith.constant 0 : index
    %194 = vector.load %arg2[%c1555, %c0_74] : memref<1712x128xf32, #tpu.memory_space<vmem>>, vector<1x128xf32>
    %c1556 = arith.constant 1556 : index
    %c0_75 = arith.constant 0 : index
    %195 = vector.load %arg2[%c1556, %c0_75] : memref<1712x128xf32, #tpu.memory_space<vmem>>, vector<1x128xf32>
    %c1557 = arith.constant 1557 : index
    %c0_76 = arith.constant 0 : index
    %196 = vector.load %arg2[%c1557, %c0_76] : memref<1712x128xf32, #tpu.memory_space<vmem>>, vector<1x128xf32>
    %c1558 = arith.constant 1558 : index
    %c0_77 = arith.constant 0 : index
    %197 = vector.load %arg2[%c1558, %c0_77] : memref<1712x128xf32, #tpu.memory_space<vmem>>, vector<1x128xf32>
    %c1559 = arith.constant 1559 : index
    %c0_78 = arith.constant 0 : index
    %198 = vector.load %arg2[%c1559, %c0_78] : memref<1712x128xf32, #tpu.memory_space<vmem>>, vector<1x128xf32>
    %c1560 = arith.constant 1560 : index
    %c0_79 = arith.constant 0 : index
    %199 = vector.load %arg2[%c1560, %c0_79] : memref<1712x128xf32, #tpu.memory_space<vmem>>, vector<1x128xf32>
    %c1561 = arith.constant 1561 : index
    %c0_80 = arith.constant 0 : index
    %200 = vector.load %arg2[%c1561, %c0_80] : memref<1712x128xf32, #tpu.memory_space<vmem>>, vector<1x128xf32>
    %cst_81 = arith.constant dense<0.000000e+00> : vector<24x128xf32>
    %201 = tpu.matmul %184, %185, %cst_81 {dimension_numbers = #tpu.dot_dimension_numbers<[1], [0], [0], [1], [0, 0, 1, 1], [], []>} : vector<24x128xf32>, vector<128x128xf32>, vector<24x128xf32> -> vector<24x128xf32>
    %202 = vector.broadcast %191 : vector<1x128xf32> to vector<24x128xf32>
    %203 = arith.addf %201, %202 : vector<24x128xf32>
    %cst_82 = arith.constant dense<0.000000e+00> : vector<24x128xf32>
    %204 = tpu.matmul %184, %186, %cst_82 {dimension_numbers = #tpu.dot_dimension_numbers<[1], [0], [0], [1], [0, 0, 1, 1], [], []>} : vector<24x128xf32>, vector<128x128xf32>, vector<24x128xf32> -> vector<24x128xf32>
    %205 = vector.broadcast %192 : vector<1x128xf32> to vector<24x128xf32>
    %206 = arith.addf %204, %205 : vector<24x128xf32>
    %cst_83 = arith.constant dense<0.000000e+00> : vector<24x128xf32>
    %207 = tpu.matmul %184, %187, %cst_83 {dimension_numbers = #tpu.dot_dimension_numbers<[1], [0], [0], [1], [0, 0, 1, 1], [], []>} : vector<24x128xf32>, vector<128x128xf32>, vector<24x128xf32> -> vector<24x128xf32>
    %208 = vector.broadcast %193 : vector<1x128xf32> to vector<24x128xf32>
    %209 = arith.addf %207, %208 : vector<24x128xf32>
    %cst_84 = arith.constant 0.000000e+00 : f32
    %210 = vector.broadcast %cst_84 : f32 to vector<24x128xf32>
    %c1704_85 = arith.constant 1704 : index
    %c0_86 = arith.constant 0 : index
    %211 = vector.load %arg2[%c1704_85, %c0_86] : memref<1712x128xf32, #tpu.memory_space<vmem>>, vector<1x128xf32>
    %212 = vector.broadcast %211 : vector<1x128xf32> to vector<24x128xf32>
    %213 = arith.mulf %203, %212 : vector<24x128xf32>
    %cst_87 = arith.constant dense<0.000000e+00> : vector<24x24xf32>
    %214 = tpu.matmul %213, %206, %cst_87 {dimension_numbers = #tpu.dot_dimension_numbers<[1], [1], [0], [0], [0, 0, 1, 0], [], []>} : vector<24x128xf32>, vector<24x128xf32>, vector<24x24xf32> -> vector<24x24xf32>
    %cst_88 = arith.constant 0.353553385 : f32
    %215 = vector.broadcast %cst_88 : f32 to vector<24x24xf32>
    %216 = arith.mulf %214, %215 : vector<24x24xf32>
    %217 = arith.addf %216, %1 : vector<24x24xf32>
    %cst_89 = arith.constant dense<0xFF800000> : vector<24xf32>
    %218 = vector.multi_reduction <maximumf>, %217, %cst_89 [1] : vector<24x24xf32> to vector<24xf32>
    %219 = vector.shape_cast %218 : vector<24xf32> to vector<24x1xf32>
    %220 = vector.broadcast %219 : vector<24x1xf32> to vector<24x24xf32>
    %221 = arith.subf %217, %220 : vector<24x24xf32>
    %222 = math.exp %221 : vector<24x24xf32>
    %cst_90 = arith.constant dense<0.000000e+00> : vector<24xf32>
    %223 = vector.multi_reduction <add>, %222, %cst_90 [1] : vector<24x24xf32> to vector<24xf32>
    %224 = vector.shape_cast %223 : vector<24xf32> to vector<24x1xf32>
    %225 = tpu.reciprocal %224 {approx = true} : vector<24x1xf32> -> vector<24x1xf32>
    %226 = arith.mulf %224, %225 : vector<24x1xf32>
    %cst_91 = arith.constant 2.000000e+00 : f32
    %227 = vector.broadcast %cst_91 : f32 to vector<24x1xf32>
    %228 = arith.subf %227, %226 : vector<24x1xf32>
    %229 = arith.mulf %225, %228 : vector<24x1xf32>
    %230 = vector.broadcast %229 : vector<24x1xf32> to vector<24x24xf32>
    %231 = arith.mulf %222, %230 : vector<24x24xf32>
    %232 = vector.broadcast %211 : vector<1x128xf32> to vector<24x128xf32>
    %233 = arith.mulf %209, %232 : vector<24x128xf32>
    %cst_92 = arith.constant dense<0.000000e+00> : vector<24x128xf32>
    %234 = tpu.matmul %231, %233, %cst_92 {dimension_numbers = #tpu.dot_dimension_numbers<[1], [0], [0], [1], [0, 0, 1, 1], [], []>} : vector<24x24xf32>, vector<24x128xf32>, vector<24x128xf32> -> vector<24x128xf32>
    %235 = arith.addf %210, %234 : vector<24x128xf32>
    %c1705_93 = arith.constant 1705 : index
    %c0_94 = arith.constant 0 : index
    %236 = vector.load %arg2[%c1705_93, %c0_94] : memref<1712x128xf32, #tpu.memory_space<vmem>>, vector<1x128xf32>
    %237 = vector.broadcast %236 : vector<1x128xf32> to vector<24x128xf32>
    %238 = arith.mulf %203, %237 : vector<24x128xf32>
    %cst_95 = arith.constant dense<0.000000e+00> : vector<24x24xf32>
    %239 = tpu.matmul %238, %206, %cst_95 {dimension_numbers = #tpu.dot_dimension_numbers<[1], [1], [0], [0], [0, 0, 1, 0], [], []>} : vector<24x128xf32>, vector<24x128xf32>, vector<24x24xf32> -> vector<24x24xf32>
    %cst_96 = arith.constant 0.353553385 : f32
    %240 = vector.broadcast %cst_96 : f32 to vector<24x24xf32>
    %241 = arith.mulf %239, %240 : vector<24x24xf32>
    %242 = arith.addf %241, %1 : vector<24x24xf32>
    %cst_97 = arith.constant dense<0xFF800000> : vector<24xf32>
    %243 = vector.multi_reduction <maximumf>, %242, %cst_97 [1] : vector<24x24xf32> to vector<24xf32>
    %244 = vector.shape_cast %243 : vector<24xf32> to vector<24x1xf32>
    %245 = vector.broadcast %244 : vector<24x1xf32> to vector<24x24xf32>
    %246 = arith.subf %242, %245 : vector<24x24xf32>
    %247 = math.exp %246 : vector<24x24xf32>
    %cst_98 = arith.constant dense<0.000000e+00> : vector<24xf32>
    %248 = vector.multi_reduction <add>, %247, %cst_98 [1] : vector<24x24xf32> to vector<24xf32>
    %249 = vector.shape_cast %248 : vector<24xf32> to vector<24x1xf32>
    %250 = tpu.reciprocal %249 {approx = true} : vector<24x1xf32> -> vector<24x1xf32>
    %251 = arith.mulf %249, %250 : vector<24x1xf32>
    %cst_99 = arith.constant 2.000000e+00 : f32
    %252 = vector.broadcast %cst_99 : f32 to vector<24x1xf32>
    %253 = arith.subf %252, %251 : vector<24x1xf32>
    %254 = arith.mulf %250, %253 : vector<24x1xf32>
    %255 = vector.broadcast %254 : vector<24x1xf32> to vector<24x24xf32>
    %256 = arith.mulf %247, %255 : vector<24x24xf32>
    %257 = vector.broadcast %236 : vector<1x128xf32> to vector<24x128xf32>
    %258 = arith.mulf %209, %257 : vector<24x128xf32>
    %cst_100 = arith.constant dense<0.000000e+00> : vector<24x128xf32>
    %259 = tpu.matmul %256, %258, %cst_100 {dimension_numbers = #tpu.dot_dimension_numbers<[1], [0], [0], [1], [0, 0, 1, 1], [], []>} : vector<24x24xf32>, vector<24x128xf32>, vector<24x128xf32> -> vector<24x128xf32>
    %260 = arith.addf %235, %259 : vector<24x128xf32>
    %c1706_101 = arith.constant 1706 : index
    %c0_102 = arith.constant 0 : index
    %261 = vector.load %arg2[%c1706_101, %c0_102] : memref<1712x128xf32, #tpu.memory_space<vmem>>, vector<1x128xf32>
    %262 = vector.broadcast %261 : vector<1x128xf32> to vector<24x128xf32>
    %263 = arith.mulf %203, %262 : vector<24x128xf32>
    %cst_103 = arith.constant dense<0.000000e+00> : vector<24x24xf32>
    %264 = tpu.matmul %263, %206, %cst_103 {dimension_numbers = #tpu.dot_dimension_numbers<[1], [1], [0], [0], [0, 0, 1, 0], [], []>} : vector<24x128xf32>, vector<24x128xf32>, vector<24x24xf32> -> vector<24x24xf32>
    %cst_104 = arith.constant 0.353553385 : f32
    %265 = vector.broadcast %cst_104 : f32 to vector<24x24xf32>
    %266 = arith.mulf %264, %265 : vector<24x24xf32>
    %267 = arith.addf %266, %1 : vector<24x24xf32>
    %cst_105 = arith.constant dense<0xFF800000> : vector<24xf32>
    %268 = vector.multi_reduction <maximumf>, %267, %cst_105 [1] : vector<24x24xf32> to vector<24xf32>
    %269 = vector.shape_cast %268 : vector<24xf32> to vector<24x1xf32>
    %270 = vector.broadcast %269 : vector<24x1xf32> to vector<24x24xf32>
    %271 = arith.subf %267, %270 : vector<24x24xf32>
    %272 = math.exp %271 : vector<24x24xf32>
    %cst_106 = arith.constant dense<0.000000e+00> : vector<24xf32>
    %273 = vector.multi_reduction <add>, %272, %cst_106 [1] : vector<24x24xf32> to vector<24xf32>
    %274 = vector.shape_cast %273 : vector<24xf32> to vector<24x1xf32>
    %275 = tpu.reciprocal %274 {approx = true} : vector<24x1xf32> -> vector<24x1xf32>
    %276 = arith.mulf %274, %275 : vector<24x1xf32>
    %cst_107 = arith.constant 2.000000e+00 : f32
    %277 = vector.broadcast %cst_107 : f32 to vector<24x1xf32>
    %278 = arith.subf %277, %276 : vector<24x1xf32>
    %279 = arith.mulf %275, %278 : vector<24x1xf32>
    %280 = vector.broadcast %279 : vector<24x1xf32> to vector<24x24xf32>
    %281 = arith.mulf %272, %280 : vector<24x24xf32>
    %282 = vector.broadcast %261 : vector<1x128xf32> to vector<24x128xf32>
    %283 = arith.mulf %209, %282 : vector<24x128xf32>
    %cst_108 = arith.constant dense<0.000000e+00> : vector<24x128xf32>
    %284 = tpu.matmul %281, %283, %cst_108 {dimension_numbers = #tpu.dot_dimension_numbers<[1], [0], [0], [1], [0, 0, 1, 1], [], []>} : vector<24x24xf32>, vector<24x128xf32>, vector<24x128xf32> -> vector<24x128xf32>
    %285 = arith.addf %260, %284 : vector<24x128xf32>
    %c1707_109 = arith.constant 1707 : index
    %c0_110 = arith.constant 0 : index
    %286 = vector.load %arg2[%c1707_109, %c0_110] : memref<1712x128xf32, #tpu.memory_space<vmem>>, vector<1x128xf32>
    %287 = vector.broadcast %286 : vector<1x128xf32> to vector<24x128xf32>
    %288 = arith.mulf %203, %287 : vector<24x128xf32>
    %cst_111 = arith.constant dense<0.000000e+00> : vector<24x24xf32>
    %289 = tpu.matmul %288, %206, %cst_111 {dimension_numbers = #tpu.dot_dimension_numbers<[1], [1], [0], [0], [0, 0, 1, 0], [], []>} : vector<24x128xf32>, vector<24x128xf32>, vector<24x24xf32> -> vector<24x24xf32>
    %cst_112 = arith.constant 0.353553385 : f32
    %290 = vector.broadcast %cst_112 : f32 to vector<24x24xf32>
    %291 = arith.mulf %289, %290 : vector<24x24xf32>
    %292 = arith.addf %291, %1 : vector<24x24xf32>
    %cst_113 = arith.constant dense<0xFF800000> : vector<24xf32>
    %293 = vector.multi_reduction <maximumf>, %292, %cst_113 [1] : vector<24x24xf32> to vector<24xf32>
    %294 = vector.shape_cast %293 : vector<24xf32> to vector<24x1xf32>
    %295 = vector.broadcast %294 : vector<24x1xf32> to vector<24x24xf32>
    %296 = arith.subf %292, %295 : vector<24x24xf32>
    %297 = math.exp %296 : vector<24x24xf32>
    %cst_114 = arith.constant dense<0.000000e+00> : vector<24xf32>
    %298 = vector.multi_reduction <add>, %297, %cst_114 [1] : vector<24x24xf32> to vector<24xf32>
    %299 = vector.shape_cast %298 : vector<24xf32> to vector<24x1xf32>
    %300 = tpu.reciprocal %299 {approx = true} : vector<24x1xf32> -> vector<24x1xf32>
    %301 = arith.mulf %299, %300 : vector<24x1xf32>
    %cst_115 = arith.constant 2.000000e+00 : f32
    %302 = vector.broadcast %cst_115 : f32 to vector<24x1xf32>
    %303 = arith.subf %302, %301 : vector<24x1xf32>
    %304 = arith.mulf %300, %303 : vector<24x1xf32>
    %305 = vector.broadcast %304 : vector<24x1xf32> to vector<24x24xf32>
    %306 = arith.mulf %297, %305 : vector<24x24xf32>
    %307 = vector.broadcast %286 : vector<1x128xf32> to vector<24x128xf32>
    %308 = arith.mulf %209, %307 : vector<24x128xf32>
    %cst_116 = arith.constant dense<0.000000e+00> : vector<24x128xf32>
    %309 = tpu.matmul %306, %308, %cst_116 {dimension_numbers = #tpu.dot_dimension_numbers<[1], [0], [0], [1], [0, 0, 1, 1], [], []>} : vector<24x24xf32>, vector<24x128xf32>, vector<24x128xf32> -> vector<24x128xf32>
    %310 = arith.addf %285, %309 : vector<24x128xf32>
    %cst_117 = arith.constant dense<0.000000e+00> : vector<24x128xf32>
    %311 = tpu.matmul %310, %188, %cst_117 {dimension_numbers = #tpu.dot_dimension_numbers<[1], [0], [0], [1], [0, 0, 1, 1], [], []>} : vector<24x128xf32>, vector<128x128xf32>, vector<24x128xf32> -> vector<24x128xf32>
    %312 = vector.broadcast %194 : vector<1x128xf32> to vector<24x128xf32>
    %313 = arith.addf %311, %312 : vector<24x128xf32>
    %314 = arith.addf %184, %313 : vector<24x128xf32>
    %cst_118 = arith.constant dense<0.000000e+00> : vector<24xf32>
    %315 = vector.multi_reduction <add>, %314, %cst_118 [1] : vector<24x128xf32> to vector<24xf32>
    %316 = vector.shape_cast %315 : vector<24xf32> to vector<24x1xf32>
    %cst_119 = arith.constant 3.125000e-02 : f32
    %317 = vector.broadcast %cst_119 : f32 to vector<24x1xf32>
    %318 = arith.mulf %316, %317 : vector<24x1xf32>
    %319 = arith.mulf %314, %314 : vector<24x128xf32>
    %cst_120 = arith.constant dense<0.000000e+00> : vector<24xf32>
    %320 = vector.multi_reduction <add>, %319, %cst_120 [1] : vector<24x128xf32> to vector<24xf32>
    %321 = vector.shape_cast %320 : vector<24xf32> to vector<24x1xf32>
    %cst_121 = arith.constant 3.125000e-02 : f32
    %322 = vector.broadcast %cst_121 : f32 to vector<24x1xf32>
    %323 = arith.mulf %321, %322 : vector<24x1xf32>
    %324 = arith.mulf %318, %318 : vector<24x1xf32>
    %325 = arith.subf %323, %324 : vector<24x1xf32>
    %326 = vector.broadcast %318 : vector<24x1xf32> to vector<24x128xf32>
    %327 = arith.subf %314, %326 : vector<24x128xf32>
    %cst_122 = arith.constant 9.99999974E-6 : f32
    %328 = vector.broadcast %cst_122 : f32 to vector<24x1xf32>
    %329 = arith.addf %325, %328 : vector<24x1xf32>
    %330 = math.rsqrt %329 : vector<24x1xf32>
    %331 = vector.broadcast %330 : vector<24x1xf32> to vector<24x128xf32>
    %332 = arith.mulf %327, %331 : vector<24x128xf32>
    %333 = vector.broadcast %195 : vector<1x128xf32> to vector<24x128xf32>
    %334 = arith.mulf %332, %333 : vector<24x128xf32>
    %335 = vector.broadcast %196 : vector<1x128xf32> to vector<24x128xf32>
    %336 = arith.addf %334, %335 : vector<24x128xf32>
    %cst_123 = arith.constant dense<0.000000e+00> : vector<24x128xf32>
    %337 = tpu.matmul %336, %189, %cst_123 {dimension_numbers = #tpu.dot_dimension_numbers<[1], [0], [0], [1], [0, 0, 1, 1], [], []>} : vector<24x128xf32>, vector<128x128xf32>, vector<24x128xf32> -> vector<24x128xf32>
    %338 = vector.broadcast %199 : vector<1x128xf32> to vector<24x128xf32>
    %339 = arith.addf %337, %338 : vector<24x128xf32>
    %cst_124 = arith.constant 0.000000e+00 : f32
    %340 = vector.broadcast %cst_124 : f32 to vector<24x128xf32>
    %341 = arith.maximumf %339, %340 : vector<24x128xf32>
    %cst_125 = arith.constant dense<0.000000e+00> : vector<24x128xf32>
    %342 = tpu.matmul %341, %190, %cst_125 {dimension_numbers = #tpu.dot_dimension_numbers<[1], [0], [0], [1], [0, 0, 1, 1], [], []>} : vector<24x128xf32>, vector<128x128xf32>, vector<24x128xf32> -> vector<24x128xf32>
    %343 = vector.broadcast %200 : vector<1x128xf32> to vector<24x128xf32>
    %344 = arith.addf %342, %343 : vector<24x128xf32>
    %345 = arith.addf %336, %344 : vector<24x128xf32>
    %cst_126 = arith.constant dense<0.000000e+00> : vector<24xf32>
    %346 = vector.multi_reduction <add>, %345, %cst_126 [1] : vector<24x128xf32> to vector<24xf32>
    %347 = vector.shape_cast %346 : vector<24xf32> to vector<24x1xf32>
    %cst_127 = arith.constant 3.125000e-02 : f32
    %348 = vector.broadcast %cst_127 : f32 to vector<24x1xf32>
    %349 = arith.mulf %347, %348 : vector<24x1xf32>
    %350 = arith.mulf %345, %345 : vector<24x128xf32>
    %cst_128 = arith.constant dense<0.000000e+00> : vector<24xf32>
    %351 = vector.multi_reduction <add>, %350, %cst_128 [1] : vector<24x128xf32> to vector<24xf32>
    %352 = vector.shape_cast %351 : vector<24xf32> to vector<24x1xf32>
    %cst_129 = arith.constant 3.125000e-02 : f32
    %353 = vector.broadcast %cst_129 : f32 to vector<24x1xf32>
    %354 = arith.mulf %352, %353 : vector<24x1xf32>
    %355 = arith.mulf %349, %349 : vector<24x1xf32>
    %356 = arith.subf %354, %355 : vector<24x1xf32>
    %357 = vector.broadcast %349 : vector<24x1xf32> to vector<24x128xf32>
    %358 = arith.subf %345, %357 : vector<24x128xf32>
    %cst_130 = arith.constant 9.99999974E-6 : f32
    %359 = vector.broadcast %cst_130 : f32 to vector<24x1xf32>
    %360 = arith.addf %356, %359 : vector<24x1xf32>
    %361 = math.rsqrt %360 : vector<24x1xf32>
    %362 = vector.broadcast %361 : vector<24x1xf32> to vector<24x128xf32>
    %363 = arith.mulf %358, %362 : vector<24x128xf32>
    %364 = vector.broadcast %197 : vector<1x128xf32> to vector<24x128xf32>
    %365 = arith.mulf %363, %364 : vector<24x128xf32>
    %366 = vector.broadcast %198 : vector<1x128xf32> to vector<24x128xf32>
    %367 = arith.addf %365, %366 : vector<24x128xf32>
    %c1568 = arith.constant 1568 : index
    %c0_131 = arith.constant 0 : index
    %368 = vector.load %arg2[%c1568, %c0_131] : memref<1712x128xf32, #tpu.memory_space<vmem>>, vector<128x128xf32>
    %c1696 = arith.constant 1696 : index
    %c0_132 = arith.constant 0 : index
    %369 = vector.load %arg2[%c1696, %c0_132] : memref<1712x128xf32, #tpu.memory_space<vmem>>, vector<1x128xf32>
    %cst_133 = arith.constant dense<0.000000e+00> : vector<24x128xf32>
    %370 = tpu.matmul %367, %368, %cst_133 {dimension_numbers = #tpu.dot_dimension_numbers<[1], [0], [0], [1], [0, 0, 1, 1], [], []>} : vector<24x128xf32>, vector<128x128xf32>, vector<24x128xf32> -> vector<24x128xf32>
    %371 = vector.broadcast %369 : vector<1x128xf32> to vector<24x128xf32>
    %372 = arith.addf %370, %371 : vector<24x128xf32>
    %c0_134 = arith.constant 0 : index
    %c0_135 = arith.constant 0 : index
    %373 = vector.load %arg4[%c0_134, %c0_135] : memref<24x128xf32, #tpu.memory_space<vmem>>, vector<24x128xf32>
    tpu.vector_store %arg4[%c0_134, %c0_135], %372 {strides = array<i32>} : memref<24x128xf32, #tpu.memory_space<vmem>>, vector<24x128xf32>,
    return
  }
  func.func @transform_0(%arg0: i32) -> (i32, i32) {
    %c0_i32 = arith.constant 0 : i32
    %c0_i32_0 = arith.constant 0 : i32
    return %arg0, %c0_i32 : i32, i32
  }
  func.func @transform_1(%arg0: i32) -> (i32, i32) {
    %c0_i32 = arith.constant 0 : i32
    %c0_i32_0 = arith.constant 0 : i32
    %c0_i32_1 = arith.constant 0 : i32
    return %c0_i32, %c0_i32_0 : i32, i32
  }
  func.func @transform_2(%arg0: i32) -> (i32, i32) {
    %c0_i32 = arith.constant 0 : i32
    %c0_i32_0 = arith.constant 0 : i32
    %c0_i32_1 = arith.constant 0 : i32
    return %c0_i32, %c0_i32_0 : i32, i32
  }
  func.func @transform_3(%arg0: i32) -> (i32, i32) {
    %c0_i32 = arith.constant 0 : i32
    %c0_i32_0 = arith.constant 0 : i32
    return %arg0, %c0_i32 : i32, i32
  }
}

</mosaic_0001>

<bundles_post_ra>
// kernel: tpu_custom_call.1
= control target key start
LH: loop header
LB: loop body
LE: loop exit
PB: predicated region body
PF: predicated region fallthrough
CT: control target
= control target key end

     0   :  { %8 = vsyncpa [#allocation3], 0  ;;  %s6129_s0 = inlined_call_operand.hbm [shape: f32[24,128], index: 0, kind: input, shape index: {}]   ;;  %s6130_s1 = inlined_call_operand.hbm [shape: f32[1712,128], index: 1, kind: input, shape index: {}]   ;;  %s6131_s2 = inlined_call_operand.hbm [shape: f32[24,24], index: 2, kind: input, shape index: {}]   ;;  %s6132_s3 = inlined_call_operand.hbm [shape: f32[24,128], index: 3, kind: output, shape index: {}]  }
   0x1   :  { %9 = vsyncpa [#allocation6], 0 }
   0x2   :  { %10 = vsyncpa [#allocation4], 0  ;;  %s5245_s12 = smov [#allocation5]   ;;  %s5246_s14 = smov [#allocation2]  }
   0x3   :  { %s28_s13 = sshll.u32 %s5245_s12, 4  ;;  %s16_s15 = sshll.u32 %s5246_s14, 4  ;;  %s29_s13 = int_to_ptr.vmem [resolvable:$true] %s28_s13  ;;  %s5274_s15 = int_to_ptr.vmem [resolvable:$true] %s16_s15 }
   0x4   :  { %s5151_s18 = scalar_lea.hbm %s6130_s1, 27392 }
   0x5   :  { %p5152_p0 = scmp.ne.s32.totalorder %s6130_s1, %s5151_s18  ;;  %p5155_p1 = scmp.lt.u32.totalorder %s5151_s18, %s6130_s1 }
   0x7   :  { %p5157_p2 = pnand %p5155_p1, %p5152_p0 }
   0x9   :  { %5160 = shalt.err (!%p5157_p2)
}
   0xa   :  { %s5161_s23 = scalar_lea.vmem %s29_s13, 27392  ;;  %p5166_p4 = scmp.lt.s32.totalorder %s29_s13, %s29_s13 }
   0xb   :  { %p5162_p3 = scmp.ne.s32.totalorder %s29_s13, %s5161_s23  ;;  %p5167_p5 = scmp.lt.s32.totalorder %s5161_s23, %s5161_s23 }
   0xd   :  { %p5168_p6 = por %p5167_p5, %p5166_p4 }
   0xf   :  { %p5169_p7 = pnand %p5168_p6, %p5162_p3 }
  0x11   :  { %5172 = shalt.err (!%p5169_p7)
}
  0x12   :  { %s5247_s24 = smov 128   ;;  %s5248_s25 = smov 8  }
  0x13   :  { %34 = dma.hbm_to_vmem [thread:$0]  %s6130_s1, 27392, %s29_s13, [#allocation6], %s5247_s24, %s5247_s24, %s5248_s25  }
  0x14   :  { %s5173_s30 = scalar_lea.hbm %s6129_s0, 384 }
  0x15   :  { %p5174_p8 = scmp.ne.s32.totalorder %s6129_s0, %s5173_s30  ;;  %p5177_p9 = scmp.lt.u32.totalorder %s5173_s30, %s6129_s0 }
  0x17   :  { %p5179_p10 = pnand %p5177_p9, %p5174_p8 }
  0x19   :  { %5182 = shalt.err (!%p5179_p10)
}
  0x1a   :  { %s5183_s8 = scalar_lea.vmem %s5274_s15, 384  ;;  %p5188_p12 = scmp.lt.s32.totalorder %s5274_s15, %s5274_s15 }
  0x1b   :  { %p5184_p11 = scmp.ne.s32.totalorder %s5274_s15, %s5183_s8  ;;  %p5189_p13 = scmp.lt.s32.totalorder %s5183_s8, %s5183_s8 }
  0x1d   :  { %p5190_p0 = por %p5189_p13, %p5188_p12 }
  0x1f   :  { %p5191_p1 = pnand %p5190_p0, %p5184_p11 }
  0x21   :  { %5194 = shalt.err (!%p5191_p1)
}
  0x22   :  { %22 = dma.hbm_to_vmem [thread:$0]  %s6129_s0, 384, %s5274_s15, [#allocation3], %s5247_s24, %s5247_s24, %s5248_s25  }
  0x23   :  { %s5249_s10 = smov [#allocation7]   ;;  %s5195_s14 = scalar_lea.hbm %s6131_s2, 384 }
  0x24   :  { %s40_s11 = sshll.u32 %s5249_s10, 4  ;;  %p5196_p2 = scmp.ne.s32.totalorder %s6131_s2, %s5195_s14  ;;  %s41_s11 = int_to_ptr.vmem [resolvable:$true] %s40_s11 }
  0x25   :  { %p5199_p3 = scmp.lt.u32.totalorder %s5195_s14, %s6131_s2 }
  0x27   :  { %p5201_p4 = pnand %p5199_p3, %p5196_p2 }
  0x29   :  { %5204 = shalt.err (!%p5201_p4)
}
  0x2a   :  { %s5205_s20 = scalar_lea.vmem %s41_s11, 384  ;;  %p5210_p6 = scmp.lt.s32.totalorder %s41_s11, %s41_s11 }
  0x2b   :  { %p5206_p5 = scmp.ne.s32.totalorder %s41_s11, %s5205_s20  ;;  %p5211_p7 = scmp.lt.s32.totalorder %s5205_s20, %s5205_s20 }
  0x2d   :  { %p5212_p8 = por %p5211_p7, %p5210_p6 }
  0x2f   :  { %p5213_p9 = pnand %p5212_p8, %p5206_p5 }
  0x31   :  { %5216 = shalt.err (!%p5213_p9)
}
  0x32   :  { %46 = dma.hbm_to_vmem [thread:$0]  %s6131_s2, 384, %s41_s11, [#allocation6], %s5247_s24, %s5247_s24, %s5248_s25  }
  0x33   :  { %5239 = dma.done.wait [#allocation3], 384  }
  0x34   :  { %5240 = vsyncadd [#allocation3], 4294966912 }
  0x35   :  { %5241 = dma.done.wait [#allocation6], 27776  }
  0x36   :  { %5242 = vsyncadd [#allocation6], 4294939520  ;;  %v5250_v0 = vmov 0.0|0.0   ;;  %vm5251_vm0 = vmmov 0   ;;  %v5252_v1 = vmov 0.0   ;;  %v78_v2 = vld [vmem:[#allocation5 + $0x80] sm:$0xff] }
  0x37   :  { %4640 = vmatprep.subr.bf16.mxu1 %v5250_v0  ;;  %4616 = vmatprep.subr.bf16.mxu0 %v5250_v0  ;;  %v79_v3 = vld [vmem:[#allocation5 + $0x88] sm:$0xff]  ;;  %v80_v4 = vld [vmem:[#allocation5 + $0x90] sm:$0xff]  ;;  %v81_v6 = vld [vmem:[#allocation5 + $0x98] sm:$0xff]  ;;  %vm514_vm1 = vcmask 195584   ;;  %s5253_s2 = smov [#allocation8]  }
  0x38   :  { %3916 = vmatprep.mubr.msk.f32.mxu1 %vm5251_vm0, %v5252_v1  ;;  %3875 = vmatprep.mubr.msk.f32.mxu0 %vm5251_vm0, %v5252_v1  ;;  %v4641_v5 = vpack.c.bf16 %v79_v3, %v78_v2  ;;  %v62_v7 = vld [vmem:[#allocation5] sm:$0xff]  ;;  %v4644_v8 = vpack.c.bf16 %v81_v6, %v80_v4  ;;  %v63_v10 = vld [vmem:[#allocation5 + $0x8] sm:$0xff]  ;;  %v64_v13 = vld [vmem:[#allocation5 + $0x10] sm:$0xff]  ;;  %s3438_s21 = sshll.u32 %s5253_s2, 4  ;;  %s3439_s21 = int_to_ptr.vmem [resolvable:$true] %s3438_s21 }
  0x39   :  { %v82_v9 = vld [vmem:[#allocation5 + $0xa0] sm:$0xff]  ;;  %v83_v11 = vld [vmem:[#allocation5 + $0xa8] sm:$0xff]  ;;  %v4617_v12 = vpack.c.bf16 %v63_v10, %v62_v7  ;;  %v65_v14 = vld [vmem:[#allocation5 + $0x18] sm:$0xff]  ;;  %s5217_s22 = scalar_lea.vmem %s3439_s21, 384  ;;  %p5222_p11 = scmp.lt.s32.totalorder %s3439_s21, %s3439_s21 }
  0x3a   :  { %4642 = vmatpush3.bf16.msra.mxu1 %v4641_v5  ;;  %v4620_v15 = vpack.c.bf16 %v65_v14, %v64_v13  ;;  %v4647_v16 = vpack.c.bf16 %v83_v11, %v82_v9  ;;  %v66_v17 = vld [vmem:[#allocation5 + $0x20] sm:$0xff]  ;;  %v67_v18 = vld [vmem:[#allocation5 + $0x28] sm:$0xff]  ;;  %v84_v19 = vld [vmem:[#allocation5 + $0xb0] sm:$0xff]  ;;  %p5218_p10 = scmp.ne.s32.totalorder %s3439_s21, %s5217_s22  ;;  %p5223_p12 = scmp.lt.s32.totalorder %s5217_s22, %s5217_s22 }
  0x3b   :  { %4643 = vmatprep.subr.bf16.mxu1 %v5250_v0  ;;  %4618 = vmatpush3.bf16.msra.mxu0 %v4617_v12  ;;  %v85_v20 = vld [vmem:[#allocation5 + $0xb8] sm:$0xff]  ;;  %v4623_v21 = vpack.c.bf16 %v67_v18, %v66_v17  ;;  %v68_v23 = vld [vmem:[#allocation5 + $0x30] sm:$0xff]  ;;  %v86_v25 = vld [vmem:[#allocation5 + $0xc0] sm:$0xff] }
  0x3c   :  { %4619 = vmatprep.subr.bf16.mxu0 %v5250_v0  ;;  %v4650_v22 = vpack.c.bf16 %v85_v20, %v84_v19  ;;  %v69_v24 = vld [vmem:[#allocation5 + $0x38] sm:$0xff]  ;;  %v87_v26 = vld [vmem:[#allocation5 + $0xc8] sm:$0xff]  ;;  %v70_v29 = vld [vmem:[#allocation5 + $0x40] sm:$0xff]  ;;  %p5224_p13 = por %p5223_p12, %p5222_p11 }
  0x3d   :  { %v4626_v27 = vpack.c.bf16 %v69_v24, %v68_v23  ;;  %v4653_v28 = vpack.c.bf16 %v87_v26, %v86_v25  ;;  %v71_v30 = vld [vmem:[#allocation5 + $0x48] sm:$0xff]  ;;  %v88_v31 = vld [vmem:[#allocation5 + $0xd0] sm:$0xff]  ;;  %v89_v32 = vld [vmem:[#allocation5 + $0xd8] sm:$0xff] }
  0x3e   :  { %4645 = vmatpush3.bf16.msra.mxu1 %v4644_v8  ;;  %v4629_v33 = vpack.c.bf16 %v71_v30, %v70_v29  ;;  %v4656_v34 = vpack.c.bf16 %v89_v32, %v88_v31  ;;  %v72_v35 = vld [vmem:[#allocation5 + $0x50] sm:$0xff]  ;;  %v73_v36 = vld [vmem:[#allocation5 + $0x58] sm:$0xff]  ;;  %v90_v37 = vld [vmem:[#allocation5 + $0xe0] sm:$0xff]  ;;  %p5225_p0 = pnand %p5224_p13, %p5218_p10 }
  0x3f   :  { %4646 = vmatprep.subr.bf16.mxu1 %v5250_v0  ;;  %4621 = vmatpush3.bf16.msra.mxu0 %v4620_v15  ;;  %v91_v38 = vld [vmem:[#allocation5 + $0xe8] sm:$0xff]  ;;  %v4632_v39 = vpack.c.bf16 %v73_v36, %v72_v35  ;;  %v74_v41 = vld [vmem:[#allocation5 + $0x60] sm:$0xff]  ;;  %v92_v43 = vld [vmem:[#allocation5 + $0xf0] sm:$0xff] }
  0x40   :  { %4622 = vmatprep.subr.bf16.mxu0 %v5250_v0  ;;  %v4659_v40 = vpack.c.bf16 %v91_v38, %v90_v37  ;;  %v75_v42 = vld [vmem:[#allocation5 + $0x68] sm:$0xff]  ;;  %v93_v44 = vld [vmem:[#allocation5 + $0xf8] sm:$0xff]  ;;  %v76_v47 = vld [vmem:[#allocation5 + $0x70] sm:$0xff] }
  0x41   :  { %v4635_v45 = vpack.c.bf16 %v75_v42, %v74_v41  ;;  %v4662_v46 = vpack.c.bf16 %v93_v44, %v92_v43  ;;  %v77_v48 = vld [vmem:[#allocation5 + $0x78] sm:$0xff]  ;;  %v56_v50 = vld [vmem:[#allocation2] sm:$0xff]  ;;  %v94_v51 = vld [vmem:[#allocation5 + $0x100] sm:$0xff] }
  0x42   :  { %4648 = vmatpush3.bf16.msra.mxu1 %v4647_v16  ;;  %v4638_v49 = vpack.c.bf16 %v77_v48, %v76_v47  ;;  %v95_v52 = vld [vmem:[#allocation5 + $0x108] sm:$0xff]  ;;  %v57_v53 = vld [vmem:[#allocation2 + $0x8] sm:$0xff]  ;;  %v97_v56 = vld [vmem:[#allocation5 + $0x118] sm:$0xff] }
  0x43   :  { %4649 = vmatprep.subr.bf16.mxu1 %v5250_v0  ;;  %4624 = vmatpush3.bf16.msra.mxu0 %v4623_v21  ;;  %v4665_v54 = vpack.c.bf16 %v95_v52, %v94_v51  ;;  %v96_v55 = vld [vmem:[#allocation5 + $0x110] sm:$0xff]  ;;  %v58_v57 = vld [vmem:[#allocation2 + $0x10] sm:$0xff]  ;;  %v98_v59 = vld [vmem:[#allocation5 + $0x120] sm:$0xff] }
  0x44   :  { %4625 = vmatprep.subr.bf16.mxu0 %v5250_v0  ;;  %v4668_v58 = vpack.c.bf16 %v97_v56, %v96_v55  ;;  %v99_v60 = vld [vmem:[#allocation5 + $0x128] sm:$0xff]  ;;  %v100_v62 = vld [vmem:[#allocation5 + $0x130] sm:$0xff]  ;;  %v101_v63 = vld [vmem:[#allocation5 + $0x138] sm:$0xff] }
  0x45   :  { %v4671_v61 = vpack.c.bf16 %v99_v60, %v98_v59  ;;  %v4674_v2 = vpack.c.bf16 %v101_v63, %v100_v62  ;;  %v102_v3 = vld [vmem:[#allocation5 + $0x140] sm:$0xff]  ;;  %v103_v4 = vld [vmem:[#allocation5 + $0x148] sm:$0xff]  ;;  %v104_v6 = vld [vmem:[#allocation5 + $0x150] sm:$0xff] }
  0x46   :  { %4651 = vmatpush3.bf16.msra.mxu1 %v4650_v22  ;;  %v4677_v5 = vpack.c.bf16 %v103_v4, %v102_v3  ;;  %v105_v7 = vld [vmem:[#allocation5 + $0x158] sm:$0xff]  ;;  %v106_v9 = vld [vmem:[#allocation5 + $0x160] sm:$0xff]  ;;  %v107_v10 = vld [vmem:[#allocation5 + $0x168] sm:$0xff] }
  0x47   :  { %4652 = vmatprep.subr.bf16.mxu1 %v5250_v0  ;;  %4627 = vmatpush3.bf16.msra.mxu0 %v4626_v27  ;;  %v4680_v8 = vpack.c.bf16 %v105_v7, %v104_v6  ;;  %v4683_v11 = vpack.c.bf16 %v107_v10, %v106_v9  ;;  %v108_v12 = vld [vmem:[#allocation5 + $0x170] sm:$0xff]  ;;  %v109_v13 = vld [vmem:[#allocation5 + $0x178] sm:$0xff]  ;;  %v3452_v17 = vld [vmem:[#allocation5 + $0x301] ss:$0 sm:$0xff] }
  0x48   :  { %4628 = vmatprep.subr.bf16.mxu0 %v5250_v0  ;;  %v4686_v14 = vpack.c.bf16 %v109_v13, %v108_v12  ;;  %v5378_v35 = vld [vmem:[#allocation5 + $0x6a9] ss:$0 sm:$0xff]  ;;  %v5397_v44 = vld [vmem:[#allocation5 + $0x6aa] ss:$0 sm:$0xff]  ;;  %v5412_v48 = vld [vmem:[#allocation5 + $0x6ab] ss:$0 sm:$0xff] }
  0x4a   :  { %4654 = vmatpush3.bf16.msra.mxu1 %v4653_v28  ;;  %v3451_v28 = vld [vmem:[#allocation5 + $0x300] ss:$0 sm:$0xff] }
  0x4b   :  { %4655 = vmatprep.subr.bf16.mxu1 %v5250_v0  ;;  %4630 = vmatpush3.bf16.msra.mxu0 %v4629_v33 }
  0x4c   :  { %4631 = vmatprep.subr.bf16.mxu0 %v5250_v0 }
  0x4e   :  { %4657 = vmatpush3.bf16.msra.mxu1 %v4656_v34  ;;  %v5376_v34 = vld [vmem:[#allocation5 + $0x6a8] ss:$0 sm:$0xff] }
  0x4f   :  { %4658 = vmatprep.subr.bf16.mxu1 %v5250_v0  ;;  %4633 = vmatpush3.bf16.msra.mxu0 %v4632_v39 }
  0x50   :  { %4634 = vmatprep.subr.bf16.mxu0 %v5250_v0 }
  0x52   :  { %4660 = vmatpush3.bf16.msra.mxu1 %v4659_v40 }
  0x53   :  { %4661 = vmatprep.subr.bf16.mxu1 %v5250_v0  ;;  %4636 = vmatpush3.bf16.msra.mxu0 %v4635_v45 }
  0x54   :  { %4637 = vmatprep.subr.bf16.mxu0 %v5250_v0 }
  0x56   :  { %4663 = vmatpush3.bf16.msra.mxu1 %v4662_v46 }
  0x57   :  { %4691 = vmatprep.subr.bf16.mxu1 %v5250_v0  ;;  %4639 = vmatpush3.bf16.msra.mxu0 %v4638_v49 }
  0x58   :  { %4664 = vmatprep.subr.bf16.mxu0 %v5250_v0 }
  0x59   :  { %3917 = vmatmul.mubr.f32.vlgmr.msra.gmra.mrb[0].mxu1 %v56_v50 }
  0x5a   :  { %3919 = vmatprep.mubr.msk.f32.mxu1 %vm5251_vm0, %v5252_v1  ;;  %3876 = vmatmul.mubr.f32.vlgmr.msra.gmra.mrb[0].mxu0 %v56_v50 }
  0x5b   :  { %3878 = vmatprep.mubr.msk.f32.mxu0 %vm5251_vm0, %v5252_v1  ;;  %4666 = vmatpush3.bf16.msra.mxu0 %v4665_v54 }
  0x5c   :  { %4667 = vmatprep.subr.bf16.mxu0 %v5250_v0 }
  0x5d   :  { %3920 = vmatmul.mubr.f32.gmra.mrb[2].mxu1 %v57_v53 }
  0x5e   :  { %3922 = vmatprep.mubr.msk.f32.mxu1 %vm5251_vm0, %v5252_v1  ;;  %3879 = vmatmul.mubr.f32.gmra.mrb[2].mxu0 %v57_v53 }
  0x5f   :  { %3881 = vmatprep.mubr.msk.f32.mxu0 %vm5251_vm0, %v5252_v1  ;;  %4669 = vmatpush3.bf16.msra.mxu0 %v4668_v58  ;;  %v3453_v58 = vld [vmem:[#allocation5 + $0x302] ss:$0 sm:$0xff] }
  0x60   :  { %4670 = vmatprep.subr.bf16.mxu0 %v5250_v0 }
  0x61   :  { %3923 = vmatmul.mubr.f32.gmra.mrb[4].mxu1 %v58_v57 }
  0x62   :  { %3987 = vmatprep.mubr.msk.f32.mxu1 %vm5251_vm0, %v5252_v1  ;;  %3882 = vmatmul.mubr.f32.gmra.mrb[4].mxu0 %v58_v57 }
  0x63   :  { %3957 = vmatprep.mubr.msk.f32.mxu0 %vm5251_vm0, %v5252_v1  ;;  %4672 = vmatpush3.bf16.msra.mxu0 %v4671_v61 }
  0x64   :  { %4673 = vmatprep.subr.bf16.mxu0 %v5250_v0 }
  0x67   :  { %4675 = vmatpush3.bf16.msra.mxu0 %v4674_v2 }
  0x68   :  { %4676 = vmatprep.subr.bf16.mxu0 %v5250_v0 }
  0x6b   :  { %4678 = vmatpush3.bf16.msra.mxu0 %v4677_v5 }
  0x6c   :  { %4679 = vmatprep.subr.bf16.mxu0 %v5250_v0 }
  0x6f   :  { %4681 = vmatpush3.bf16.msra.mxu0 %v4680_v8 }
  0x70   :  { %4682 = vmatprep.subr.bf16.mxu0 %v5250_v0 }
  0x73   :  { %4684 = vmatpush3.bf16.msra.mxu0 %v4683_v11 }
  0x74   :  { %4685 = vmatprep.subr.bf16.mxu0 %v5250_v0 }
  0x77   :  { %4687 = vmatpush3.bf16.msra.mxu0 %v4686_v14 }
  0x78   :  { %4688 = vmatprep.subr.bf16.mxu0 %v5250_v0 }
  0x7a   :  { %3958 = vmatmul.mubr.f32.vlgmr.msra.gmra.mrb[6].mxu0 %v56_v50 }
  0x7b   :  { %3960 = vmatprep.mubr.msk.f32.mxu0 %vm5251_vm0, %v5252_v1 }
  0x7e   :  { %3961 = vmatmul.mubr.f32.gmra.mrb[8].mxu0 %v57_v53 }
  0x7f   :  { %3963 = vmatprep.mubr.msk.f32.mxu0 %vm5251_vm0, %v5252_v1 }
  0x82   :  { %3964 = vmatmul.mubr.f32.gmra.mrb[10].mxu0 %v58_v57 }
  0x83   :  { %3972 = vmatprep.mubr.msk.f32.mxu0 %vm5251_vm0, %v5252_v1 }
 0x12c   :  { %v322_v15 = vpop.f32.mrb[0].mxu1 }
 0x12d   :  { %v3918_v16 = vpop.f32.mrb[1].mxu1  ;;  %v238_v18 = vpop.f32.mrb[0].mxu0  ;;  %v323_v21 = vadd.f32 %v3452_v17, %v322_v15  ;;  %v59_v15 = vld [vmem:[#allocation7] sm:$0xff] }
 0x12e   :  { %v3877_v20 = vpop.f32.mrb[1].mxu0  ;;  %v239_v31 = vadd.f32 %v3451_v28, %v238_v18 }
 0x130   :  { %v327_v19 = vpop.f32.mrb[2].mxu1  ;;  %v425_v36 = vmul.f32 %v5376_v34, %v239_v31  ;;  %v565_v37 = vmul.f32 %v5378_v35, %v239_v31  ;;  %v882_v45 = vmul.f32 %v5397_v44, %v239_v31  ;;  %v1113_v49 = vmul.f32 %v5412_v48, %v239_v31  ;;  %v61_v31 = vld [vmem:[#allocation7 + $0x10] sm:$0xff] }
 0x131   :  { %v328_v22 = vadd.f32 %v3452_v17, %v327_v19  ;;  %v3921_v23 = vpop.f32.mrb[3].mxu1  ;;  %v243_v25 = vpop.f32.mrb[2].mxu0 }
 0x132   :  { %v3880_v27 = vpop.f32.mrb[3].mxu0  ;;  %v244_v38 = vadd.f32 %v3451_v28, %v243_v25 }
 0x133   :  { %v4689_v24 = vpack.c.bf16 %v328_v22, %v323_v21  ;;  %v60_v22 = vld [vmem:[#allocation7 + $0x8] sm:$0xff] }
 0x134   :  { %v332_v26 = vpop.f32.mrb[4].mxu1  ;;  %v426_v40 = vmul.f32 %v5376_v34, %v244_v38  ;;  %v566_v41 = vmul.f32 %v5378_v35, %v244_v38  ;;  %v883_v46 = vmul.f32 %v5397_v44, %v244_v38  ;;  %v1114_v50 = vmul.f32 %v5412_v48, %v244_v38 }
 0x135   :  { %4690 = vmatpush3.bf16.xpose.msra.mxu0 %v4689_v24  ;;  %4693 = vmatpush3.bf16.xpose.msra.mxu1 %v4689_v24  ;;  %v3924_v29 = vpop.f32.mrb[5].mxu1  ;;  %v248_v30 = vpop.f32.mrb[4].mxu0  ;;  %v333_v33 = vadd.f32 %v3452_v17, %v332_v26 }
 0x136   :  { %3970 = vmatprep.subr.mxu0 %v5252_v1  ;;  %3985 = vmatprep.subr.mxu1 %v5252_v1  ;;  %v3883_v32 = vpop.f32.mrb[5].mxu0  ;;  %v249_v39 = vadd.f32 %v3451_v28, %v248_v30 }
 0x138   :  { %v427_v42 = vmul.f32 %v5376_v34, %v249_v39  ;;  %v567_v43 = vmul.f32 %v5378_v35, %v249_v39  ;;  %v884_v47 = vmul.f32 %v5397_v44, %v249_v39  ;;  %v1115_v51 = vmul.f32 %v5412_v48, %v249_v39 }
 0x13d   :  { %3971 = vmatpush3.xpose.msra.mxu0 %v333_v33  ;;  %3986 = vmatpush3.xpose.msra.mxu1 %v333_v33 }
 0x13e   :  { %4700 = vmatprep.subr.bf16.mxu0 %v5250_v0  ;;  %4694 = vmatprep.subr.bf16.mxu1 %v5250_v0 }
 0x140   :  { %3973 = vmatmul.mubr.f32.vlgmr.msra.gmra.mrb[12].mxu0 %v425_v36  ;;  %3988 = vmatmul.mubr.f32.vlgmr.msra.gmra.mrb[6].mxu1 %v565_v37 }
 0x141   :  { %4702 = vmatpush3.bf16.xpose.msra.mxu0 %v4689_v24  ;;  %3975 = vmatprep.mubr.msk.f32.mxu0 %vm5251_vm0, %v5252_v1 }
 0x142   :  { %3990 = vmatprep.mubr.msk.f32.mxu1 %vm5251_vm0, %v5252_v1  ;;  %4030 = vmatprep.subr.mxu0 %v5252_v1 }
 0x144   :  { %3976 = vmatmul.mubr.f32.gmra.mrb[14].mxu0 %v426_v40  ;;  %3991 = vmatmul.mubr.f32.gmra.mrb[8].mxu1 %v566_v41 }
 0x145   :  { %3978 = vmatprep.mubr.msk.f32.mxu0 %vm5251_vm0, %v5252_v1  ;;  %3993 = vmatprep.mubr.msk.f32.mxu1 %vm5251_vm0, %v5252_v1 }
 0x148   :  { %3979 = vmatmul.mubr.f32.gmra.mrb[16].mxu0 %v427_v42  ;;  %3994 = vmatmul.mubr.f32.gmra.mrb[10].mxu1 %v567_v43 }
 0x149   :  { %4031 = vmatpush3.xpose.msra.mxu0 %v333_v33  ;;  %4032 = vmatprep.mubr.msk.f32.mxu0 %vm5251_vm0, %v5252_v1 }
 0x14a   :  { %4706 = vmatprep.subr.bf16.mxu0 %v5250_v0  ;;  %4002 = vmatprep.mubr.msk.f32.mxu1 %vm5251_vm0, %v5252_v1 }
 0x14c   :  { %4033 = vmatmul.mubr.f32.vlgmr.msra.gmra.mrb[18].mxu0 %v882_v45 }
 0x14d   :  { %4708 = vmatpush3.bf16.xpose.msra.mxu0 %v4689_v24  ;;  %4035 = vmatprep.mubr.msk.f32.mxu0 %vm5251_vm0, %v5252_v1  ;;  %v406_v52 = vpop.f32.mrb[6].mxu0 }
 0x14e   :  { %4060 = vmatprep.subr.mxu0 %v5252_v1  ;;  %v3959_v53 = vpop.f32.mrb[7].mxu0  ;;  %v407_v59 = vadd.f32 %v3453_v58, %v406_v52 }
 0x150   :  { %4036 = vmatmul.mubr.f32.gmra.mrb[20].mxu0 %v883_v46  ;;  %v5427_v61 = vmul.f32 %v5376_v34, %v407_v59  ;;  %v696_v62 = vmul.f32 %v5378_v35, %v407_v59  ;;  %v5435_v3 = vmul.f32 %v5397_v44, %v407_v59  ;;  %v5438_v4 = vmul.f32 %v5412_v48, %v407_v59 }
 0x151   :  { %4038 = vmatprep.mubr.msk.f32.mxu0 %vm5251_vm0, %v5252_v1  ;;  %v411_v54 = vpop.f32.mrb[8].mxu0 }
 0x152   :  { %v3962_v55 = vpop.f32.mrb[9].mxu0  ;;  %v412_v60 = vadd.f32 %v3453_v58, %v411_v54 }
 0x154   :  { %4039 = vmatmul.mubr.f32.gmra.mrb[22].mxu0 %v884_v47  ;;  %v5431_v63 = vmul.f32 %v5376_v34, %v412_v60  ;;  %v697_v2 = vmul.f32 %v5378_v35, %v412_v60  ;;  %v5441_v5 = vmul.f32 %v5397_v44, %v412_v60  ;;  %v5444_v6 = vmul.f32 %v5412_v48, %v412_v60 }
 0x155   :  { %4061 = vmatpush3.xpose.msra.mxu0 %v333_v33  ;;  %4062 = vmatprep.mubr.msk.f32.mxu0 %vm5251_vm0, %v5252_v1  ;;  %v416_v56 = vpop.f32.mrb[10].mxu0 }
 0x156   :  { %4712 = vmatprep.subr.bf16.mxu0 %v5250_v0  ;;  %v3965_v57 = vpop.f32.mrb[11].mxu0  ;;  %v4695_v7 = vpack.c.bf16 %v697_v2, %v696_v62  ;;  %v4698_v8 = vpack.c.bf16 %v5431_v63, %v5427_v61  ;;  %v4704_v9 = vpack.c.bf16 %v5441_v5, %v5435_v3  ;;  %v4710_v10 = vpack.c.bf16 %v5444_v6, %v5438_v4 }
 0x157   :  { %v5452_v11 = vadd.f32 %v3453_v58, %v416_v56 }
 0x158   :  { %4063 = vmatmul.mubr.f32.vlgmr.msra.gmra.mrb[24].mxu0 %v1113_v49  ;;  %4696 = vmatpush3.bf16.msra.mxu1 %v4695_v7 }
 0x159   :  { %4065 = vmatprep.mubr.msk.f32.mxu0 %vm5251_vm0, %v5252_v1  ;;  %4000 = vmatprep.subr.mxu1 %v5252_v1  ;;  %v698_v12 = vmul.f32 %v5378_v35, %v5452_v11 }
 0x15c   :  { %4066 = vmatmul.mubr.f32.gmra.mrb[26].mxu0 %v1114_v50  ;;  %4001 = vmatpush3.msra.mxu1 %v698_v12 }
 0x15d   :  { %4068 = vmatprep.mubr.msk.f32.mxu0 %vm5251_vm0, %v5252_v1  ;;  %4697 = vmatprep.subr.bf16.mxu1 %v5250_v0 }
 0x160   :  { %4069 = vmatmul.mubr.f32.gmra.mrb[28].mxu0 %v1115_v51 }
 0x161   :  { %4118 = vmatprep.mubr.msk.f32.mxu0 %vm5251_vm0, %v5252_v1 }
 0x213   :  { %v494_v13 = vpop.f32.mrb[12].mxu0  ;;  %v634_v14 = vpop.f32.mrb[6].mxu1 }
 0x214   :  { %v648_v16 = vmul.f32 0.35355338, %v634_v14  ;;  %v3974_v17 = vpop.f32.mrb[13].mxu0  ;;  %v3989_v18 = vpop.f32.mrb[7].mxu1  ;;  %v508_v32 = vmul.f32 0.35355338, %v494_v13 }
 0x216   :  { %v5458_v19 = vadd.f32 %v648_v16, %v59_v15  ;;  %v511_v46 = vadd.f32 %v508_v32, %v59_v15 }
 0x217   :  { %v499_v20 = vpop.f32.mrb[14].mxu0  ;;  %v639_v21 = vpop.f32.mrb[8].mxu1 }
 0x218   :  { %v649_v23 = vmul.f32 0.35355338, %v639_v21  ;;  %v3977_v24 = vpop.f32.mrb[15].mxu0  ;;  %v3992_v25 = vpop.f32.mrb[9].mxu1  ;;  %v509_v26 = vmul.f32 0.35355338, %v499_v20 }
 0x219   :  { %v654_v27 = vsel %vm514_vm1, %v5458_v19, -inf  ;;  %v515_v53 = vsel %vm514_vm1, %v511_v46, -inf }
 0x21a   :  { %655 = vmax.xlane.f32.xlu0 %v654_v27  ;;  %v5462_v28 = vadd.f32 %v649_v23, %v60_v22  ;;  %v5466_v38 = vadd.f32 %v509_v26, %v60_v22 }
 0x21b   :  { %v504_v29 = vpop.f32.mrb[16].mxu0  ;;  %v644_v30 = vpop.f32.mrb[10].mxu1 }
 0x21c   :  { %v650_v33 = vmul.f32 0.35355338, %v644_v30  ;;  %v3980_v35 = vpop.f32.mrb[17].mxu0  ;;  %v3995_v36 = vpop.f32.mrb[11].mxu1  ;;  %v657_v37 = vsel %vm514_vm1, %v5462_v28, -inf  ;;  %v518_v47 = vsel %vm514_vm1, %v5466_v38, -inf }
 0x21d   :  { %v510_v41 = vmul.f32 0.35355338, %v504_v29 }
 0x21e   :  { %658 = vmax.xlane.f32.xlu0 %v657_v37  ;;  %v653_v39 = vadd.f32 %v650_v33, %v61_v31 }
 0x21f   :  { %v951_v40 = vpop.f32.mrb[18].mxu0  ;;  %v513_v55 = vadd.f32 %v510_v41, %v61_v31 }
 0x220   :  { %v965_v42 = vmul.f32 0.35355338, %v951_v40  ;;  %v4034_v43 = vpop.f32.mrb[19].mxu0  ;;  %v660_v45 = vsel %vm514_vm1, %v653_v39, -inf }
 0x221   :  { %661 = vmax.xlane.f32.xlu1 %v660_v45  ;;  %v521_v59 = vsel %vm514_vm1, %v513_v55, -inf }
 0x222   :  { %519 = vmax.xlane.f32.xlu0 %v518_v47  ;;  %v968_v49 = vadd.f32 %v965_v42, %v59_v15 }
 0x223   :  { %v956_v50 = vpop.f32.mrb[20].mxu0 }
 0x224   :  { %v966_v51 = vmul.f32 0.35355338, %v956_v50  ;;  %v4037_v52 = vpop.f32.mrb[21].mxu0  ;;  %v971_v54 = vsel %vm514_vm1, %v968_v49, -inf }
 0x225   :  { %516 = vmax.xlane.f32.xlu1 %v515_v53 }
 0x226   :  { %972 = vmax.xlane.f32.xlu0 %v971_v54  ;;  %v5474_v60 = vadd.f32 %v966_v51, %v60_v22 }
 0x227   :  { %v961_v56 = vpop.f32.mrb[22].mxu0 }
 0x228   :  { %v967_v57 = vmul.f32 0.35355338, %v961_v56  ;;  %v4040_v58 = vpop.f32.mrb[23].mxu0  ;;  %v974_v13 = vsel %vm514_vm1, %v5474_v60, -inf }
 0x229   :  { %522 = vmax.xlane.f32.xlu1 %v521_v59 }
 0x22a   :  { %v5476_v62 = vadd.f32 %v967_v57, %v61_v31 }
 0x22b   :  { %v1182_v2 = vpop.f32.mrb[24].mxu0 }
 0x22c   :  { %v1196_v7 = vmul.f32 0.35355338, %v1182_v2  ;;  %v4064_v12 = vpop.f32.mrb[25].mxu0  ;;  %v977_v14 = vsel %vm514_vm1, %v5476_v62, -inf }
 0x22d   :  { %975 = vmax.xlane.f32.xlu1 %v974_v13  ;;  %978 = vmax.xlane.f32.xlu0 %v977_v14 }
 0x22e   :  { %v5482_v16 = vadd.f32 %v1196_v7, %v59_v15 }
 0x22f   :  { %v1187_v17 = vpop.f32.mrb[26].mxu0 }
 0x230   :  { %v1197_v18 = vmul.f32 0.35355338, %v1187_v17  ;;  %v4067_v20 = vpop.f32.mrb[27].mxu0  ;;  %v1202_v21 = vsel %vm514_vm1, %v5482_v16, -inf }
 0x231   :  { %1203 = vmax.xlane.f32.xlu1 %v1202_v21 }
 0x232   :  { %v5486_v23 = vadd.f32 %v1197_v18, %v60_v22 }
 0x233   :  { %v1192_v24 = vpop.f32.mrb[28].mxu0 }
 0x234   :  { %v1198_v25 = vmul.f32 0.35355338, %v1192_v24  ;;  %v4070_v26 = vpop.f32.mrb[29].mxu0  ;;  %v1205_v27 = vsel %vm514_vm1, %v5486_v23, -inf }
 0x235   :  { %1206 = vmax.xlane.f32.xlu0 %v1205_v27 }
 0x236   :  { %v5490_v29 = vadd.f32 %v1198_v25, %v61_v31 }
 0x238   :  { %v1208_v15 = vsel %vm514_vm1, %v5490_v29, -inf }
 0x239   :  { %1209 = vmax.xlane.f32.xlu1 %v1208_v15 }
 0x2a7   :  { %v656_v30 = vpop.xlane.xlu0 %655 }
 0x2a8   :  { %v663_v32 = vsub.f32 %v5458_v19, %v656_v30 }
 0x2aa   :  { %v666_v33 = vmul.f32 1.442695, %v663_v32 }
 0x2ab   :  { %v659_v35 = vpop.xlane.xlu0 %658 }
 0x2ac   :  { %5021 = vpow2.f32 %v666_v33  ;;  %v664_v22 = vsub.f32 %v5462_v28, %v659_v35 }
 0x2ae   :  { %v668_v36 = vmul.f32 1.442695, %v664_v22  ;;  %v662_v37 = vpop.xlane.xlu1 %661 }
 0x2af   :  { %v665_v40 = vsub.f32 %v653_v39, %v662_v37  ;;  %v520_v41 = vpop.xlane.xlu0 %519 }
 0x2b0   :  { %5023 = vpow2.f32 %v668_v36  ;;  %v525_v31 = vsub.f32 %v5466_v38, %v520_v41 }
 0x2b1   :  { %v670_v42 = vmul.f32 1.442695, %v665_v40 }
 0x2b2   :  { %v529_v43 = vmul.f32 1.442695, %v525_v31  ;;  %v517_v45 = vpop.xlane.xlu1 %516 }
 0x2b3   :  { %5025 = vpow2.f32 %v670_v42  ;;  %v524_v47 = vsub.f32 %v511_v46, %v517_v45  ;;  %v973_v50 = vpop.xlane.xlu0 %972  ;;  %v111_v45 = vld [vmem:[#allocation5 + $0x188] sm:$0xff] }
 0x2b4   :  { %v980_v51 = vsub.f32 %v968_v49, %v973_v50  ;;  %5027 = vpow2.f32 %v529_v43  ;;  %v110_v43 = vld [vmem:[#allocation5 + $0x180] sm:$0xff] }
 0x2b5   :  { %v527_v19 = vmul.f32 1.442695, %v524_v47  ;;  %v112_v47 = vld [vmem:[#allocation5 + $0x190] sm:$0xff]  ;;  %v4713_v50 = vpack.c.bf16 %v111_v45, %v110_v43 }
 0x2b6   :  { %v5497_v52 = vpop.eup %5021  ;;  %v983_v53 = vmul.f32 1.442695, %v980_v51  ;;  %v523_v28 = vpop.xlane.xlu1 %522  ;;  %v113_v51 = vld [vmem:[#allocation5 + $0x198] sm:$0xff] }
 0x2b7   :  { %5029 = vpow2.f32 %v527_v19  ;;  %v526_v54 = vsub.f32 %v513_v55, %v523_v28  ;;  %v672_v39 = vsel %vm514_vm1, %v5497_v52, 0.0  ;;  %4714 = vmatpush3.bf16.msra.mxu0 %v4713_v50  ;;  %v4716_v19 = vpack.c.bf16 %v113_v51, %v112_v47  ;;  %v115_v28 = vld [vmem:[#allocation5 + $0x1a8] sm:$0xff] }
 0x2b8   :  { %673 = vadd.xlane.f32.xlu0 %v672_v39  ;;  %5031 = vpow2.f32 %v983_v53  ;;  %4715 = vmatprep.subr.bf16.mxu0 %v5250_v0  ;;  %v114_v53 = vld [vmem:[#allocation5 + $0x1a0] sm:$0xff]  ;;  %v116_v39 = vld [vmem:[#allocation5 + $0x1b0] sm:$0xff] }
 0x2b9   :  { %v531_v38 = vmul.f32 1.442695, %v526_v54  ;;  %v4719_v54 = vpack.c.bf16 %v115_v28, %v114_v53 }
 0x2ba   :  { %v5501_v56 = vpop.eup %5023  ;;  %v976_v57 = vpop.xlane.xlu1 %975 }
 0x2bb   :  { %v979_v46 = vpop.xlane.xlu0 %978  ;;  %5033 = vpow2.f32 %v531_v38  ;;  %v981_v49 = vsub.f32 %v5474_v60, %v976_v57  ;;  %v675_v59 = vsel %vm514_vm1, %v5501_v56, 0.0  ;;  %4717 = vmatpush3.bf16.msra.mxu0 %v4716_v19  ;;  %v117_v38 = vld [vmem:[#allocation5 + $0x1b8] sm:$0xff] }
 0x2bc   :  { %v982_v58 = vsub.f32 %v5476_v62, %v979_v46  ;;  %676 = vadd.xlane.f32.xlu1 %v675_v59  ;;  %4718 = vmatprep.subr.bf16.mxu0 %v5250_v0  ;;  %v4722_v57 = vpack.c.bf16 %v117_v38, %v116_v39  ;;  %v118_v46 = vld [vmem:[#allocation5 + $0x1c0] sm:$0xff]  ;;  %v120_v59 = vld [vmem:[#allocation5 + $0x1d0] sm:$0xff] }
 0x2bd   :  { %v5507_v55 = vpop.eup %5025  ;;  %v985_v2 = vmul.f32 1.442695, %v981_v49  ;;  %v119_v49 = vld [vmem:[#allocation5 + $0x1c8] sm:$0xff] }
 0x2be   :  { %v987_v7 = vmul.f32 1.442695, %v982_v58  ;;  %v1204_v12 = vpop.xlane.xlu1 %1203  ;;  %v678_v13 = vsel %vm514_vm1, %v5507_v55, 0.0  ;;  %v5511_v14 = vpop.eup %5027  ;;  %v4725_v58 = vpack.c.bf16 %v119_v49, %v118_v46  ;;  %v559_v46 = vmul.f32 %v5376_v34, %v5452_v11 }
 0x2bf   :  { %5035 = vpow2.f32 %v985_v2  ;;  %v1211_v17 = vsub.f32 %v5482_v16, %v1204_v12  ;;  %679 = vadd.xlane.f32.xlu0 %v678_v13  ;;  %v536_v20 = vsel %vm514_vm1, %v5511_v14, 0.0  ;;  %4720 = vmatpush3.bf16.msra.mxu0 %v4719_v54  ;;  %v121_v2 = vld [vmem:[#allocation5 + $0x1d8] sm:$0xff]  ;;  %v122_v12 = vld [vmem:[#allocation5 + $0x1e0] sm:$0xff]  ;;  %v123_v13 = vld [vmem:[#allocation5 + $0x1e8] sm:$0xff] }
 0x2c0   :  { %5037 = vpow2.f32 %v987_v7  ;;  %4721 = vmatprep.subr.bf16.mxu0 %v5250_v0  ;;  %v4728_v7 = vpack.c.bf16 %v121_v2, %v120_v59 }
 0x2c1   :  { %v5514_v60 = vpop.eup %5029  ;;  %v1214_v62 = vmul.f32 1.442695, %v1211_v17  ;;  %v4731_v17 = vpack.c.bf16 %v123_v13, %v122_v12 }
 0x2c2   :  { %v1207_v18 = vpop.xlane.xlu0 %1206  ;;  %v533_v21 = vsel %vm514_vm1, %v5514_v60, 0.0  ;;  %v5520_v24 = vpop.eup %5031 }
 0x2c3   :  { %5039 = vpow2.f32 %v1214_v62  ;;  %v1212_v25 = vsub.f32 %v5486_v23, %v1207_v18  ;;  %537 = vadd.xlane.f32.xlu0 %v536_v20  ;;  %534 = vadd.xlane.f32.xlu1 %v533_v21  ;;  %v989_v15 = vsel %vm514_vm1, %v5520_v24, 0.0  ;;  %v124_v62 = vld [vmem:[#allocation5 + $0x1f0] sm:$0xff]  ;;  %v125_v18 = vld [vmem:[#allocation5 + $0x1f8] sm:$0xff] }
 0x2c4   :  { %4723 = vmatpush3.bf16.msra.mxu0 %v4722_v57  ;;  %v4734_v20 = vpack.c.bf16 %v125_v18, %v124_v62 }
 0x2c5   :  { %v5523_v16 = vpop.eup %5033  ;;  %v1216_v26 = vmul.f32 1.442695, %v1212_v25  ;;  %4724 = vmatprep.subr.bf16.mxu0 %v5250_v0 }
 0x2c6   :  { %v1210_v27 = vpop.xlane.xlu1 %1209  ;;  %v539_v30 = vsel %vm514_vm1, %v5523_v16, 0.0 }
 0x2c7   :  { %5041 = vpow2.f32 %v1216_v26  ;;  %v1213_v32 = vsub.f32 %v5490_v29, %v1210_v27  ;;  %990 = vadd.xlane.f32.xlu0 %v989_v15  ;;  %540 = vadd.xlane.f32.xlu1 %v539_v30 }
 0x2c8   :  { %4726 = vmatpush3.bf16.msra.mxu0 %v4725_v58 }
 0x2c9   :  { %v5530_v33 = vpop.eup %5035  ;;  %v1218_v23 = vmul.f32 1.442695, %v1213_v32  ;;  %4727 = vmatprep.subr.bf16.mxu0 %v5250_v0 }
 0x2ca   :  { %v5532_v35 = vpop.eup %5037  ;;  %v992_v22 = vsel %vm514_vm1, %v5530_v33, 0.0 }
 0x2cb   :  { %5043 = vpow2.f32 %v1218_v23  ;;  %v995_v36 = vsel %vm514_vm1, %v5532_v35, 0.0  ;;  %993 = vadd.xlane.f32.xlu1 %v992_v22 }
 0x2cc   :  { %996 = vadd.xlane.f32.xlu0 %v995_v36  ;;  %4729 = vmatpush3.bf16.msra.mxu0 %v4728_v7 }
 0x2cd   :  { %v5538_v37 = vpop.eup %5039  ;;  %4730 = vmatprep.subr.bf16.mxu0 %v5250_v0 }
 0x2ce   :  { %v1220_v29 = vsel %vm514_vm1, %v5538_v37, 0.0 }
 0x2cf   :  { %1221 = vadd.xlane.f32.xlu1 %v1220_v29 }
 0x2d0   :  { %4732 = vmatpush3.bf16.msra.mxu0 %v4731_v17 }
 0x2d1   :  { %v5542_v40 = vpop.eup %5041  ;;  %4733 = vmatprep.subr.bf16.mxu0 %v5250_v0 }
 0x2d2   :  { %v1223_v41 = vsel %vm514_vm1, %v5542_v40, 0.0 }
 0x2d3   :  { %1224 = vadd.xlane.f32.xlu0 %v1223_v41 }
 0x2d4   :  { %4735 = vmatpush3.bf16.msra.mxu0 %v4734_v20 }
 0x2d5   :  { %v5546_v31 = vpop.eup %5043  ;;  %4760 = vmatprep.subr.bf16.mxu0 %v5250_v0 }
 0x2d6   :  { %v1226_v42 = vsel %vm514_vm1, %v5546_v31, 0.0 }
 0x2d7   :  { %1227 = vadd.xlane.f32.xlu1 %v1226_v42 }
 0x345   :  { %v674_v21 = vpop.xlane.xlu0 %673 }
 0x346   :  { %5045 = vrcp.f32 %v674_v21 }
 0x349   :  { %v677_v25 = vpop.xlane.xlu1 %676 }
 0x34a   :  { %5047 = vrcp.f32 %v677_v25 }
 0x34c   :  { %v680_v26 = vpop.xlane.xlu0 %679 }
 0x34d   :  { %5049 = vrcp.f32 %v680_v26 }
 0x350   :  { %v5046_v27 = vpop.eup %5045  ;;  %v538_v15 = vpop.xlane.xlu0 %537 }
 0x351   :  { %v535_v30 = vpop.xlane.xlu1 %534  ;;  %v684_v32 = vmul.f32 %v5046_v27, %v674_v21  ;;  %5051 = vrcp.f32 %v538_v15 }
 0x352   :  { %5053 = vrcp.f32 %v535_v30 }
 0x353   :  { %v687_v23 = vsub.f32 2.0, %v684_v32 }
 0x354   :  { %v5048_v22 = vpop.eup %5047  ;;  %v991_v36 = vpop.xlane.xlu0 %990 }
 0x355   :  { %v541_v29 = vpop.xlane.xlu1 %540  ;;  %v690_v41 = vmul.f32 %v5046_v27, %v687_v23  ;;  %v685_v42 = vmul.f32 %v5048_v22, %v677_v25  ;;  %5055 = vrcp.f32 %v991_v36  ;;  %v1015_v27 = vmul.f32 %v5397_v44, %v5452_v11 }
 0x356   :  { %5057 = vrcp.f32 %v541_v29 }
 0x357   :  { %v5050_v43 = vpop.eup %5049  ;;  %v693_v45 = vmul.f32 %v5497_v52, %v690_v41  ;;  %v688_v47 = vsub.f32 2.0, %v685_v42  ;;  %v1246_v42 = vmul.f32 %v5412_v48, %v5452_v11 }
 0x358   :  { %v686_v50 = vmul.f32 %v5050_v43, %v680_v26 }
 0x359   :  { %v994_v51 = vpop.xlane.xlu1 %993  ;;  %v691_v19 = vmul.f32 %v5048_v22, %v688_v47  ;;  %4003 = vmatmul.mubr.msk.f32.vlgmr.msra.gmra.mrb[12].mxu1 %vm514_vm1, %v693_v45  ;;  %v997_v39 = vpop.xlane.xlu0 %996 }
 0x35a   :  { %v689_v53 = vsub.f32 2.0, %v686_v50  ;;  %4699 = vmatpush3.bf16.msra.mxu1 %v4698_v8  ;;  %5059 = vrcp.f32 %v994_v51  ;;  %4005 = vmatprep.mubr.msk.f32.mxu1 %vm5251_vm0, %v5252_v1 }
 0x35b   :  { %v5052_v28 = vpop.eup %5051  ;;  %v694_v54 = vmul.f32 %v5501_v56, %v691_v19  ;;  %4015 = vmatprep.subr.mxu1 %v5252_v1  ;;  %5061 = vrcp.f32 %v997_v39 }
 0x35c   :  { %v5054_v52 = vpop.eup %5053  ;;  %v692_v38 = vmul.f32 %v5050_v43, %v689_v53  ;;  %v546_v57 = vmul.f32 %v5052_v28, %v538_v15 }
 0x35d   :  { %v545_v49 = vmul.f32 %v5054_v52, %v535_v30  ;;  %4006 = vmatmul.mubr.msk.f32.gmra.mrb[14].mxu1 %vm514_vm1, %v694_v54  ;;  %v1222_v58 = vpop.xlane.xlu1 %1221  ;;  %v128_v54 = vld [vmem:[#allocation5 + $0x210] sm:$0xff] }
 0x35e   :  { %v695_v61 = vmul.f32 %v5507_v55, %v692_v38  ;;  %4016 = vmatpush3.msra.mxu1 %v559_v46  ;;  %4008 = vmatprep.mubr.msk.f32.mxu1 %vm5251_vm0, %v5252_v1  ;;  %v549_v8 = vsub.f32 2.0, %v546_v57  ;;  %5063 = vrcp.f32 %v1222_v58  ;;  %v3470_v57 = vld [vmem:[#allocation5 + $0x303] ss:$0 sm:$0xff] }
 0x35f   :  { %v5056_v63 = vpop.eup %5055  ;;  %v548_v56 = vsub.f32 2.0, %v545_v49  ;;  %4703 = vmatprep.subr.bf16.mxu1 %v5250_v0 }
 0x360   :  { %v5058_v59 = vpop.eup %5057  ;;  %v552_v34 = vmul.f32 %v5052_v28, %v549_v8  ;;  %v1001_v12 = vmul.f32 %v5056_v63, %v991_v36  ;;  %v1225_v17 = vpop.xlane.xlu0 %1224  ;;  %v127_v28 = vld [vmem:[#allocation5 + $0x208] sm:$0xff] }
 0x361   :  { %v551_v2 = vmul.f32 %v5054_v52, %v548_v56  ;;  %v547_v7 = vmul.f32 %v5058_v59, %v541_v29  ;;  %4009 = vmatmul.mubr.msk.f32.gmra.mrb[16].mxu1 %vm514_vm1, %v695_v61  ;;  %5065 = vrcp.f32 %v1225_v17  ;;  %v129_v52 = vld [vmem:[#allocation5 + $0x218] sm:$0xff] }
 0x362   :  { %4017 = vmatprep.mubr.msk.f32.mxu1 %vm5251_vm0, %v5252_v1  ;;  %v555_v18 = vmul.f32 %v5511_v14, %v552_v34  ;;  %v1004_v20 = vsub.f32 2.0, %v1001_v12  ;;  %v4740_v38 = vpack.c.bf16 %v129_v52, %v128_v54 }
 0x363   :  { %v554_v55 = vmul.f32 %v5514_v60, %v551_v2  ;;  %v550_v13 = vsub.f32 2.0, %v547_v7  ;;  %v5142_v7 = vld [vmem:[#allocation2 + $0x8] sm:$0xff] }
 0x364   :  { %v5060_v62 = vpop.eup %5059  ;;  %v1228_v60 = vpop.xlane.xlu1 %1227  ;;  %v1007_v3 = vmul.f32 %v5056_v63, %v1004_v20  ;;  %v5141_v63 = vld [vmem:[#allocation2] sm:$0xff] }
 0x365   :  { %4018 = vmatmul.mubr.msk.f32.vlgmr.msra.gmra.mrb[12].mxu1 %vm514_vm1, %v554_v55  ;;  %v553_v21 = vmul.f32 %v5058_v59, %v550_v13  ;;  %v1002_v25 = vmul.f32 %v5060_v62, %v994_v51  ;;  %v5062_v26 = vpop.eup %5061  ;;  %5067 = vrcp.f32 %v1228_v60 }
 0x366   :  { %4705 = vmatpush3.bf16.msra.mxu1 %v4704_v9  ;;  %4020 = vmatprep.mubr.msk.f32.mxu1 %vm5251_vm0, %v5252_v1  ;;  %v1003_v9 = vmul.f32 %v5062_v26, %v997_v39  ;;  %v1010_v44 = vmul.f32 %v5520_v24, %v1007_v3 }
 0x367   :  { %4045 = vmatprep.subr.mxu1 %v5252_v1  ;;  %v556_v5 = vmul.f32 %v5523_v16, %v553_v21  ;;  %v1005_v14 = vsub.f32 2.0, %v1002_v25  ;;  %v130_v21 = vld [vmem:[#allocation5 + $0x220] sm:$0xff]  ;;  %v131_v25 = vld [vmem:[#allocation5 + $0x228] sm:$0xff] }
 0x368   :  { %v5064_v15 = vpop.eup %5063  ;;  %v1006_v30 = vsub.f32 2.0, %v1003_v9  ;;  %v135_v9 = vld [vmem:[#allocation5 + $0x248] sm:$0xff] }
 0x369   :  { %4021 = vmatmul.mubr.msk.f32.gmra.mrb[14].mxu1 %vm514_vm1, %v555_v18  ;;  %v1008_v32 = vmul.f32 %v5060_v62, %v1005_v14  ;;  %v1232_v23 = vmul.f32 %v5064_v15, %v1222_v58  ;;  %v5143_v62 = vld [vmem:[#allocation2 + $0x10] sm:$0xff] }
 0x36a   :  { %4046 = vmatpush3.msra.mxu1 %v1015_v27  ;;  %4023 = vmatprep.mubr.msk.f32.mxu1 %vm5251_vm0, %v5252_v1  ;;  %v1009_v16 = vmul.f32 %v5062_v26, %v1006_v30  ;;  %v132_v26 = vld [vmem:[#allocation5 + $0x230] sm:$0xff]  ;;  %v133_v27 = vld [vmem:[#allocation5 + $0x238] sm:$0xff] }
 0x36b   :  { %4709 = vmatprep.subr.bf16.mxu1 %v5250_v0  ;;  %v5066_v22 = vpop.eup %5065  ;;  %v1011_v36 = vmul.f32 %v5530_v33, %v1008_v32  ;;  %v1235_v29 = vsub.f32 2.0, %v1232_v23  ;;  %v4746_v3 = vpack.c.bf16 %v133_v27, %v132_v26  ;;  %v138_v32 = vld [vmem:[#allocation5 + $0x260] sm:$0xff]  ;;  %v139_v23 = vld [vmem:[#allocation5 + $0x268] sm:$0xff] }
 0x36c   :  { %v1233_v41 = vmul.f32 %v5066_v22, %v1225_v17  ;;  %v1012_v4 = vmul.f32 %v5532_v35, %v1009_v16  ;;  %v140_v16 = vld [vmem:[#allocation5 + $0x270] sm:$0xff]  ;;  %v3471_v26 = vld [vmem:[#allocation5 + $0x304] ss:$0 sm:$0xff] }
 0x36d   :  { %4024 = vmatmul.mubr.msk.f32.gmra.mrb[16].mxu1 %vm514_vm1, %v556_v5  ;;  %v1238_v6 = vmul.f32 %v5064_v15, %v1235_v29  ;;  %v134_v5 = vld [vmem:[#allocation5 + $0x240] sm:$0xff]  ;;  %v136_v15 = vld [vmem:[#allocation5 + $0x250] sm:$0xff] }
 0x36e   :  { %4047 = vmatprep.mubr.msk.f32.mxu1 %vm5251_vm0, %v5252_v1  ;;  %v4749_v14 = vpack.c.bf16 %v135_v9, %v134_v5 }
 0x36f   :  { %v5068_v24 = vpop.eup %5067  ;;  %v1241_v48 = vmul.f32 %v5538_v37, %v1238_v6  ;;  %v145_v6 = vld [vmem:[#allocation5 + $0x298] sm:$0xff] }
 0x370   :  { %v1234_v43 = vmul.f32 %v5068_v24, %v1228_v60  ;;  %v4743_v60 = vpack.c.bf16 %v131_v25, %v130_v21 }
 0x371   :  { %4048 = vmatmul.mubr.msk.f32.vlgmr.msra.gmra.mrb[12].mxu1 %vm514_vm1, %v1010_v44  ;;  %v137_v44 = vld [vmem:[#allocation5 + $0x258] sm:$0xff] }
 0x372   :  { %4711 = vmatpush3.bf16.msra.mxu1 %v4710_v10  ;;  %4050 = vmatprep.mubr.msk.f32.mxu1 %vm5251_vm0, %v5252_v1  ;;  %v1236_v10 = vsub.f32 2.0, %v1233_v41  ;;  %v1237_v33 = vsub.f32 2.0, %v1234_v43  ;;  %v4752_v30 = vpack.c.bf16 %v137_v44, %v136_v15  ;;  %v142_v41 = vld [vmem:[#allocation5 + $0x280] sm:$0xff] }
 0x373   :  { %4075 = vmatprep.subr.mxu1 %v5252_v1  ;;  %v146_v43 = vld [vmem:[#allocation5 + $0x2a0] sm:$0xff] }
 0x374   :  { %v1239_v11 = vmul.f32 %v5066_v22, %v1236_v10  ;;  %v1240_v45 = vmul.f32 %v5068_v24, %v1237_v33  ;;  %v4755_v22 = vpack.c.bf16 %v139_v23, %v138_v32  ;;  %v143_v24 = vld [vmem:[#allocation5 + $0x288] sm:$0xff]  ;;  %v148_v33 = vld [vmem:[#allocation5 + $0x2b0] sm:$0xff] }
 0x375   :  { %4051 = vmatmul.mubr.msk.f32.gmra.mrb[14].mxu1 %vm514_vm1, %v1011_v36  ;;  %v141_v36 = vld [vmem:[#allocation5 + $0x278] sm:$0xff] }
 0x376   :  { %4076 = vmatpush3.msra.mxu1 %v1246_v42  ;;  %4053 = vmatprep.mubr.msk.f32.mxu1 %vm5251_vm0, %v5252_v1  ;;  %v1242_v35 = vmul.f32 %v5542_v40, %v1239_v11  ;;  %v1243_v47 = vmul.f32 %v5546_v31, %v1240_v45  ;;  %v126_v31 = vld [vmem:[#allocation5 + $0x200] sm:$0xff]  ;;  %v4758_v29 = vpack.c.bf16 %v141_v36, %v140_v16  ;;  %v144_v42 = vld [vmem:[#allocation5 + $0x290] sm:$0xff]  ;;  %v157_v36 = vld [vmem:[#allocation5 + $0x2f8] sm:$0xff] }
 0x377   :  { %4736 = vmatprep.subr.bf16.mxu1 %v5250_v0  ;;  %v4737_v39 = vpack.c.bf16 %v127_v28, %v126_v31  ;;  %v4764_v10 = vpack.c.bf16 %v145_v6, %v144_v42  ;;  %v155_v31 = vld [vmem:[#allocation5 + $0x2e8] sm:$0xff] }
 0x379   :  { %4054 = vmatmul.mubr.msk.f32.gmra.mrb[16].mxu1 %vm514_vm1, %v1012_v4  ;;  %v4761_v4 = vpack.c.bf16 %v143_v24, %v142_v41  ;;  %v3473_v41 = vld [vmem:[#allocation5 + $0x308] ss:$0 sm:$0xff] }
 0x37a   :  { %4077 = vmatprep.mubr.msk.f32.mxu1 %vm5251_vm0, %v5252_v1 }
 0x37d   :  { %4078 = vmatmul.mubr.msk.f32.vlgmr.msra.gmra.mrb[12].mxu1 %vm514_vm1, %v1241_v48  ;;  %v147_v48 = vld [vmem:[#allocation5 + $0x2a8] sm:$0xff] }
 0x37e   :  { %4080 = vmatprep.mubr.msk.f32.mxu1 %vm5251_vm0, %v5252_v1  ;;  %4738 = vmatpush3.bf16.msra.mxu1 %v4737_v39  ;;  %v4767_v11 = vpack.c.bf16 %v147_v48, %v146_v43 }
 0x37f   :  { %4739 = vmatprep.subr.bf16.mxu1 %v5250_v0 }
 0x381   :  { %4081 = vmatmul.mubr.msk.f32.gmra.mrb[14].mxu1 %vm514_vm1, %v1242_v35  ;;  %v149_v35 = vld [vmem:[#allocation5 + $0x2b8] sm:$0xff] }
 0x382   :  { %4083 = vmatprep.mubr.msk.f32.mxu1 %vm5251_vm0, %v5252_v1  ;;  %4741 = vmatpush3.bf16.msra.mxu1 %v4740_v38  ;;  %v4770_v45 = vpack.c.bf16 %v149_v35, %v148_v33 }
 0x383   :  { %4742 = vmatprep.subr.bf16.mxu1 %v5250_v0 }
 0x385   :  { %4084 = vmatmul.mubr.msk.f32.gmra.mrb[16].mxu1 %vm514_vm1, %v1243_v47  ;;  %v150_v47 = vld [vmem:[#allocation5 + $0x2c0] sm:$0xff] }
 0x386   :  { %4159 = vmatprep.mubr.msk.f32.mxu1 %vm5251_vm0, %v5252_v1  ;;  %4744 = vmatpush3.bf16.msra.mxu1 %v4743_v60 }
 0x387   :  { %4745 = vmatprep.subr.bf16.mxu1 %v5250_v0 }
 0x38a   :  { %4747 = vmatpush3.bf16.msra.mxu1 %v4746_v3  ;;  %v3472_v3 = vld [vmem:[#allocation5 + $0x305] ss:$0 sm:$0xff] }
 0x38b   :  { %4748 = vmatprep.subr.bf16.mxu1 %v5250_v0 }
 0x38e   :  { %4750 = vmatpush3.bf16.msra.mxu1 %v4749_v14 }
 0x38f   :  { %4751 = vmatprep.subr.bf16.mxu1 %v5250_v0 }
 0x392   :  { %4753 = vmatpush3.bf16.msra.mxu1 %v4752_v30 }
 0x393   :  { %4754 = vmatprep.subr.bf16.mxu1 %v5250_v0 }
 0x396   :  { %4756 = vmatpush3.bf16.msra.mxu1 %v4755_v22 }
 0x397   :  { %4757 = vmatprep.subr.bf16.mxu1 %v5250_v0 }
 0x39a   :  { %4759 = vmatpush3.bf16.msra.mxu1 %v4758_v29 }
 0x39b   :  { %4784 = vmatprep.subr.bf16.mxu1 %v5250_v0 }
 0x450   :  { %v1322_v37 = vpop.f32.mrb[12].mxu1 }
 0x451   :  { %v4079_v50 = vpop.f32.mrb[13].mxu1  ;;  %4119 = vmatmul.mubr.f32.vlgmr.msra.gmra.mrb[30].mxu0 %v1322_v37  ;;  %v151_v37 = vld [vmem:[#allocation5 + $0x2c8] sm:$0xff] }
 0x452   :  { %4121 = vmatprep.mubr.msk.f32.mxu0 %vm5251_vm0, %v5252_v1  ;;  %4762 = vmatpush3.bf16.msra.mxu0 %v4761_v4  ;;  %v4773_v50 = vpack.c.bf16 %v151_v37, %v150_v47  ;;  %v1706_v37 = vld [vmem:[#allocation5 + $0x310] sm:$0xff] }
 0x453   :  { %4763 = vmatprep.subr.bf16.mxu0 %v5250_v0 }
 0x454   :  { %v1327_v40 = vpop.f32.mrb[14].mxu1 }
 0x455   :  { %v4082_v51 = vpop.f32.mrb[15].mxu1  ;;  %4122 = vmatmul.mubr.f32.gmra.mrb[32].mxu0 %v1327_v40  ;;  %v152_v40 = vld [vmem:[#allocation5 + $0x2d0] sm:$0xff] }
 0x456   :  { %4124 = vmatprep.mubr.msk.f32.mxu0 %vm5251_vm0, %v5252_v1  ;;  %4765 = vmatpush3.bf16.msra.mxu0 %v4764_v10  ;;  %v153_v51 = vld [vmem:[#allocation5 + $0x2d8] sm:$0xff] }
 0x457   :  { %4766 = vmatprep.subr.bf16.mxu0 %v5250_v0 }
 0x458   :  { %v1332_v19 = vpop.f32.mrb[16].mxu1 }
 0x459   :  { %v4085_v53 = vpop.f32.mrb[17].mxu1  ;;  %4125 = vmatmul.mubr.f32.gmra.mrb[34].mxu0 %v1332_v19  ;;  %v4776_v19 = vpack.c.bf16 %v153_v51, %v152_v40  ;;  %v1722_v40 = vld [vmem:[#allocation5 + $0x390] sm:$0xff] }
 0x45a   :  { %4200 = vmatprep.mubr.msk.f32.mxu0 %vm5251_vm0, %v5252_v1  ;;  %4768 = vmatpush3.bf16.msra.mxu0 %v4767_v11  ;;  %v154_v53 = vld [vmem:[#allocation5 + $0x2e0] sm:$0xff] }
 0x45b   :  { %4769 = vmatprep.subr.bf16.mxu0 %v5250_v0  ;;  %v4779_v28 = vpack.c.bf16 %v155_v31, %v154_v53  ;;  %v1708_v53 = vld [vmem:[#allocation5 + $0x320] sm:$0xff]  ;;  %v1709_v31 = vld [vmem:[#allocation5 + $0x328] sm:$0xff] }
 0x45e   :  { %4771 = vmatpush3.bf16.msra.mxu0 %v4770_v45 }
 0x45f   :  { %4772 = vmatprep.subr.bf16.mxu0 %v5250_v0 }
 0x462   :  { %4774 = vmatpush3.bf16.msra.mxu0 %v4773_v50  ;;  %v1707_v50 = vld [vmem:[#allocation5 + $0x318] sm:$0xff] }
 0x463   :  { %4775 = vmatprep.subr.bf16.mxu0 %v5250_v0  ;;  %v4785_v51 = vpack.c.bf16 %v1707_v50, %v1706_v37  ;;  %v1737_v37 = vld [vmem:[#allocation5 + $0x408] sm:$0xff] }
 0x466   :  { %4777 = vmatpush3.bf16.msra.mxu0 %v4776_v19  ;;  %v1723_v19 = vld [vmem:[#allocation5 + $0x398] sm:$0xff] }
 0x467   :  { %4778 = vmatprep.subr.bf16.mxu0 %v5250_v0 }
 0x46a   :  { %4780 = vmatpush3.bf16.msra.mxu0 %v4779_v28  ;;  %v4809_v28 = vpack.c.bf16 %v1723_v19, %v1722_v40 }
 0x46b   :  { %4781 = vmatprep.subr.bf16.mxu0 %v5250_v0 }
 0x524   :  { %v1409_v46 = vpop.f32.mrb[30].mxu0 }
 0x525   :  { %v1410_v49 = vadd.f32 %v3470_v57, %v1409_v46  ;;  %v4120_v61 = vpop.f32.mrb[31].mxu0 }
 0x527   :  { %v5635_v8 = vadd.f32 %v5141_v63, %v1410_v49 }
 0x528   :  { %v1414_v56 = vpop.f32.mrb[32].mxu0 }
 0x529   :  { %v1415_v58 = vadd.f32 %v3470_v57, %v1414_v56  ;;  %1426 = vadd.xlane.f32.xlu0 %v5635_v8  ;;  %v4123_v59 = vpop.f32.mrb[33].mxu0  ;;  %v1435_v2 = vmul.f32 %v5635_v8, %v5635_v8 }
 0x52b   :  { %v5640_v34 = vadd.f32 %v5142_v7, %v1415_v58  ;;  %1438 = vadd.xlane.f32.xlu1 %v1435_v2 }
 0x52c   :  { %v1419_v55 = vpop.f32.mrb[34].mxu0 }
 0x52d   :  { %v1420_v12 = vadd.f32 %v3470_v57, %v1419_v55  ;;  %1428 = vadd.xlane.f32.xlu0 %v5640_v34  ;;  %v4126_v13 = vpop.f32.mrb[35].mxu0  ;;  %v1436_v17 = vmul.f32 %v5640_v34, %v5640_v34 }
 0x52f   :  { %v5645_v18 = vadd.f32 %v5143_v62, %v1420_v12  ;;  %1440 = vadd.xlane.f32.xlu1 %v1436_v17 }
 0x531   :  { %1430 = vadd.xlane.f32.xlu0 %v5645_v18  ;;  %v1437_v20 = vmul.f32 %v5645_v18, %v5645_v18 }
 0x533   :  { %1442 = vadd.xlane.f32.xlu1 %v1437_v20 }
 0x5b6   :  { %v1427_v54 = vpop.xlane.xlu0 %1426 }
 0x5b7   :  { %v1432_v39 = vmul.f32 0.03125, %v1427_v54  ;;  %v1724_v54 = vld [vmem:[#allocation5 + $0x3a0] sm:$0xff] }
 0x5b8   :  { %v1439_v52 = vpop.xlane.xlu1 %1438 }
 0x5b9   :  { %v1447_v38 = vmul.f32 %v1432_v39, %v1432_v39  ;;  %v1444_v57 = vmul.f32 0.03125, %v1439_v52  ;;  %v1453_v25 = vsub.f32 %v5635_v8, %v1432_v39  ;;  %v1725_v39 = vld [vmem:[#allocation5 + $0x3a8] sm:$0xff]  ;;  %v4788_v52 = vpack.c.bf16 %v1709_v31, %v1708_v53 }
 0x5ba   :  { %v1429_v46 = vpop.xlane.xlu0 %1428 }
 0x5bb   :  { %v1450_v49 = vsub.f32 %v1444_v57, %v1447_v38  ;;  %v1433_v61 = vmul.f32 0.03125, %v1429_v46  ;;  %v4812_v38 = vpack.c.bf16 %v1725_v39, %v1724_v54  ;;  %v3474_v57 = vld [vmem:[#allocation5 + $0x309] ss:$0 sm:$0xff] }
 0x5bc   :  { %v1441_v63 = vpop.xlane.xlu1 %1440 }
 0x5bd   :  { %v1456_v56 = vadd.f32 1e-05, %v1450_v49  ;;  %v1448_v58 = vmul.f32 %v1433_v61, %v1433_v61  ;;  %v1445_v59 = vmul.f32 0.03125, %v1441_v63  ;;  %v1454_v5 = vsub.f32 %v5640_v34, %v1433_v61 }
 0x5be   :  { %v1431_v2 = vpop.xlane.xlu0 %1430 }
 0x5bf   :  { %5069 = vrsqrt.f32 %v1456_v56  ;;  %v1451_v7 = vsub.f32 %v1445_v59, %v1448_v58  ;;  %v1434_v55 = vmul.f32 0.03125, %v1431_v2 }
 0x5c0   :  { %v1443_v12 = vpop.xlane.xlu1 %1442 }
 0x5c1   :  { %v1457_v13 = vadd.f32 1e-05, %v1451_v7  ;;  %v1449_v17 = vmul.f32 %v1434_v55, %v1434_v55  ;;  %v1446_v62 = vmul.f32 0.03125, %v1443_v12  ;;  %v1455_v30 = vsub.f32 %v5645_v18, %v1434_v55  ;;  %v156_v18 = vld [vmem:[#allocation5 + $0x2f0] sm:$0xff] }
 0x5c2   :  { %v4782_v29 = vpack.c.bf16 %v157_v36, %v156_v18  ;;  %v1716_v18 = vld [vmem:[#allocation5 + $0x360] sm:$0xff]  ;;  %v1717_v36 = vld [vmem:[#allocation5 + $0x368] sm:$0xff] }
 0x5c3   :  { %5071 = vrsqrt.f32 %v1457_v13  ;;  %v1452_v20 = vsub.f32 %v1446_v62, %v1449_v17 }
 0x5c4   :  { %4783 = vmatpush3.bf16.msra.mxu0 %v4782_v29  ;;  %v4800_v29 = vpack.c.bf16 %v1717_v36, %v1716_v18 }
 0x5c5   :  { %v1458_v21 = vadd.f32 1e-05, %v1452_v20  ;;  %4808 = vmatprep.subr.bf16.mxu0 %v5250_v0 }
 0x5c7   :  { %5073 = vrsqrt.f32 %v1458_v21  ;;  %v1710_v21 = vld [vmem:[#allocation5 + $0x330] sm:$0xff] }
 0x5c9   :  { %v5070_v60 = vpop.eup %5069 }
 0x5ca   :  { %v1462_v27 = vmul.f32 %v5070_v60, %v1453_v25  ;;  %v1711_v25 = vld [vmem:[#allocation5 + $0x338] sm:$0xff] }
 0x5cb   :  { %v4791_v60 = vpack.c.bf16 %v1711_v25, %v1710_v21  ;;  %v3475_v21 = vld [vmem:[#allocation5 + $0x306] ss:$0 sm:$0xff] }
 0x5cc   :  { %v1469_v9 = vmul.f32 %v3471_v26, %v1462_v27  ;;  %v1727_v27 = vld [vmem:[#allocation5 + $0x3b8] sm:$0xff] }
 0x5cd   :  { %v5072_v14 = vpop.eup %5071 }
 0x5ce   :  { %v5665_v15 = vadd.f32 %v3472_v3, %v1469_v9  ;;  %v1463_v44 = vmul.f32 %v5072_v14, %v1454_v5  ;;  %v1712_v5 = vld [vmem:[#allocation5 + $0x340] sm:$0xff]  ;;  %v1713_v9 = vld [vmem:[#allocation5 + $0x348] sm:$0xff] }
 0x5cf   :  { %v4794_v14 = vpack.c.bf16 %v1713_v9, %v1712_v5 }
 0x5d0   :  { %4160 = vmatmul.mubr.f32.vlgmr.msra.gmra.mrb[18].mxu1 %v5665_v15  ;;  %v1470_v32 = vmul.f32 %v3471_v26, %v1463_v44  ;;  %v1729_v44 = vld [vmem:[#allocation5 + $0x3c8] sm:$0xff] }
 0x5d1   :  { %v5074_v23 = vpop.eup %5073  ;;  %4162 = vmatprep.mubr.msk.f32.mxu1 %vm5251_vm0, %v5252_v1  ;;  %4786 = vmatpush3.bf16.msra.mxu1 %v4785_v51 }
 0x5d2   :  { %v1477_v8 = vadd.f32 %v3472_v3, %v1470_v32  ;;  %v1464_v22 = vmul.f32 %v5074_v23, %v1455_v30  ;;  %4787 = vmatprep.subr.bf16.mxu1 %v5250_v0  ;;  %v1714_v32 = vld [vmem:[#allocation5 + $0x350] sm:$0xff]  ;;  %v1715_v23 = vld [vmem:[#allocation5 + $0x358] sm:$0xff] }
 0x5d4   :  { %4163 = vmatmul.mubr.f32.gmra.mrb[20].mxu1 %v1477_v8  ;;  %v1471_v16 = vmul.f32 %v3471_v26, %v1464_v22  ;;  %v1726_v26 = vld [vmem:[#allocation5 + $0x3b0] sm:$0xff] }
 0x5d5   :  { %4165 = vmatprep.mubr.msk.f32.mxu1 %vm5251_vm0, %v5252_v1  ;;  %4789 = vmatpush3.bf16.msra.mxu1 %v4788_v52  ;;  %v1730_v22 = vld [vmem:[#allocation5 + $0x3d0] sm:$0xff] }
 0x5d6   :  { %v5673_v34 = vadd.f32 %v3472_v3, %v1471_v16  ;;  %4790 = vmatprep.subr.bf16.mxu1 %v5250_v0  ;;  %v4815_v3 = vpack.c.bf16 %v1727_v27, %v1726_v26  ;;  %v1731_v16 = vld [vmem:[#allocation5 + $0x3d8] sm:$0xff]  ;;  %v3476_v27 = vld [vmem:[#allocation5 + $0x307] ss:$0 sm:$0xff] }
 0x5d7   :  { %v1739_v26 = vld [vmem:[#allocation5 + $0x418] sm:$0xff] }
 0x5d8   :  { %4166 = vmatmul.mubr.f32.gmra.mrb[22].mxu1 %v5673_v34 }
 0x5d9   :  { %4241 = vmatprep.mubr.msk.f32.mxu1 %vm5251_vm0, %v5252_v1  ;;  %4792 = vmatpush3.bf16.msra.mxu1 %v4791_v60  ;;  %v1738_v60 = vld [vmem:[#allocation5 + $0x410] sm:$0xff] }
 0x5da   :  { %4793 = vmatprep.subr.bf16.mxu1 %v5250_v0 }
 0x5dd   :  { %4795 = vmatpush3.bf16.msra.mxu1 %v4794_v14  ;;  %v4833_v14 = vpack.c.bf16 %v1739_v26, %v1738_v60  ;;  %v5145_v60 = vld [vmem:[#allocation5 + $0x6a9] ss:$0 sm:$0xff] }
 0x5de   :  { %4796 = vmatprep.subr.bf16.mxu1 %v5250_v0 }
 0x6a3   :  { %v1549_v24 = vpop.f32.mrb[18].mxu1 }
 0x6a4   :  { %v1550_v42 = vadd.f32 %v3473_v41, %v1549_v24  ;;  %v4161_v4 = vpop.f32.mrb[19].mxu1  ;;  %v1733_v24 = vld [vmem:[#allocation5 + $0x3e8] sm:$0xff] }
 0x6a5   :  { %v1718_v4 = vld [vmem:[#allocation5 + $0x370] sm:$0xff] }
 0x6a6   :  { %v1563_v6 = vmax.f32 %v1550_v42, 0.0 }
 0x6a7   :  { %v1554_v10 = vpop.f32.mrb[20].mxu1 }
 0x6a8   :  { %v1555_v43 = vadd.f32 %v3473_v41, %v1554_v10  ;;  %v4164_v48 = vpop.f32.mrb[21].mxu1  ;;  %4201 = vmatmul.mubr.f32.vlgmr.msra.gmra.mrb[36].mxu0 %v1563_v6  ;;  %v1719_v6 = vld [vmem:[#allocation5 + $0x378] sm:$0xff] }
 0x6a9   :  { %4203 = vmatprep.mubr.msk.f32.mxu0 %vm5251_vm0, %v5252_v1  ;;  %4810 = vmatpush3.bf16.msra.mxu0 %v4809_v28  ;;  %v4803_v10 = vpack.c.bf16 %v1719_v6, %v1718_v4  ;;  %v1735_v48 = vld [vmem:[#allocation5 + $0x3f8] sm:$0xff]  ;;  %v1746_v4 = vld [vmem:[#allocation5 + $0x450] sm:$0xff] }
 0x6aa   :  { %v1564_v11 = vmax.f32 %v1555_v43, 0.0  ;;  %4811 = vmatprep.subr.bf16.mxu0 %v5250_v0  ;;  %v1734_v43 = vld [vmem:[#allocation5 + $0x3f0] sm:$0xff]  ;;  %v1747_v6 = vld [vmem:[#allocation5 + $0x458] sm:$0xff] }
 0x6ab   :  { %v1559_v33 = vpop.f32.mrb[22].mxu1 }
 0x6ac   :  { %v1560_v35 = vadd.f32 %v3473_v41, %v1559_v33  ;;  %v4167_v45 = vpop.f32.mrb[23].mxu1  ;;  %4204 = vmatmul.mubr.f32.gmra.mrb[38].mxu0 %v1564_v11  ;;  %v1732_v41 = vld [vmem:[#allocation5 + $0x3e0] sm:$0xff]  ;;  %v4827_v11 = vpack.c.bf16 %v1735_v48, %v1734_v43  ;;  %v1749_v48 = vld [vmem:[#allocation5 + $0x468] sm:$0xff] }
 0x6ad   :  { %4206 = vmatprep.mubr.msk.f32.mxu0 %vm5251_vm0, %v5252_v1  ;;  %4813 = vmatpush3.bf16.msra.mxu0 %v4812_v38  ;;  %v4824_v42 = vpack.c.bf16 %v1733_v24, %v1732_v41  ;;  %v1720_v33 = vld [vmem:[#allocation5 + $0x380] sm:$0xff]  ;;  %v1745_v24 = vld [vmem:[#allocation5 + $0x448] sm:$0xff] }
 0x6ae   :  { %v1565_v47 = vmax.f32 %v1560_v35, 0.0  ;;  %4814 = vmatprep.subr.bf16.mxu0 %v5250_v0  ;;  %v1721_v35 = vld [vmem:[#allocation5 + $0x388] sm:$0xff]  ;;  %v1736_v45 = vld [vmem:[#allocation5 + $0x400] sm:$0xff] }
 0x6af   :  { %v4830_v50 = vpack.c.bf16 %v1737_v37, %v1736_v45  ;;  %v1744_v41 = vld [vmem:[#allocation5 + $0x440] sm:$0xff]  ;;  %v1753_v37 = vld [vmem:[#allocation5 + $0x488] sm:$0xff] }
 0x6b0   :  { %4207 = vmatmul.mubr.f32.gmra.mrb[40].mxu0 %v1565_v47  ;;  %v4806_v47 = vpack.c.bf16 %v1721_v35, %v1720_v33  ;;  %v1748_v43 = vld [vmem:[#allocation5 + $0x460] sm:$0xff]  ;;  %v1750_v33 = vld [vmem:[#allocation5 + $0x470] sm:$0xff]  ;;  %v1751_v35 = vld [vmem:[#allocation5 + $0x478] sm:$0xff] }
 0x6b1   :  { %4282 = vmatprep.mubr.msk.f32.mxu0 %vm5251_vm0, %v5252_v1  ;;  %4816 = vmatpush3.bf16.msra.mxu0 %v4815_v3  ;;  %v4851_v45 = vpack.c.bf16 %v1751_v35, %v1750_v33 }
 0x6b2   :  { %4817 = vmatprep.subr.bf16.mxu0 %v5250_v0 }
 0x77b   :  { %v1636_v46 = vpop.f32.mrb[36].mxu0 }
 0x77c   :  { %v1637_v49 = vadd.f32 %v3474_v57, %v1636_v46  ;;  %v4202_v61 = vpop.f32.mrb[37].mxu0 }
 0x77e   :  { %v5690_v63 = vadd.f32 %v1637_v49, %v5665_v15  ;;  %v1728_v15 = vld [vmem:[#allocation5 + $0x3c0] sm:$0xff] }
 0x77f   :  { %v1641_v56 = vpop.f32.mrb[38].mxu0  ;;  %v4818_v30 = vpack.c.bf16 %v1729_v44, %v1728_v15 }
 0x780   :  { %v1642_v58 = vadd.f32 %v3474_v57, %v1641_v56  ;;  %1653 = vadd.xlane.f32.xlu0 %v5690_v63  ;;  %v4205_v59 = vpop.f32.mrb[39].mxu0  ;;  %v1662_v2 = vmul.f32 %v5690_v63, %v5690_v63 }
 0x781   :  { %4819 = vmatpush3.bf16.msra.mxu0 %v4818_v30  ;;  %v1740_v30 = vld [vmem:[#allocation5 + $0x420] sm:$0xff] }
 0x782   :  { %v5695_v7 = vadd.f32 %v1642_v58, %v1477_v8  ;;  %1665 = vadd.xlane.f32.xlu1 %v1662_v2  ;;  %v4797_v8 = vpack.c.bf16 %v1715_v23, %v1714_v32  ;;  %4820 = vmatprep.subr.bf16.mxu0 %v5250_v0  ;;  %v1741_v32 = vld [vmem:[#allocation5 + $0x428] sm:$0xff] }
 0x783   :  { %v1646_v55 = vpop.f32.mrb[40].mxu0 }
 0x784   :  { %v1647_v12 = vadd.f32 %v3474_v57, %v1646_v55  ;;  %1655 = vadd.xlane.f32.xlu0 %v5695_v7  ;;  %v4208_v13 = vpop.f32.mrb[41].mxu0  ;;  %v1663_v17 = vmul.f32 %v5695_v7, %v5695_v7  ;;  %4798 = vmatpush3.bf16.msra.mxu1 %v4797_v8 }
 0x785   :  { %4799 = vmatprep.subr.bf16.mxu1 %v5250_v0 }
 0x786   :  { %v5701_v62 = vadd.f32 %v1647_v12, %v5673_v34  ;;  %1667 = vadd.xlane.f32.xlu1 %v1663_v17  ;;  %v4821_v34 = vpack.c.bf16 %v1731_v16, %v1730_v22 }
 0x788   :  { %1657 = vadd.xlane.f32.xlu0 %v5701_v62  ;;  %v1664_v20 = vmul.f32 %v5701_v62, %v5701_v62  ;;  %4822 = vmatpush3.bf16.msra.mxu0 %v4821_v34  ;;  %v1743_v34 = vld [vmem:[#allocation5 + $0x438] sm:$0xff] }
 0x789   :  { %4823 = vmatprep.subr.bf16.mxu0 %v5250_v0  ;;  %4801 = vmatpush3.bf16.msra.mxu1 %v4800_v29 }
 0x78a   :  { %1669 = vadd.xlane.f32.xlu1 %v1664_v20  ;;  %4802 = vmatprep.subr.bf16.mxu1 %v5250_v0 }
 0x78c   :  { %4825 = vmatpush3.bf16.msra.mxu0 %v4824_v42  ;;  %v4842_v42 = vpack.c.bf16 %v1745_v24, %v1744_v41 }
 0x78d   :  { %4826 = vmatprep.subr.bf16.mxu0 %v5250_v0  ;;  %4804 = vmatpush3.bf16.msra.mxu1 %v4803_v10  ;;  %v4845_v10 = vpack.c.bf16 %v1747_v6, %v1746_v4 }
 0x78e   :  { %4805 = vmatprep.subr.bf16.mxu1 %v5250_v0 }
 0x790   :  { %4828 = vmatpush3.bf16.msra.mxu0 %v4827_v11  ;;  %v4848_v11 = vpack.c.bf16 %v1749_v48, %v1748_v43 }
 0x791   :  { %4829 = vmatprep.subr.bf16.mxu0 %v5250_v0  ;;  %4807 = vmatpush3.bf16.msra.mxu1 %v4806_v47  ;;  %v1752_v47 = vld [vmem:[#allocation5 + $0x480] sm:$0xff] }
 0x792   :  { %4832 = vmatprep.subr.bf16.mxu1 %v5250_v0 }
 0x794   :  { %4831 = vmatpush3.bf16.msra.mxu0 %v4830_v50  ;;  %v4854_v50 = vpack.c.bf16 %v1753_v37, %v1752_v47 }
 0x795   :  { %4856 = vmatprep.subr.bf16.mxu0 %v5250_v0 }
 0x80d   :  { %v1654_v40 = vpop.xlane.xlu0 %1653 }
 0x80e   :  { %v1659_v51 = vmul.f32 0.03125, %v1654_v40 }
 0x80f   :  { %v1666_v19 = vpop.xlane.xlu1 %1665 }
 0x810   :  { %v1674_v53 = vmul.f32 %v1659_v51, %v1659_v51  ;;  %v1671_v31 = vmul.f32 0.03125, %v1666_v19  ;;  %v1680_v17 = vsub.f32 %v5690_v63, %v1659_v51 }
 0x811   :  { %v1656_v28 = vpop.xlane.xlu0 %1655 }
 0x812   :  { %v1677_v54 = vsub.f32 %v1671_v31, %v1674_v53  ;;  %v1660_v39 = vmul.f32 0.03125, %v1656_v28  ;;  %v3478_v31 = vld [vmem:[#allocation5 + $0x611] ss:$0 sm:$0xff] }
 0x813   :  { %v1668_v52 = vpop.xlane.xlu1 %1667 }
 0x814   :  { %v1683_v38 = vadd.f32 1e-05, %v1677_v54  ;;  %v1675_v57 = vmul.f32 %v1660_v39, %v1660_v39  ;;  %v1672_v46 = vmul.f32 0.03125, %v1668_v52  ;;  %v1681_v3 = vsub.f32 %v5695_v7, %v1660_v39 }
 0x815   :  { %v1658_v49 = vpop.xlane.xlu0 %1657  ;;  %v4836_v7 = vpack.c.bf16 %v1741_v32, %v1740_v30 }
 0x816   :  { %5075 = vrsqrt.f32 %v1683_v38  ;;  %v1678_v61 = vsub.f32 %v1672_v46, %v1675_v57  ;;  %v1661_v56 = vmul.f32 0.03125, %v1658_v49 }
 0x817   :  { %v1670_v58 = vpop.xlane.xlu1 %1669 }
 0x818   :  { %v1684_v59 = vadd.f32 1e-05, %v1678_v61  ;;  %v1676_v2 = vmul.f32 %v1661_v56, %v1661_v56  ;;  %v1673_v55 = vmul.f32 0.03125, %v1670_v58  ;;  %v1682_v23 = vsub.f32 %v5701_v62, %v1661_v56  ;;  %v1742_v62 = vld [vmem:[#allocation5 + $0x430] sm:$0xff] }
 0x819   :  { %v4839_v36 = vpack.c.bf16 %v1743_v34, %v1742_v62  ;;  %v5809_v62 = vld [vmem:[#allocation5 + $0x6aa] ss:$0 sm:$0xff] }
 0x81a   :  { %5077 = vrsqrt.f32 %v1684_v59  ;;  %v1679_v12 = vsub.f32 %v1673_v55, %v1676_v2  ;;  %v3477_v59 = vld [vmem:[#allocation5 + $0x610] ss:$0 sm:$0xff] }
 0x81c   :  { %v1685_v13 = vadd.f32 1e-05, %v1679_v12  ;;  %v5771_v12 = vld [vmem:[#allocation5 + $0x6a8] ss:$0 sm:$0xff] }
 0x81e   :  { %5079 = vrsqrt.f32 %v1685_v13 }
 0x820   :  { %v5076_v20 = vpop.eup %5075 }
 0x821   :  { %v1689_v25 = vmul.f32 %v5076_v20, %v1680_v17 }
 0x823   :  { %v1696_v5 = vmul.f32 %v3475_v21, %v1689_v25 }
 0x824   :  { %v5078_v9 = vpop.eup %5077 }
 0x825   :  { %v5720_v15 = vadd.f32 %v3476_v27, %v1696_v5  ;;  %v1690_v44 = vmul.f32 %v5078_v9, %v1681_v3 }
 0x827   :  { %4242 = vmatmul.mubr.f32.vlgmr.msra.gmra.mrb[24].mxu1 %v5720_v15  ;;  %4283 = vmatmul.mubr.f32.vlgmr.msra.gmra.mrb[42].mxu0 %v5720_v15  ;;  %v1697_v63 = vmul.f32 %v3475_v21, %v1690_v44 }
 0x828   :  { %v5080_v8 = vpop.eup %5079  ;;  %4834 = vmatpush3.bf16.msra.mxu1 %v4833_v14  ;;  %4244 = vmatprep.mubr.msk.f32.mxu1 %vm5251_vm0, %v5252_v1 }
 0x829   :  { %4285 = vmatprep.mubr.msk.f32.mxu0 %vm5251_vm0, %v5252_v1  ;;  %4835 = vmatprep.subr.bf16.mxu1 %v5250_v0  ;;  %v5730_v22 = vadd.f32 %v3476_v27, %v1697_v63  ;;  %v1691_v16 = vmul.f32 %v5080_v8, %v1682_v23 }
 0x82b   :  { %4245 = vmatmul.mubr.f32.gmra.mrb[26].mxu1 %v5730_v22  ;;  %4286 = vmatmul.mubr.f32.gmra.mrb[44].mxu0 %v5730_v22  ;;  %v1698_v18 = vmul.f32 %v3475_v21, %v1691_v16 }
 0x82c   :  { %4837 = vmatpush3.bf16.msra.mxu1 %v4836_v7  ;;  %4247 = vmatprep.mubr.msk.f32.mxu1 %vm5251_vm0, %v5252_v1 }
 0x82d   :  { %4288 = vmatprep.mubr.msk.f32.mxu0 %vm5251_vm0, %v5252_v1  ;;  %4838 = vmatprep.subr.bf16.mxu1 %v5250_v0  ;;  %v5739_v29 = vadd.f32 %v3476_v27, %v1698_v18  ;;  %v3479_v27 = vld [vmem:[#allocation5 + $0x612] ss:$0 sm:$0xff]  ;;  %v5814_v18 = vld [vmem:[#allocation5 + $0x6ab] ss:$0 sm:$0xff] }
 0x82f   :  { %4248 = vmatmul.mubr.f32.gmra.mrb[28].mxu1 %v5739_v29  ;;  %4289 = vmatmul.mubr.f32.gmra.mrb[46].mxu0 %v5739_v29 }
 0x830   :  { %4840 = vmatpush3.bf16.msra.mxu1 %v4839_v36  ;;  %4323 = vmatprep.mubr.msk.f32.mxu1 %vm5251_vm0, %v5252_v1 }
 0x831   :  { %4841 = vmatprep.subr.bf16.mxu1 %v5250_v0  ;;  %4338 = vmatprep.mubr.msk.f32.mxu0 %vm5251_vm0, %v5252_v1 }
 0x834   :  { %4843 = vmatpush3.bf16.msra.mxu1 %v4842_v42 }
 0x835   :  { %4844 = vmatprep.subr.bf16.mxu1 %v5250_v0 }
 0x838   :  { %4846 = vmatpush3.bf16.msra.mxu1 %v4845_v10 }
 0x839   :  { %4847 = vmatprep.subr.bf16.mxu1 %v5250_v0 }
 0x83c   :  { %4849 = vmatpush3.bf16.msra.mxu1 %v4848_v11 }
 0x83d   :  { %4850 = vmatprep.subr.bf16.mxu1 %v5250_v0 }
 0x840   :  { %4852 = vmatpush3.bf16.msra.mxu1 %v4851_v45 }
 0x841   :  { %4853 = vmatprep.subr.bf16.mxu1 %v5250_v0 }
 0x844   :  { %4855 = vmatpush3.bf16.msra.mxu1 %v4854_v50 }
 0x845   :  { %4862 = vmatprep.subr.bf16.mxu1 %v5250_v0 }
 0x847   :  { %4324 = vmatmul.mubr.f32.vlgmr.msra.gmra.mrb[30].mxu1 %v5720_v15 }
 0x848   :  { %4326 = vmatprep.mubr.msk.f32.mxu1 %vm5251_vm0, %v5252_v1 }
 0x84b   :  { %4327 = vmatmul.mubr.f32.gmra.mrb[32].mxu1 %v5730_v22 }
 0x84c   :  { %4329 = vmatprep.mubr.msk.f32.mxu1 %vm5251_vm0, %v5252_v1 }
 0x84f   :  { %4330 = vmatmul.mubr.f32.gmra.mrb[34].mxu1 %v5739_v29 }
 0x850   :  { %4368 = vmatprep.mubr.msk.f32.mxu1 %vm5251_vm0, %v5252_v1 }
 0x8fa   :  { %v1882_v40 = vpop.f32.mrb[24].mxu1  ;;  %v1966_v51 = vpop.f32.mrb[42].mxu0 }
 0x8fb   :  { %v4243_v19 = vpop.f32.mrb[25].mxu1  ;;  %v4284_v53 = vpop.f32.mrb[43].mxu0  ;;  %v1967_v39 = vadd.f32 %v3478_v31, %v1966_v51  ;;  %v5766_v2 = vadd.f32 %v3477_v59, %v1882_v40 }
 0x8fd   :  { %v2064_v13 = vmul.f32 %v5771_v12, %v5766_v2  ;;  %v2198_v26 = vmul.f32 %v5145_v60, %v5766_v2  ;;  %v2510_v48 = vmul.f32 %v5809_v62, %v5766_v2  ;;  %v2736_v37 = vmul.f32 %v5814_v18, %v5766_v2  ;;  %v5149_v2 = vld [vmem:[#allocation7 + $0x8] sm:$0xff] }
 0x8fe   :  { %v1887_v28 = vpop.f32.mrb[26].mxu1  ;;  %v1971_v54 = vpop.f32.mrb[44].mxu0 }
 0x8ff   :  { %v1972_v52 = vadd.f32 %v3478_v31, %v1971_v54  ;;  %v4246_v38 = vpop.f32.mrb[27].mxu1  ;;  %v4287_v57 = vpop.f32.mrb[45].mxu0  ;;  %v5775_v17 = vadd.f32 %v3477_v59, %v1887_v28 }
 0x900   :  { %v5148_v57 = vld [vmem:[#allocation7] sm:$0xff] }
 0x901   :  { %v5762_v46 = vpack.c.bf16 %v1972_v52, %v1967_v39  ;;  %v2065_v21 = vmul.f32 %v5771_v12, %v5775_v17  ;;  %v2199_v14 = vmul.f32 %v5145_v60, %v5775_v17  ;;  %v2511_v45 = vmul.f32 %v5809_v62, %v5775_v17 }
 0x902   :  { %v1892_v49 = vpop.f32.mrb[28].mxu1  ;;  %v1976_v61 = vpop.f32.mrb[46].mxu0  ;;  %v2737_v50 = vmul.f32 %v5814_v18, %v5775_v17 }
 0x903   :  { %v4249_v56 = vpop.f32.mrb[29].mxu1  ;;  %v4290_v58 = vpop.f32.mrb[47].mxu0  ;;  %4858 = vmatpush3.bf16.xpose.msra.mxu0 %v5762_v46  ;;  %v5768_v55 = vadd.f32 %v3478_v31, %v1976_v61  ;;  %v5781_v20 = vadd.f32 %v3477_v59, %v1892_v49 }
 0x904   :  { %4336 = vmatprep.subr.mxu0 %v5252_v1 }
 0x905   :  { %v2066_v25 = vmul.f32 %v5771_v12, %v5781_v20  ;;  %v2200_v8 = vmul.f32 %v5145_v60, %v5781_v20  ;;  %v2512_v47 = vmul.f32 %v5809_v62, %v5781_v20  ;;  %v2738_v40 = vmul.f32 %v5814_v18, %v5781_v20 }
 0x90b   :  { %4337 = vmatpush3.xpose.msra.mxu0 %v5768_v55 }
 0x90c   :  { %4859 = vmatprep.subr.bf16.mxu0 %v5250_v0 }
 0x90e   :  { %4339 = vmatmul.mubr.f32.vlgmr.msra.gmra.mrb[48].mxu0 %v2064_v13 }
 0x90f   :  { %4861 = vmatpush3.bf16.xpose.msra.mxu0 %v5762_v46  ;;  %4341 = vmatprep.mubr.msk.f32.mxu0 %vm5251_vm0, %v5252_v1 }
 0x910   :  { %4351 = vmatprep.subr.mxu0 %v5252_v1 }
 0x912   :  { %4342 = vmatmul.mubr.f32.gmra.mrb[50].mxu0 %v2065_v21 }
 0x913   :  { %4344 = vmatprep.mubr.msk.f32.mxu0 %vm5251_vm0, %v5252_v1 }
 0x916   :  { %4345 = vmatmul.mubr.f32.gmra.mrb[52].mxu0 %v2066_v25 }
 0x917   :  { %4352 = vmatpush3.xpose.msra.mxu0 %v5768_v55  ;;  %4353 = vmatprep.mubr.msk.f32.mxu0 %vm5251_vm0, %v5252_v1 }
 0x918   :  { %4868 = vmatprep.subr.bf16.mxu0 %v5250_v0 }
 0x91a   :  { %v2050_v3 = vpop.f32.mrb[30].mxu1  ;;  %4354 = vmatmul.mubr.f32.vlgmr.msra.gmra.mrb[54].mxu0 %v2198_v26 }
 0x91b   :  { %v4325_v5 = vpop.f32.mrb[31].mxu1  ;;  %4870 = vmatpush3.bf16.xpose.msra.mxu0 %v5762_v46  ;;  %4356 = vmatprep.mubr.msk.f32.mxu0 %vm5251_vm0, %v5252_v1  ;;  %v2051_v9 = vadd.f32 %v3479_v27, %v2050_v3 }
 0x91c   :  { %4396 = vmatprep.subr.mxu0 %v5252_v1 }
 0x91d   :  { %v5803_v23 = vmul.f32 %v5771_v12, %v2051_v9  ;;  %v2329_v63 = vmul.f32 %v5145_v60, %v2051_v9  ;;  %v5820_v41 = vmul.f32 %v5809_v62, %v2051_v9  ;;  %v5823_v24 = vmul.f32 %v5814_v18, %v2051_v9 }
 0x91e   :  { %v2055_v44 = vpop.f32.mrb[32].mxu1  ;;  %4357 = vmatmul.mubr.f32.gmra.mrb[56].mxu0 %v2199_v14 }
 0x91f   :  { %v2056_v30 = vadd.f32 %v3479_v27, %v2055_v44  ;;  %v4328_v32 = vpop.f32.mrb[33].mxu1  ;;  %4359 = vmatprep.mubr.msk.f32.mxu0 %vm5251_vm0, %v5252_v1 }
 0x921   :  { %v5807_v7 = vmul.f32 %v5771_v12, %v2056_v30  ;;  %v2330_v16 = vmul.f32 %v5145_v60, %v2056_v30  ;;  %v5812_v34 = vmul.f32 %v5809_v62, %v2056_v30  ;;  %v5817_v36 = vmul.f32 %v5814_v18, %v2056_v30 }
 0x922   :  { %v2060_v42 = vpop.f32.mrb[34].mxu1  ;;  %4360 = vmatmul.mubr.f32.gmra.mrb[58].mxu0 %v2200_v8 }
 0x923   :  { %v5825_v4 = vadd.f32 %v3479_v27, %v2060_v42  ;;  %v4331_v6 = vpop.f32.mrb[35].mxu1  ;;  %4397 = vmatpush3.xpose.msra.mxu0 %v5768_v55  ;;  %v4863_v10 = vpack.c.bf16 %v2330_v16, %v2329_v63  ;;  %4398 = vmatprep.mubr.msk.f32.mxu0 %vm5251_vm0, %v5252_v1  ;;  %v4866_v43 = vpack.c.bf16 %v5807_v7, %v5803_v23  ;;  %v5150_v27 = vld [vmem:[#allocation7 + $0x10] sm:$0xff] }
 0x924   :  { %4874 = vmatprep.subr.bf16.mxu0 %v5250_v0  ;;  %v4872_v11 = vpack.c.bf16 %v5812_v34, %v5820_v41  ;;  %v4878_v33 = vpack.c.bf16 %v5817_v36, %v5823_v24 }
 0x925   :  { %4864 = vmatpush3.bf16.msra.mxu1 %v4863_v10  ;;  %v2331_v35 = vmul.f32 %v5145_v60, %v5825_v4 }
 0x926   :  { %4399 = vmatmul.mubr.f32.vlgmr.msra.gmra.mrb[60].mxu0 %v2510_v48  ;;  %4366 = vmatprep.subr.mxu1 %v5252_v1 }
 0x927   :  { %4876 = vmatpush3.bf16.xpose.msra.mxu0 %v5762_v46  ;;  %4401 = vmatprep.mubr.msk.f32.mxu0 %vm5251_vm0, %v5252_v1 }
 0x928   :  { %4426 = vmatprep.subr.mxu0 %v5252_v1 }
 0x929   :  { %4367 = vmatpush3.msra.mxu1 %v2331_v35 }
 0x92a   :  { %4402 = vmatmul.mubr.f32.gmra.mrb[62].mxu0 %v2511_v45  ;;  %4865 = vmatprep.subr.bf16.mxu1 %v5250_v0 }
 0x92b   :  { %4404 = vmatprep.mubr.msk.f32.mxu0 %vm5251_vm0, %v5252_v1 }
 0x92e   :  { %4405 = vmatmul.mubr.f32.gmra.mrb[64].mxu0 %v2512_v47 }
 0x92f   :  { %4427 = vmatpush3.xpose.msra.mxu0 %v5768_v55  ;;  %4428 = vmatprep.mubr.msk.f32.mxu0 %vm5251_vm0, %v5252_v1 }
 0x930   :  { %4880 = vmatprep.subr.bf16.mxu0 %v5250_v0 }
 0x932   :  { %4429 = vmatmul.mubr.f32.vlgmr.msra.gmra.mrb[66].mxu0 %v2736_v37 }
 0x933   :  { %4431 = vmatprep.mubr.msk.f32.mxu0 %vm5251_vm0, %v5252_v1 }
 0x936   :  { %4432 = vmatmul.mubr.f32.gmra.mrb[68].mxu0 %v2737_v50 }
 0x937   :  { %4434 = vmatprep.mubr.msk.f32.mxu0 %vm5251_vm0, %v5252_v1 }
 0x93a   :  { %4435 = vmatmul.mubr.f32.gmra.mrb[70].mxu0 %v2738_v40 }
 0x93b   :  { %4484 = vmatprep.mubr.msk.f32.mxu0 %vm5251_vm0, %v5252_v1 }
 0x9e1   :  { %v2133_v51 = vpop.f32.mrb[48].mxu0 }
 0x9e2   :  { %v4340_v19 = vpop.f32.mrb[49].mxu0  ;;  %v2147_v49 = vmul.f32 0.35355338, %v2133_v51 }
 0x9e4   :  { %v5874_v20 = vadd.f32 %v5148_v57, %v2147_v49 }
 0x9e5   :  { %v2138_v53 = vpop.f32.mrb[50].mxu0 }
 0x9e6   :  { %v4343_v31 = vpop.f32.mrb[51].mxu0  ;;  %v2148_v13 = vmul.f32 0.35355338, %v2138_v53  ;;  %v2153_v9 = vsel %vm514_vm1, %v5874_v20, -inf }
 0x9e8   :  { %v2151_v63 = vadd.f32 %v5149_v2, %v2148_v13 }
 0x9e9   :  { %v2143_v28 = vpop.f32.mrb[52].mxu0 }
 0x9ea   :  { %v4346_v54 = vpop.f32.mrb[53].mxu0  ;;  %v2149_v21 = vmul.f32 0.35355338, %v2143_v28  ;;  %v2156_v10 = vsel %vm514_vm1, %v2151_v63, -inf }
 0x9ec   :  { %v2152_v32 = vadd.f32 %v5150_v27, %v2149_v21 }
 0x9ed   :  { %v2267_v39 = vpop.f32.mrb[54].mxu0 }
 0x9ee   :  { %v2281_v52 = vmul.f32 0.35355338, %v2267_v39  ;;  %v4355_v38 = vpop.f32.mrb[55].mxu0  ;;  %v2159_v6 = vsel %vm514_vm1, %v2152_v32, -inf }
 0x9f0   :  { %v5868_v46 = vadd.f32 %v5148_v57, %v2281_v52 }
 0x9f1   :  { %v2272_v61 = vpop.f32.mrb[56].mxu0 }
 0x9f2   :  { %v2282_v56 = vmul.f32 0.35355338, %v2272_v61  ;;  %v4358_v58 = vpop.f32.mrb[57].mxu0  ;;  %v2287_v59 = vsel %vm514_vm1, %v5868_v46, -inf }
 0x9f3   :  { %2288 = vmax.xlane.f32.xlu0 %v2287_v59 }
 0x9f4   :  { %v5872_v55 = vadd.f32 %v5149_v2, %v2282_v56 }
 0x9f5   :  { %v2277_v17 = vpop.f32.mrb[58].mxu0 }
 0x9f6   :  { %v2283_v25 = vmul.f32 0.35355338, %v2277_v17  ;;  %v4361_v60 = vpop.f32.mrb[59].mxu0  ;;  %v2290_v26 = vsel %vm514_vm1, %v5872_v55, -inf }
 0x9f7   :  { %2291 = vmax.xlane.f32.xlu1 %v2290_v26 }
 0x9f8   :  { %v2286_v3 = vadd.f32 %v5150_v27, %v2283_v25 }
 0x9f9   :  { %v2579_v5 = vpop.f32.mrb[60].mxu0 }
 0x9fa   :  { %v2593_v14 = vmul.f32 0.35355338, %v2579_v5  ;;  %v4400_v44 = vpop.f32.mrb[61].mxu0  ;;  %v2293_v30 = vsel %vm514_vm1, %v2286_v3, -inf }
 0x9fb   :  { %2154 = vmax.xlane.f32.xlu1 %v2153_v9  ;;  %2294 = vmax.xlane.f32.xlu0 %v2293_v30 }
 0x9fc   :  { %v5883_v48 = vadd.f32 %v5148_v57, %v2593_v14 }
 0x9fd   :  { %v2584_v8 = vpop.f32.mrb[62].mxu0 }
 0x9fe   :  { %v2594_v16 = vmul.f32 0.35355338, %v2584_v8  ;;  %v4403_v42 = vpop.f32.mrb[63].mxu0  ;;  %v2599_v50 = vsel %vm514_vm1, %v5883_v48, -inf }
 0x9ff   :  { %2160 = vmax.xlane.f32.xlu1 %v2159_v6  ;;  %2157 = vmax.xlane.f32.xlu0 %v2156_v10 }
 0xa00   :  { %v2597_v35 = vadd.f32 %v5149_v2, %v2594_v16 }
 0xa01   :  { %v2589_v45 = vpop.f32.mrb[64].mxu0 }
 0xa02   :  { %v2595_v47 = vmul.f32 0.35355338, %v2589_v45  ;;  %v4406_v37 = vpop.f32.mrb[65].mxu0  ;;  %v2602_v40 = vsel %vm514_vm1, %v2597_v35, -inf }
 0xa03   :  { %2600 = vmax.xlane.f32.xlu0 %v2599_v50  ;;  %2603 = vmax.xlane.f32.xlu1 %v2602_v40 }
 0xa04   :  { %v2598_v51 = vadd.f32 %v5150_v27, %v2595_v47 }
 0xa05   :  { %v2805_v19 = vpop.f32.mrb[66].mxu0 }
 0xa06   :  { %v2819_v53 = vmul.f32 0.35355338, %v2805_v19  ;;  %v4430_v31 = vpop.f32.mrb[67].mxu0  ;;  %v2605_v28 = vsel %vm514_vm1, %v2598_v51, -inf }
 0xa07   :  { %2606 = vmax.xlane.f32.xlu0 %v2605_v28 }
 0xa08   :  { %v5889_v54 = vadd.f32 %v5148_v57, %v2819_v53 }
 0xa09   :  { %v2810_v39 = vpop.f32.mrb[68].mxu0 }
 0xa0a   :  { %v2820_v52 = vmul.f32 0.35355338, %v2810_v39  ;;  %v4433_v38 = vpop.f32.mrb[69].mxu0  ;;  %v2825_v49 = vsel %vm514_vm1, %v5889_v54, -inf }
 0xa0b   :  { %2826 = vmax.xlane.f32.xlu1 %v2825_v49 }
 0xa0c   :  { %v5893_v61 = vadd.f32 %v5149_v2, %v2820_v52 }
 0xa0d   :  { %v2815_v56 = vpop.f32.mrb[70].mxu0 }
 0xa0e   :  { %v2821_v58 = vmul.f32 0.35355338, %v2815_v56  ;;  %v4436_v59 = vpop.f32.mrb[71].mxu0  ;;  %v2828_v13 = vsel %vm514_vm1, %v5893_v61, -inf }
 0xa0f   :  { %2829 = vmax.xlane.f32.xlu0 %v2828_v13 }
 0xa10   :  { %v5897_v17 = vadd.f32 %v5150_v27, %v2821_v58 }
 0xa12   :  { %v2831_v57 = vsel %vm514_vm1, %v5897_v17, -inf }
 0xa13   :  { %2832 = vmax.xlane.f32.xlu1 %v2831_v57 }
 0xa80   :  { %v2289_v21 = vpop.xlane.xlu0 %2288 }
 0xa81   :  { %v2296_v25 = vsub.f32 %v5868_v46, %v2289_v21 }
 0xa83   :  { %v2299_v60 = vmul.f32 1.442695, %v2296_v25 }
 0xa84   :  { %v2292_v26 = vpop.xlane.xlu1 %2291 }
 0xa85   :  { %5081 = vpow2.f32 %v2299_v60  ;;  %v2297_v2 = vsub.f32 %v5872_v55, %v2292_v26 }
 0xa87   :  { %v2301_v5 = vmul.f32 1.442695, %v2297_v2 }
 0xa88   :  { %v2155_v9 = vpop.xlane.xlu1 %2154  ;;  %v2295_v14 = vpop.xlane.xlu0 %2294 }
 0xa89   :  { %5083 = vpow2.f32 %v2301_v5  ;;  %v2162_v44 = vsub.f32 %v5874_v20, %v2155_v9  ;;  %v2298_v27 = vsub.f32 %v2286_v3, %v2295_v14 }
 0xa8b   :  { %v2165_v30 = vmul.f32 1.442695, %v2162_v44  ;;  %v2303_v8 = vmul.f32 1.442695, %v2298_v27 }
 0xa8c   :  { %v2161_v16 = vpop.xlane.xlu1 %2160  ;;  %v2158_v42 = vpop.xlane.xlu0 %2157 }
 0xa8d   :  { %5085 = vpow2.f32 %v2165_v30  ;;  %v2164_v6 = vsub.f32 %v2152_v32, %v2161_v16  ;;  %v2163_v10 = vsub.f32 %v2151_v63, %v2158_v42 }
 0xa8e   :  { %5087 = vpow2.f32 %v2303_v8 }
 0xa8f   :  { %v5904_v46 = vpop.eup %5081  ;;  %v2169_v45 = vmul.f32 1.442695, %v2164_v6  ;;  %v2167_v47 = vmul.f32 1.442695, %v2163_v10  ;;  %v1754_v6 = vld [vmem:[#allocation5 + $0x490] sm:$0xff]  ;;  %v1755_v10 = vld [vmem:[#allocation5 + $0x498] sm:$0xff] }
 0xa90   :  { %v2601_v55 = vpop.xlane.xlu0 %2600  ;;  %v2604_v37 = vpop.xlane.xlu1 %2603  ;;  %v2305_v50 = vsel %vm514_vm1, %v5904_v46, 0.0 }
 0xa91   :  { %5089 = vpow2.f32 %v2169_v45  ;;  %v2608_v20 = vsub.f32 %v5883_v48, %v2601_v55  ;;  %v2609_v3 = vsub.f32 %v2597_v35, %v2604_v37  ;;  %2306 = vadd.xlane.f32.xlu0 %v2305_v50  ;;  %v1756_v45 = vld [vmem:[#allocation5 + $0x4a0] sm:$0xff]  ;;  %v1757_v55 = vld [vmem:[#allocation5 + $0x4a8] sm:$0xff]  ;;  %v1758_v50 = vld [vmem:[#allocation5 + $0x4b0] sm:$0xff] }
 0xa92   :  { %5091 = vpow2.f32 %v2167_v47  ;;  %v4881_v47 = vpack.c.bf16 %v1755_v10, %v1754_v6  ;;  %v4884_v37 = vpack.c.bf16 %v1757_v55, %v1756_v45 }
 0xa93   :  { %v5909_v40 = vpop.eup %5083  ;;  %v2611_v32 = vmul.f32 1.442695, %v2608_v20  ;;  %v2613_v63 = vmul.f32 1.442695, %v2609_v3  ;;  %v1759_v20 = vld [vmem:[#allocation5 + $0x4b8] sm:$0xff] }
 0xa94   :  { %v2607_v19 = vpop.xlane.xlu0 %2606  ;;  %v2308_v53 = vsel %vm514_vm1, %v5909_v40, 0.0  ;;  %4882 = vmatpush3.bf16.msra.mxu0 %v4881_v47  ;;  %v4887_v3 = vpack.c.bf16 %v1759_v20, %v1758_v50 }
 0xa95   :  { %5093 = vpow2.f32 %v2611_v32  ;;  %v2610_v31 = vsub.f32 %v2598_v51, %v2607_v19  ;;  %2309 = vadd.xlane.f32.xlu1 %v2308_v53  ;;  %4883 = vmatprep.subr.bf16.mxu0 %v5250_v0  ;;  %v1760_v32 = vld [vmem:[#allocation5 + $0x4c0] sm:$0xff]  ;;  %v1762_v53 = vld [vmem:[#allocation5 + $0x4d0] sm:$0xff] }
 0xa96   :  { %5095 = vpow2.f32 %v2613_v63  ;;  %v1761_v63 = vld [vmem:[#allocation5 + $0x4c8] sm:$0xff] }
 0xa97   :  { %v5913_v28 = vpop.eup %5085  ;;  %v2615_v39 = vmul.f32 1.442695, %v2610_v31  ;;  %v4890_v19 = vpack.c.bf16 %v1761_v63, %v1760_v32  ;;  %v1763_v31 = vld [vmem:[#allocation5 + $0x4d8] sm:$0xff] }
 0xa98   :  { %v5915_v52 = vpop.eup %5087  ;;  %v2827_v48 = vpop.xlane.xlu1 %2826  ;;  %v2171_v35 = vsel %vm514_vm1, %v5913_v28, 0.0  ;;  %4885 = vmatpush3.bf16.msra.mxu0 %v4884_v37 }
 0xa99   :  { %5097 = vpow2.f32 %v2615_v39  ;;  %v2834_v38 = vsub.f32 %v5889_v54, %v2827_v48  ;;  %v2311_v49 = vsel %vm514_vm1, %v5915_v52, 0.0  ;;  %2172 = vadd.xlane.f32.xlu1 %v2171_v35  ;;  %4886 = vmatprep.subr.bf16.mxu0 %v5250_v0  ;;  %v4893_v39 = vpack.c.bf16 %v1763_v31, %v1762_v53  ;;  %v1764_v48 = vld [vmem:[#allocation5 + $0x4e0] sm:$0xff]  ;;  %v1765_v35 = vld [vmem:[#allocation5 + $0x4e8] sm:$0xff] }
 0xa9a   :  { %2312 = vadd.xlane.f32.xlu0 %v2311_v49  ;;  %v1766_v49 = vld [vmem:[#allocation5 + $0x4f0] sm:$0xff] }
 0xa9b   :  { %v5922_v51 = vpop.eup %5089  ;;  %v2837_v56 = vmul.f32 1.442695, %v2834_v38  ;;  %v4896_v38 = vpack.c.bf16 %v1765_v35, %v1764_v48  ;;  %v2197_v48 = vmul.f32 %v5771_v12, %v5825_v4 }
 0xa9c   :  { %v5924_v58 = vpop.eup %5091  ;;  %v2830_v59 = vpop.xlane.xlu0 %2829  ;;  %v2177_v13 = vsel %vm514_vm1, %v5922_v51, 0.0  ;;  %4888 = vmatpush3.bf16.msra.mxu0 %v4887_v3 }
 0xa9d   :  { %5099 = vpow2.f32 %v2837_v56  ;;  %v2835_v57 = vsub.f32 %v5893_v61, %v2830_v59  ;;  %v2174_v54 = vsel %vm514_vm1, %v5924_v58, 0.0  ;;  %2178 = vadd.xlane.f32.xlu1 %v2177_v13  ;;  %4889 = vmatprep.subr.bf16.mxu0 %v5250_v0  ;;  %v1767_v56 = vld [vmem:[#allocation5 + $0x4f8] sm:$0xff]  ;;  %v1768_v13 = vld [vmem:[#allocation5 + $0x500] sm:$0xff] }
 0xa9e   :  { %2175 = vadd.xlane.f32.xlu0 %v2174_v54  ;;  %v4899_v59 = vpack.c.bf16 %v1767_v56, %v1766_v49 }
 0xa9f   :  { %v5931_v21 = vpop.eup %5093  ;;  %v2839_v25 = vmul.f32 1.442695, %v2835_v57  ;;  %v1769_v57 = vld [vmem:[#allocation5 + $0x508] sm:$0xff] }
 0xaa0   :  { %v5933_v60 = vpop.eup %5095  ;;  %v2833_v26 = vpop.xlane.xlu1 %2832  ;;  %v2617_v2 = vsel %vm514_vm1, %v5931_v21, 0.0  ;;  %4891 = vmatpush3.bf16.msra.mxu0 %v4890_v19  ;;  %v4902_v54 = vpack.c.bf16 %v1769_v57, %v1768_v13 }
 0xaa1   :  { %5101 = vpow2.f32 %v2839_v25  ;;  %v2836_v5 = vsub.f32 %v5897_v17, %v2833_v26  ;;  %v2620_v61 = vsel %vm514_vm1, %v5933_v60, 0.0  ;;  %4892 = vmatprep.subr.bf16.mxu0 %v5250_v0 }
 0xaa2   :  { %2618 = vadd.xlane.f32.xlu0 %v2617_v2  ;;  %2621 = vadd.xlane.f32.xlu1 %v2620_v61 }
 0xaa3   :  { %v5940_v9 = vpop.eup %5097  ;;  %v2841_v14 = vmul.f32 1.442695, %v2836_v5 }
 0xaa4   :  { %v2623_v44 = vsel %vm514_vm1, %v5940_v9, 0.0  ;;  %4894 = vmatpush3.bf16.msra.mxu0 %v4893_v39 }
 0xaa5   :  { %5103 = vpow2.f32 %v2841_v14  ;;  %4895 = vmatprep.subr.bf16.mxu0 %v5250_v0 }
 0xaa6   :  { %2624 = vadd.xlane.f32.xlu0 %v2623_v44 }
 0xaa7   :  { %v5944_v27 = vpop.eup %5099 }
 0xaa8   :  { %v2843_v30 = vsel %vm514_vm1, %v5944_v27, 0.0  ;;  %4897 = vmatpush3.bf16.msra.mxu0 %v4896_v38 }
 0xaa9   :  { %2844 = vadd.xlane.f32.xlu1 %v2843_v30  ;;  %4898 = vmatprep.subr.bf16.mxu0 %v5250_v0 }
 0xaab   :  { %v5948_v17 = vpop.eup %5101 }
 0xaac   :  { %v2846_v8 = vsel %vm514_vm1, %v5948_v17, 0.0  ;;  %4900 = vmatpush3.bf16.msra.mxu0 %v4899_v59 }
 0xaad   :  { %2847 = vadd.xlane.f32.xlu0 %v2846_v8  ;;  %4901 = vmatprep.subr.bf16.mxu0 %v5250_v0 }
 0xaaf   :  { %v5952_v16 = vpop.eup %5103 }
 0xab0   :  { %v2849_v42 = vsel %vm514_vm1, %v5952_v16, 0.0  ;;  %4903 = vmatpush3.bf16.msra.mxu0 %v4902_v54 }
 0xab1   :  { %2850 = vadd.xlane.f32.xlu1 %v2849_v42  ;;  %4928 = vmatprep.subr.bf16.mxu0 %v5250_v0 }
 0xb1e   :  { %v2307_v25 = vpop.xlane.xlu0 %2306 }
 0xb1f   :  { %5105 = vrcp.f32 %v2307_v25 }
 0xb22   :  { %v2310_v26 = vpop.xlane.xlu1 %2309 }
 0xb23   :  { %5107 = vrcp.f32 %v2310_v26 }
 0xb26   :  { %v2173_v2 = vpop.xlane.xlu1 %2172 }
 0xb27   :  { %v2313_v5 = vpop.xlane.xlu0 %2312  ;;  %5109 = vrcp.f32 %v2173_v2 }
 0xb28   :  { %5111 = vrcp.f32 %v2313_v5 }
 0xb29   :  { %v5106_v61 = vpop.eup %5105 }
 0xb2a   :  { %v2317_v14 = vmul.f32 %v5106_v61, %v2307_v25  ;;  %v2179_v44 = vpop.xlane.xlu1 %2178 }
 0xb2b   :  { %v2176_v30 = vpop.xlane.xlu0 %2175  ;;  %5113 = vrcp.f32 %v2179_v44 }
 0xb2c   :  { %v2320_v8 = vsub.f32 2.0, %v2317_v14  ;;  %5115 = vrcp.f32 %v2176_v30 }
 0xb2d   :  { %v5108_v42 = vpop.eup %5107 }
 0xb2e   :  { %v2323_v6 = vmul.f32 %v5106_v61, %v2320_v8  ;;  %v2318_v10 = vmul.f32 %v5108_v42, %v2310_v26 }
 0xb2f   :  { %v2619_v45 = vpop.xlane.xlu0 %2618  ;;  %v2622_v50 = vpop.xlane.xlu1 %2621 }
 0xb30   :  { %v2326_v47 = vmul.f32 %v5904_v46, %v2323_v6  ;;  %v2321_v55 = vsub.f32 2.0, %v2318_v10  ;;  %5117 = vrcp.f32 %v2619_v45 }
 0xb31   :  { %v5110_v37 = vpop.eup %5109  ;;  %5119 = vrcp.f32 %v2622_v50 }
 0xb32   :  { %v5112_v20 = vpop.eup %5111  ;;  %v2324_v3 = vmul.f32 %v5108_v42, %v2321_v55  ;;  %v2183_v32 = vmul.f32 %v5110_v37, %v2173_v2  ;;  %4369 = vmatmul.mubr.msk.f32.vlgmr.msra.gmra.mrb[36].mxu1 %vm514_vm1, %v2326_v47 }
 0xb33   :  { %v2319_v63 = vmul.f32 %v5112_v20, %v2313_v5  ;;  %4867 = vmatpush3.bf16.msra.mxu1 %v4866_v43  ;;  %4371 = vmatprep.mubr.msk.f32.mxu1 %vm5251_vm0, %v5252_v1  ;;  %v2625_v39 = vpop.xlane.xlu0 %2624 }
 0xb34   :  { %v2327_v19 = vmul.f32 %v5909_v40, %v2324_v3  ;;  %4381 = vmatprep.subr.mxu1 %v5252_v1  ;;  %v2186_v31 = vsub.f32 2.0, %v2183_v32  ;;  %5121 = vrcp.f32 %v2625_v39 }
 0xb35   :  { %v5114_v46 = vpop.eup %5113  ;;  %v2322_v53 = vsub.f32 2.0, %v2319_v63 }
 0xb36   :  { %v5116_v35 = vpop.eup %5115  ;;  %4372 = vmatmul.mubr.msk.f32.gmra.mrb[38].mxu1 %vm514_vm1, %v2327_v19  ;;  %v2189_v40 = vmul.f32 %v5110_v37, %v2186_v31  ;;  %v2185_v49 = vmul.f32 %v5114_v46, %v2179_v44  ;;  %v2845_v56 = vpop.xlane.xlu1 %2844  ;;  %v2643_v44 = vmul.f32 %v5809_v62, %v5825_v4  ;;  %v2869_v37 = vmul.f32 %v5814_v18, %v5825_v4  ;;  %v1772_v31 = vld [vmem:[#allocation5 + $0x520] sm:$0xff] }
 0xb37   :  { %v2325_v23 = vmul.f32 %v5112_v20, %v2322_v53  ;;  %v2184_v7 = vmul.f32 %v5116_v35, %v2176_v30  ;;  %4382 = vmatpush3.msra.mxu1 %v2197_v48  ;;  %4374 = vmatprep.mubr.msk.f32.mxu1 %vm5251_vm0, %v5252_v1  ;;  %5123 = vrcp.f32 %v2845_v56  ;;  %v1771_v53 = vld [vmem:[#allocation5 + $0x518] sm:$0xff]  ;;  %v1773_v48 = vld [vmem:[#allocation5 + $0x528] sm:$0xff] }
 0xb38   :  { %4871 = vmatprep.subr.bf16.mxu1 %v5250_v0  ;;  %v2192_v12 = vmul.f32 %v5913_v28, %v2189_v40  ;;  %v2188_v57 = vsub.f32 2.0, %v2185_v49 }
 0xb39   :  { %v2328_v43 = vmul.f32 %v5915_v52, %v2325_v23  ;;  %v2187_v38 = vsub.f32 2.0, %v2184_v7  ;;  %v3492_v23 = vld [vmem:[#allocation5 + $0x613] ss:$0 sm:$0xff] }
 0xb3a   :  { %v5118_v59 = vpop.eup %5117  ;;  %v2848_v25 = vpop.xlane.xlu0 %2847  ;;  %v2191_v2 = vmul.f32 %v5114_v46, %v2188_v57 }
 0xb3b   :  { %4375 = vmatmul.mubr.msk.f32.gmra.mrb[40].mxu1 %vm514_vm1, %v2328_v43  ;;  %v2190_v13 = vmul.f32 %v5116_v35, %v2187_v38  ;;  %v2629_v54 = vmul.f32 %v5118_v59, %v2619_v45  ;;  %v5120_v26 = vpop.eup %5119  ;;  %5125 = vrcp.f32 %v2848_v25  ;;  %v4908_v35 = vpack.c.bf16 %v1773_v48, %v1772_v31 }
 0xb3c   :  { %4383 = vmatprep.mubr.msk.f32.mxu1 %vm5251_vm0, %v5252_v1  ;;  %v2630_v28 = vmul.f32 %v5120_v26, %v2622_v50  ;;  %v2194_v34 = vmul.f32 %v5922_v51, %v2191_v2  ;;  %v1775_v2 = vld [vmem:[#allocation5 + $0x538] sm:$0xff] }
 0xb3d   :  { %v2193_v52 = vmul.f32 %v5924_v58, %v2190_v13  ;;  %v2632_v5 = vsub.f32 2.0, %v2629_v54 }
 0xb3e   :  { %v2851_v61 = vpop.xlane.xlu1 %2850  ;;  %v5122_v14 = vpop.eup %5121 }
 0xb3f   :  { %4384 = vmatmul.mubr.msk.f32.vlgmr.msra.gmra.mrb[36].mxu1 %vm514_vm1, %v2192_v12  ;;  %5127 = vrcp.f32 %v2851_v61  ;;  %v2635_v41 = vmul.f32 %v5118_v59, %v2632_v5  ;;  %v2631_v58 = vmul.f32 %v5122_v14, %v2625_v39 }
 0xb40   :  { %4873 = vmatpush3.bf16.msra.mxu1 %v4872_v11  ;;  %4386 = vmatprep.mubr.msk.f32.mxu1 %vm5251_vm0, %v5252_v1  ;;  %v2633_v11 = vsub.f32 2.0, %v2630_v28  ;;  %v1776_v28 = vld [vmem:[#allocation5 + $0x540] sm:$0xff] }
 0xb41   :  { %4411 = vmatprep.subr.mxu1 %v5252_v1  ;;  %v5124_v30 = vpop.eup %5123  ;;  %v2638_v62 = vmul.f32 %v5931_v21, %v2635_v41  ;;  %v2634_v42 = vsub.f32 2.0, %v2631_v58  ;;  %v1780_v41 = vld [vmem:[#allocation5 + $0x560] sm:$0xff] }
 0xb42   :  { %v2636_v8 = vmul.f32 %v5120_v26, %v2633_v11  ;;  %v2855_v6 = vmul.f32 %v5124_v30, %v2845_v56  ;;  %v1781_v11 = vld [vmem:[#allocation5 + $0x568] sm:$0xff] }
 0xb43   :  { %4387 = vmatmul.mubr.msk.f32.gmra.mrb[38].mxu1 %vm514_vm1, %v2193_v52  ;;  %v2637_v45 = vmul.f32 %v5122_v14, %v2634_v42  ;;  %v4920_v58 = vpack.c.bf16 %v1781_v11, %v1780_v41  ;;  %v1784_v42 = vld [vmem:[#allocation5 + $0x580] sm:$0xff] }
 0xb44   :  { %4412 = vmatpush3.msra.mxu1 %v2643_v44  ;;  %4389 = vmatprep.mubr.msk.f32.mxu1 %vm5251_vm0, %v5252_v1  ;;  %v2639_v51 = vmul.f32 %v5933_v60, %v2636_v8  ;;  %v2858_v47 = vsub.f32 2.0, %v2855_v6  ;;  %v1779_v44 = vld [vmem:[#allocation5 + $0x558] sm:$0xff]  ;;  %v1785_v6 = vld [vmem:[#allocation5 + $0x588] sm:$0xff] }
 0xb45   :  { %4877 = vmatprep.subr.bf16.mxu1 %v5250_v0  ;;  %v5126_v10 = vpop.eup %5125  ;;  %v2640_v36 = vmul.f32 %v5940_v9, %v2637_v45  ;;  %v1787_v45 = vld [vmem:[#allocation5 + $0x598] sm:$0xff] }
 0xb46   :  { %v2856_v55 = vmul.f32 %v5126_v10, %v2848_v25  ;;  %v2861_v24 = vmul.f32 %v5124_v30, %v2858_v47  ;;  %v1782_v30 = vld [vmem:[#allocation5 + $0x570] sm:$0xff]  ;;  %v1788_v47 = vld [vmem:[#allocation5 + $0x5a0] sm:$0xff] }
 0xb47   :  { %4390 = vmatmul.mubr.msk.f32.gmra.mrb[40].mxu1 %vm514_vm1, %v2194_v34 }
 0xb48   :  { %4413 = vmatprep.mubr.msk.f32.mxu1 %vm5251_vm0, %v5252_v1  ;;  %v2864_v18 = vmul.f32 %v5944_v27, %v2861_v24  ;;  %v1791_v24 = vld [vmem:[#allocation5 + $0x5b8] sm:$0xff] }
 0xb49   :  { %v5128_v21 = vpop.eup %5127 }
 0xb4a   :  { %v2857_v60 = vmul.f32 %v5128_v21, %v2851_v61  ;;  %v1777_v61 = vld [vmem:[#allocation5 + $0x548] sm:$0xff] }
 0xb4b   :  { %4414 = vmatmul.mubr.msk.f32.vlgmr.msra.gmra.mrb[36].mxu1 %vm514_vm1, %v2638_v62  ;;  %v4914_v14 = vpack.c.bf16 %v1777_v61, %v1776_v28  ;;  %v1783_v62 = vld [vmem:[#allocation5 + $0x578] sm:$0xff]  ;;  %v3493_v28 = vld [vmem:[#allocation5 + $0x614] ss:$0 sm:$0xff] }
 0xb4c   :  { %4879 = vmatpush3.bf16.msra.mxu1 %v4878_v33  ;;  %4416 = vmatprep.mubr.msk.f32.mxu1 %vm5251_vm0, %v5252_v1  ;;  %v2859_v33 = vsub.f32 2.0, %v2856_v55  ;;  %v2860_v50 = vsub.f32 2.0, %v2857_v60  ;;  %v4923_v8 = vpack.c.bf16 %v1783_v62, %v1782_v30  ;;  %v1792_v60 = vld [vmem:[#allocation5 + $0x5c0] sm:$0xff] }
 0xb4d   :  { %4441 = vmatprep.subr.mxu1 %v5252_v1 }
 0xb4e   :  { %v2862_v4 = vmul.f32 %v5126_v10, %v2859_v33  ;;  %v2863_v20 = vmul.f32 %v5128_v21, %v2860_v50  ;;  %v4926_v10 = vpack.c.bf16 %v1785_v6, %v1784_v42  ;;  %v1789_v21 = vld [vmem:[#allocation5 + $0x5a8] sm:$0xff]  ;;  %v1794_v50 = vld [vmem:[#allocation5 + $0x5d0] sm:$0xff]  ;;  %v1800_v6 = vld [vmem:[#allocation5 + $0x600] sm:$0xff] }
 0xb4f   :  { %4417 = vmatmul.mubr.msk.f32.gmra.mrb[38].mxu1 %vm514_vm1, %v2639_v51  ;;  %v1786_v51 = vld [vmem:[#allocation5 + $0x590] sm:$0xff] }
 0xb50   :  { %4442 = vmatpush3.msra.mxu1 %v2869_v37  ;;  %4419 = vmatprep.mubr.msk.f32.mxu1 %vm5251_vm0, %v5252_v1  ;;  %v2865_v9 = vmul.f32 %v5948_v17, %v2862_v4  ;;  %v2866_v3 = vmul.f32 %v5952_v16, %v2863_v20  ;;  %v1770_v16 = vld [vmem:[#allocation5 + $0x510] sm:$0xff]  ;;  %v4929_v55 = vpack.c.bf16 %v1787_v45, %v1786_v51  ;;  %v3495_v51 = vld [vmem:[#allocation5 + $0x618] ss:$0 sm:$0xff] }
 0xb51   :  { %4904 = vmatprep.subr.bf16.mxu1 %v5250_v0  ;;  %v4905_v39 = vpack.c.bf16 %v1771_v53, %v1770_v16  ;;  %v4932_v37 = vpack.c.bf16 %v1789_v21, %v1788_v47 }
 0xb53   :  { %4420 = vmatmul.mubr.msk.f32.gmra.mrb[40].mxu1 %vm514_vm1, %v2640_v36  ;;  %v1790_v36 = vld [vmem:[#allocation5 + $0x5b0] sm:$0xff] }
 0xb54   :  { %4443 = vmatprep.mubr.msk.f32.mxu1 %vm5251_vm0, %v5252_v1  ;;  %v4935_v33 = vpack.c.bf16 %v1791_v24, %v1790_v36 }
 0xb57   :  { %4444 = vmatmul.mubr.msk.f32.vlgmr.msra.gmra.mrb[36].mxu1 %vm514_vm1, %v2864_v18  ;;  %v1793_v18 = vld [vmem:[#allocation5 + $0x5c8] sm:$0xff] }
 0xb58   :  { %4446 = vmatprep.mubr.msk.f32.mxu1 %vm5251_vm0, %v5252_v1  ;;  %4906 = vmatpush3.bf16.msra.mxu1 %v4905_v39  ;;  %v4938_v4 = vpack.c.bf16 %v1793_v18, %v1792_v60 }
 0xb59   :  { %4907 = vmatprep.subr.bf16.mxu1 %v5250_v0 }
 0xb5b   :  { %4447 = vmatmul.mubr.msk.f32.gmra.mrb[38].mxu1 %vm514_vm1, %v2865_v9  ;;  %v1795_v9 = vld [vmem:[#allocation5 + $0x5d8] sm:$0xff] }
 0xb5c   :  { %4449 = vmatprep.mubr.msk.f32.mxu1 %vm5251_vm0, %v5252_v1  ;;  %4909 = vmatpush3.bf16.msra.mxu1 %v4908_v35  ;;  %v4941_v20 = vpack.c.bf16 %v1795_v9, %v1794_v50  ;;  %v3329_v9 = vld [vmem:[#allocation5 + $0x620] sm:$0xff] }
 0xb5d   :  { %4910 = vmatprep.subr.bf16.mxu1 %v5250_v0 }
 0xb5f   :  { %4450 = vmatmul.mubr.msk.f32.gmra.mrb[40].mxu1 %vm514_vm1, %v2866_v3  ;;  %v1796_v3 = vld [vmem:[#allocation5 + $0x5e0] sm:$0xff] }
 0xb60   :  { %4525 = vmatprep.mubr.msk.f32.mxu1 %vm5251_vm0, %v5252_v1 }
 0xc2a   :  { %v2945_v27 = vpop.f32.mrb[36].mxu1 }
 0xc2b   :  { %v4445_v32 = vpop.f32.mrb[37].mxu1  ;;  %4485 = vmatmul.mubr.f32.vlgmr.msra.gmra.mrb[72].mxu0 %v2945_v27  ;;  %v1797_v27 = vld [vmem:[#allocation5 + $0x5e8] sm:$0xff] }
 0xc2c   :  { %4487 = vmatprep.mubr.msk.f32.mxu0 %vm5251_vm0, %v5252_v1  ;;  %4930 = vmatpush3.bf16.msra.mxu0 %v4929_v55  ;;  %v4944_v32 = vpack.c.bf16 %v1797_v27, %v1796_v3  ;;  %v3331_v3 = vld [vmem:[#allocation5 + $0x630] sm:$0xff] }
 0xc2d   :  { %4931 = vmatprep.subr.bf16.mxu0 %v5250_v0 }
 0xc2e   :  { %v2950_v17 = vpop.f32.mrb[38].mxu1 }
 0xc2f   :  { %v4448_v63 = vpop.f32.mrb[39].mxu1  ;;  %4488 = vmatmul.mubr.f32.gmra.mrb[74].mxu0 %v2950_v17  ;;  %v1798_v17 = vld [vmem:[#allocation5 + $0x5f0] sm:$0xff] }
 0xc30   :  { %4490 = vmatprep.mubr.msk.f32.mxu0 %vm5251_vm0, %v5252_v1  ;;  %4933 = vmatpush3.bf16.msra.mxu0 %v4932_v37  ;;  %v1799_v63 = vld [vmem:[#allocation5 + $0x5f8] sm:$0xff] }
 0xc31   :  { %4934 = vmatprep.subr.bf16.mxu0 %v5250_v0 }
 0xc32   :  { %v2955_v19 = vpop.f32.mrb[40].mxu1 }
 0xc33   :  { %v4451_v46 = vpop.f32.mrb[41].mxu1  ;;  %4491 = vmatmul.mubr.f32.gmra.mrb[76].mxu0 %v2955_v19  ;;  %v4947_v19 = vpack.c.bf16 %v1799_v63, %v1798_v17  ;;  %v3496_v63 = vld [vmem:[#allocation5 + $0x619] ss:$0 sm:$0xff] }
 0xc34   :  { %4566 = vmatprep.mubr.msk.f32.mxu0 %vm5251_vm0, %v5252_v1  ;;  %4936 = vmatpush3.bf16.msra.mxu0 %v4935_v33 }
 0xc35   :  { %4937 = vmatprep.subr.bf16.mxu0 %v5250_v0 }
 0xc38   :  { %4939 = vmatpush3.bf16.msra.mxu0 %v4938_v4 }
 0xc39   :  { %4940 = vmatprep.subr.bf16.mxu0 %v5250_v0 }
 0xc3c   :  { %4942 = vmatpush3.bf16.msra.mxu0 %v4941_v20  ;;  %v3330_v20 = vld [vmem:[#allocation5 + $0x628] sm:$0xff] }
 0xc3d   :  { %4943 = vmatprep.subr.bf16.mxu0 %v5250_v0  ;;  %v4953_v27 = vpack.c.bf16 %v3330_v20, %v3329_v9  ;;  %v3497_v9 = vld [vmem:[#allocation5 + $0x616] ss:$0 sm:$0xff] }
 0xc40   :  { %4945 = vmatpush3.bf16.msra.mxu0 %v4944_v32  ;;  %v3332_v32 = vld [vmem:[#allocation5 + $0x638] sm:$0xff] }
 0xc41   :  { %4946 = vmatprep.subr.bf16.mxu0 %v5250_v0  ;;  %v4956_v17 = vpack.c.bf16 %v3332_v32, %v3331_v3  ;;  %v3498_v3 = vld [vmem:[#allocation5 + $0x617] ss:$0 sm:$0xff] }
 0xc44   :  { %4948 = vmatpush3.bf16.msra.mxu0 %v4947_v19 }
 0xc45   :  { %4949 = vmatprep.subr.bf16.mxu0 %v5250_v0 }
 0xcfe   :  { %v3032_v7 = vpop.f32.mrb[72].mxu0 }
 0xcff   :  { %v3033_v43 = vadd.f32 %v3492_v23, %v3032_v7  ;;  %v4486_v40 = vpop.f32.mrb[73].mxu0 }
 0xd01   :  { %v6042_v38 = vadd.f32 %v3033_v43, %v5720_v15 }
 0xd02   :  { %v3037_v49 = vpop.f32.mrb[74].mxu0 }
 0xd03   :  { %v3038_v56 = vadd.f32 %v3492_v23, %v3037_v49  ;;  %3049 = vadd.xlane.f32.xlu0 %v6042_v38  ;;  %v4489_v59 = vpop.f32.mrb[75].mxu0  ;;  %v3058_v12 = vmul.f32 %v6042_v38, %v6042_v38 }
 0xd05   :  { %v6048_v13 = vadd.f32 %v3038_v56, %v5730_v22  ;;  %3061 = vadd.xlane.f32.xlu1 %v3058_v12  ;;  %v1774_v22 = vld [vmem:[#allocation5 + $0x530] sm:$0xff] }
 0xd06   :  { %v3042_v57 = vpop.f32.mrb[76].mxu0  ;;  %v4911_v5 = vpack.c.bf16 %v1775_v2, %v1774_v22 }
 0xd07   :  { %v3043_v54 = vadd.f32 %v3492_v23, %v3042_v57  ;;  %3051 = vadd.xlane.f32.xlu0 %v6048_v13  ;;  %v4492_v25 = vpop.f32.mrb[77].mxu0  ;;  %v3059_v15 = vmul.f32 %v6048_v13, %v6048_v13 }
 0xd08   :  { %4912 = vmatpush3.bf16.msra.mxu1 %v4911_v5 }
 0xd09   :  { %v6054_v26 = vadd.f32 %v3043_v54, %v5739_v29  ;;  %3063 = vadd.xlane.f32.xlu1 %v3059_v15  ;;  %4913 = vmatprep.subr.bf16.mxu1 %v5250_v0  ;;  %v1778_v29 = vld [vmem:[#allocation5 + $0x550] sm:$0xff] }
 0xd0a   :  { %v4917_v34 = vpack.c.bf16 %v1779_v44, %v1778_v29 }
 0xd0b   :  { %3053 = vadd.xlane.f32.xlu0 %v6054_v26  ;;  %v3060_v52 = vmul.f32 %v6054_v26, %v6054_v26 }
 0xd0c   :  { %4915 = vmatpush3.bf16.msra.mxu1 %v4914_v14  ;;  %v3494_v14 = vld [vmem:[#allocation5 + $0x615] ss:$0 sm:$0xff] }
 0xd0d   :  { %3065 = vadd.xlane.f32.xlu1 %v3060_v52  ;;  %4916 = vmatprep.subr.bf16.mxu1 %v5250_v0 }
 0xd10   :  { %4918 = vmatpush3.bf16.msra.mxu1 %v4917_v34 }
 0xd11   :  { %4919 = vmatprep.subr.bf16.mxu1 %v5250_v0 }
 0xd14   :  { %4921 = vmatpush3.bf16.msra.mxu1 %v4920_v58 }
 0xd15   :  { %4922 = vmatprep.subr.bf16.mxu1 %v5250_v0 }
 0xd18   :  { %4924 = vmatpush3.bf16.msra.mxu1 %v4923_v8 }
 0xd19   :  { %4925 = vmatprep.subr.bf16.mxu1 %v5250_v0 }
 0xd1c   :  { %4927 = vmatpush3.bf16.msra.mxu1 %v4926_v10 }
 0xd1d   :  { %4952 = vmatprep.subr.bf16.mxu1 %v5250_v0 }
 0xd90   :  { %v3050_v46 = vpop.xlane.xlu0 %3049 }
 0xd91   :  { %v3055_v16 = vmul.f32 0.03125, %v3050_v46 }
 0xd92   :  { %v3062_v53 = vpop.xlane.xlu1 %3061 }
 0xd93   :  { %v3070_v31 = vmul.f32 %v3055_v16, %v3055_v16  ;;  %v3067_v39 = vmul.f32 0.03125, %v3062_v53  ;;  %v3076_v2 = vsub.f32 %v6042_v38, %v3055_v16 }
 0xd94   :  { %v3052_v48 = vpop.xlane.xlu0 %3051 }
 0xd95   :  { %v3073_v35 = vsub.f32 %v3067_v39, %v3070_v31  ;;  %v3056_v23 = vmul.f32 0.03125, %v3052_v48 }
 0xd96   :  { %v3064_v7 = vpop.xlane.xlu1 %3063 }
 0xd97   :  { %v3079_v43 = vadd.f32 1e-05, %v3073_v35  ;;  %v3071_v40 = vmul.f32 %v3056_v23, %v3056_v23  ;;  %v3068_v49 = vmul.f32 0.03125, %v3064_v7  ;;  %v3077_v29 = vsub.f32 %v6048_v13, %v3056_v23 }
 0xd98   :  { %v3054_v56 = vpop.xlane.xlu0 %3053 }
 0xd99   :  { %5129 = vrsqrt.f32 %v3079_v43  ;;  %v3074_v59 = vsub.f32 %v3068_v49, %v3071_v40  ;;  %v3057_v12 = vmul.f32 0.03125, %v3054_v56 }
 0xd9a   :  { %v3066_v57 = vpop.xlane.xlu1 %3065 }
 0xd9b   :  { %v3080_v54 = vadd.f32 1e-05, %v3074_v59  ;;  %v3072_v25 = vmul.f32 %v3057_v12, %v3057_v12  ;;  %v3069_v15 = vmul.f32 0.03125, %v3066_v57  ;;  %v3078_v58 = vsub.f32 %v6054_v26, %v3057_v12  ;;  %v1801_v26 = vld [vmem:[#allocation5 + $0x608] sm:$0xff]  ;;  %v3333_v12 = vld [vmem:[#allocation5 + $0x640] sm:$0xff] }
 0xd9c   :  { %v4950_v10 = vpack.c.bf16 %v1801_v26, %v1800_v6  ;;  %v3334_v57 = vld [vmem:[#allocation5 + $0x648] sm:$0xff] }
 0xd9d   :  { %5131 = vrsqrt.f32 %v3080_v54  ;;  %v3075_v52 = vsub.f32 %v3069_v15, %v3072_v25  ;;  %v4959_v54 = vpack.c.bf16 %v3334_v57, %v3333_v12  ;;  %v3335_v25 = vld [vmem:[#allocation5 + $0x650] sm:$0xff]  ;;  %v3336_v15 = vld [vmem:[#allocation5 + $0x658] sm:$0xff] }
 0xd9e   :  { %4951 = vmatpush3.bf16.msra.mxu0 %v4950_v10 }
 0xd9f   :  { %v3081_v22 = vadd.f32 1e-05, %v3075_v52  ;;  %v4962_v52 = vpack.c.bf16 %v3336_v15, %v3335_v25 }
 0xda1   :  { %5133 = vrsqrt.f32 %v3081_v22  ;;  %v3337_v22 = vld [vmem:[#allocation5 + $0x660] sm:$0xff] }
 0xda3   :  { %v5130_v5 = vpop.eup %5129 }
 0xda4   :  { %v3085_v61 = vmul.f32 %v5130_v5, %v3076_v2  ;;  %v3338_v2 = vld [vmem:[#allocation5 + $0x668] sm:$0xff] }
 0xda5   :  { %v4965_v5 = vpack.c.bf16 %v3338_v2, %v3337_v22 }
 0xda6   :  { %v3092_v44 = vmul.f32 %v3493_v28, %v3085_v61  ;;  %v3340_v61 = vld [vmem:[#allocation5 + $0x678] sm:$0xff] }
 0xda7   :  { %v5132_v34 = vpop.eup %5131 }
 0xda8   :  { %v3099_v41 = vadd.f32 %v3494_v14, %v3092_v44  ;;  %v3086_v11 = vmul.f32 %v5132_v34, %v3077_v29  ;;  %v3341_v29 = vld [vmem:[#allocation5 + $0x680] sm:$0xff]  ;;  %v3342_v44 = vld [vmem:[#allocation5 + $0x688] sm:$0xff] }
 0xda9   :  { %v4971_v34 = vpack.c.bf16 %v3342_v44, %v3341_v29 }
 0xdaa   :  { %4526 = vmatmul.mubr.f32.vlgmr.msra.gmra.mrb[42].mxu1 %v3099_v41  ;;  %v3093_v30 = vmul.f32 %v3493_v28, %v3086_v11  ;;  %v3344_v11 = vld [vmem:[#allocation5 + $0x698] sm:$0xff] }
 0xdab   :  { %v5134_v62 = vpop.eup %5133  ;;  %4528 = vmatprep.mubr.msk.f32.mxu1 %vm5251_vm0, %v5252_v1  ;;  %4954 = vmatpush3.bf16.msra.mxu1 %v4953_v27 }
 0xdac   :  { %v3100_v8 = vadd.f32 %v3494_v14, %v3093_v30  ;;  %v3087_v38 = vmul.f32 %v5134_v62, %v3078_v58  ;;  %4955 = vmatprep.subr.bf16.mxu1 %v5250_v0 }
 0xdae   :  { %4529 = vmatmul.mubr.f32.gmra.mrb[44].mxu1 %v3100_v8  ;;  %v3094_v42 = vmul.f32 %v3493_v28, %v3087_v38  ;;  %v3339_v28 = vld [vmem:[#allocation5 + $0x670] sm:$0xff] }
 0xdaf   :  { %4531 = vmatprep.mubr.msk.f32.mxu1 %vm5251_vm0, %v5252_v1  ;;  %4957 = vmatpush3.bf16.msra.mxu1 %v4956_v17 }
 0xdb0   :  { %v3101_v13 = vadd.f32 %v3494_v14, %v3094_v42  ;;  %4958 = vmatprep.subr.bf16.mxu1 %v5250_v0  ;;  %v4968_v14 = vpack.c.bf16 %v3340_v61, %v3339_v28 }
 0xdb2   :  { %4532 = vmatmul.mubr.f32.gmra.mrb[46].mxu1 %v3101_v13 }
 0xdb3   :  { %4607 = vmatprep.mubr.msk.f32.mxu1 %vm5251_vm0, %v5252_v1  ;;  %4960 = vmatpush3.bf16.msra.mxu1 %v4959_v54 }
 0xdb4   :  { %4961 = vmatprep.subr.bf16.mxu1 %v5250_v0 }
 0xdb7   :  { %4963 = vmatpush3.bf16.msra.mxu1 %v4962_v52 }
 0xdb8   :  { %4964 = vmatprep.subr.bf16.mxu1 %v5250_v0 }
 0xdbb   :  { %4966 = vmatpush3.bf16.msra.mxu1 %v4965_v5 }
 0xdbc   :  { %4967 = vmatprep.subr.bf16.mxu1 %v5250_v0 }
 0xdbf   :  { %4969 = vmatpush3.bf16.msra.mxu1 %v4968_v14 }
 0xdc0   :  { %4970 = vmatprep.subr.bf16.mxu1 %v5250_v0 }
 0xdc3   :  { %4972 = vmatpush3.bf16.msra.mxu1 %v4971_v34 }
 0xdc4   :  { %4973 = vmatprep.subr.bf16.mxu1 %v5250_v0 }
 0xe7d   :  { %v3172_v45 = vpop.f32.mrb[42].mxu1 }
 0xe7e   :  { %v3173_v47 = vadd.f32 %v3495_v51, %v3172_v45  ;;  %v4527_v55 = vpop.f32.mrb[43].mxu1 }
 0xe80   :  { %v3186_v21 = vmax.f32 %v3173_v47, 0.0 }
 0xe81   :  { %v3177_v37 = vpop.f32.mrb[44].mxu1 }
 0xe82   :  { %v3178_v36 = vadd.f32 %v3495_v51, %v3177_v37  ;;  %v4530_v24 = vpop.f32.mrb[45].mxu1  ;;  %4567 = vmatmul.mubr.f32.vlgmr.msra.gmra.mrb[78].mxu0 %v3186_v21 }
 0xe83   :  { %4569 = vmatprep.mubr.msk.f32.mxu0 %vm5251_vm0, %v5252_v1 }
 0xe84   :  { %v3187_v33 = vmax.f32 %v3178_v36, 0.0 }
 0xe85   :  { %v3182_v60 = vpop.f32.mrb[46].mxu1 }
 0xe86   :  { %v3183_v18 = vadd.f32 %v3495_v51, %v3182_v60  ;;  %v4533_v4 = vpop.f32.mrb[47].mxu1  ;;  %4570 = vmatmul.mubr.f32.gmra.mrb[80].mxu0 %v3187_v33 }
 0xe87   :  { %4572 = vmatprep.mubr.msk.f32.mxu0 %vm5251_vm0, %v5252_v1 }
 0xe88   :  { %v3188_v50 = vmax.f32 %v3183_v18, 0.0 }
 0xe8a   :  { %4573 = vmatmul.mubr.f32.gmra.mrb[82].mxu0 %v3188_v50 }
 0xf55   :  { %v3259_v19 = vpop.f32.mrb[78].mxu0 }
 0xf56   :  { %v3260_v46 = vadd.f32 %v3496_v63, %v3259_v19  ;;  %v4568_v16 = vpop.f32.mrb[79].mxu0 }
 0xf58   :  { %v6087_v53 = vadd.f32 %v3260_v46, %v3099_v41  ;;  %v3343_v41 = vld [vmem:[#allocation5 + $0x690] sm:$0xff] }
 0xf59   :  { %v3264_v31 = vpop.f32.mrb[80].mxu0  ;;  %v4974_v58 = vpack.c.bf16 %v3344_v11, %v3343_v41 }
 0xf5a   :  { %v3265_v39 = vadd.f32 %v3496_v63, %v3264_v31  ;;  %3276 = vadd.xlane.f32.xlu0 %v6087_v53  ;;  %v4571_v48 = vpop.f32.mrb[81].mxu0  ;;  %v3285_v35 = vmul.f32 %v6087_v53, %v6087_v53 }
 0xf5b   :  { %4975 = vmatpush3.bf16.msra.mxu1 %v4974_v58 }
 0xf5c   :  { %v6092_v23 = vadd.f32 %v3265_v39, %v3100_v8  ;;  %3288 = vadd.xlane.f32.xlu1 %v3285_v35 }
 0xf5d   :  { %v3269_v7 = vpop.f32.mrb[82].mxu0 }
 0xf5e   :  { %v3270_v43 = vadd.f32 %v3496_v63, %v3269_v7  ;;  %3278 = vadd.xlane.f32.xlu0 %v6092_v23  ;;  %v4574_v40 = vpop.f32.mrb[83].mxu0  ;;  %v3286_v49 = vmul.f32 %v6092_v23, %v6092_v23 }
 0xf60   :  { %v6097_v56 = vadd.f32 %v3270_v43, %v3101_v13  ;;  %3290 = vadd.xlane.f32.xlu1 %v3286_v49 }
 0xf62   :  { %3280 = vadd.xlane.f32.xlu0 %v6097_v56  ;;  %v3287_v59 = vmul.f32 %v6097_v56, %v6097_v56 }
 0xf64   :  { %3292 = vadd.xlane.f32.xlu1 %v3287_v59 }
 0xfe7   :  { %v3277_v30 = vpop.xlane.xlu0 %3276 }
 0xfe8   :  { %v3282_v62 = vmul.f32 0.03125, %v3277_v30 }
 0xfe9   :  { %v3289_v8 = vpop.xlane.xlu1 %3288 }
 0xfea   :  { %v3297_v38 = vmul.f32 %v3282_v62, %v3282_v62  ;;  %v3294_v42 = vmul.f32 0.03125, %v3289_v8  ;;  %v3303_v4 = vsub.f32 %v6087_v53, %v3282_v62 }
 0xfeb   :  { %v3279_v13 = vpop.xlane.xlu0 %3278 }
 0xfec   :  { %v3300_v6 = vsub.f32 %v3294_v42, %v3297_v38  ;;  %v3283_v26 = vmul.f32 0.03125, %v3279_v13 }
 0xfed   :  { %v3291_v10 = vpop.xlane.xlu1 %3290 }
 0xfee   :  { %v3306_v51 = vadd.f32 1e-05, %v3300_v6  ;;  %v3298_v45 = vmul.f32 %v3283_v26, %v3283_v26  ;;  %v3295_v47 = vmul.f32 0.03125, %v3291_v10  ;;  %v3304_v27 = vsub.f32 %v6092_v23, %v3283_v26  ;;  %v3499_v23 = vld [vmem:[#allocation5 + $0x6a0] ss:$0 sm:$0xff] }
 0xfef   :  { %v3281_v55 = vpop.xlane.xlu0 %3280 }
 0xff0   :  { %5135 = vrsqrt.f32 %v3306_v51  ;;  %v3301_v21 = vsub.f32 %v3295_v47, %v3298_v45  ;;  %v3284_v37 = vmul.f32 0.03125, %v3281_v55 }
 0xff1   :  { %v3293_v36 = vpop.xlane.xlu1 %3292 }
 0xff2   :  { %v3307_v0 = vadd.f32 1e-05, %v3301_v21  ;;  %v3299_v24 = vmul.f32 %v3284_v37, %v3284_v37  ;;  %v3296_v33 = vmul.f32 0.03125, %v3293_v36  ;;  %v3305_v46 = vsub.f32 %v6097_v56, %v3284_v37 }
 0xff4   :  { %5137 = vrsqrt.f32 %v3307_v0  ;;  %v3302_v60 = vsub.f32 %v3296_v33, %v3299_v24 }
 0xff6   :  { %v3308_v18 = vadd.f32 1e-05, %v3302_v60 }
 0xff8   :  { %5139 = vrsqrt.f32 %v3308_v18 }
 0xffa   :  { %v5136_v50 = vpop.eup %5135 }
 0xffb   :  { %v3312_v20 = vmul.f32 %v5136_v50, %v3303_v4 }
 0xffd   :  { %v3319_v32 = vmul.f32 %v3497_v9, %v3312_v20 }
 0xffe   :  { %v5138_v17 = vpop.eup %5137 }
 0xfff   :  { %v3326_v63 = vadd.f32 %v3498_v3, %v3319_v32  ;;  %v3313_v19 = vmul.f32 %v5138_v17, %v3304_v27 }
0x1001   :  { %4608 = vmatmul.mubr.f32.vlgmr.msra.gmra.mrb[48].mxu1 %v3326_v63  ;;  %v3320_v16 = vmul.f32 %v3497_v9, %v3313_v19 }
0x1002   :  { %v5140_v31 = vpop.eup %5139  ;;  %4610 = vmatprep.mubr.msk.f32.mxu1 %vm5251_vm0, %v5252_v1 }
0x1003   :  { %v3327_v39 = vadd.f32 %v3498_v3, %v3320_v16  ;;  %v3314_v53 = vmul.f32 %v5140_v31, %v3305_v46 }
0x1005   :  { %4611 = vmatmul.mubr.f32.gmra.mrb[50].mxu1 %v3327_v39  ;;  %v3321_v48 = vmul.f32 %v3497_v9, %v3314_v53 }
0x1006   :  { %4613 = vmatprep.mubr.msk.f32.mxu1 %vm5251_vm0, %v5252_v1 }
0x1007   :  { %v3328_v35 = vadd.f32 %v3498_v3, %v3321_v48 }
0x1009   :  { %4614 = vmatmul.mubr.f32.gmra.mrb[52].mxu1 %v3328_v35 }
0x10d4   :  { %v3416_v7 = vpop.f32.mrb[48].mxu1 }
0x10d5   :  { %v3417_v43 = vadd.f32 %v3499_v23, %v3416_v7  ;;  %v4609_v40 = vpop.f32.mrb[49].mxu1 }
0x10d7   :  { %3430 = vst [vmem:[#allocation8] sm:$0xff] %v3417_v43 }
0x10d8   :  { %v3421_v49 = vpop.f32.mrb[50].mxu1 }
0x10d9   :  { %v3422_v56 = vadd.f32 %v3499_v23, %v3421_v49  ;;  %v4612_v59 = vpop.f32.mrb[51].mxu1 }
0x10db   :  { %3431 = vst [vmem:[#allocation8 + $0x8] sm:$0xff] %v3422_v56 }
0x10dc   :  { %v3426_v12 = vpop.f32.mrb[52].mxu1 }
0x10dd   :  { %v3427_v57 = vadd.f32 %v3499_v23, %v3426_v12  ;;  %v4615_v54 = vpop.f32.mrb[53].mxu1 }
0x10df   :  { %3432 = vst [vmem:[#allocation8 + $0x10] sm:$0xff] %v3427_v57 }
0x10e0   :  { %5228 = shalt.err (!%p5225_p0)
}
0x10e1   :  { %s5229_s27 = scalar_lea.hbm %s6132_s3, 384 }
0x10e2   :  { %p5230_p1 = scmp.ne.s32.totalorder %s6132_s3, %s5229_s27  ;;  %p5233_p2 = scmp.lt.u32.totalorder %s5229_s27, %s6132_s3 }
0x10e4   :  { %p5235_p3 = pnand %p5233_p2, %p5230_p1 }
0x10e6   :  { %5238 = shalt.err (!%p5235_p3)
}
0x10e7   :  { %3444 = dma.vmem_to_hbm [thread:$0]  %s3439_s21, 384, %s6132_s3, [#allocation4], %s5247_s24, %s5247_s24, %s5248_s25  }
0x10e8   :  { %5243 = dma.done.wait [#allocation4], 384  }
0x10e9   :  { %5244 = vsyncadd [#allocation4], 4294966912 }
0x10ea   :  { %3448 = vsyncpa [#allocation3], 1 }
0x10eb   :  { %3449 = vsyncpa [#allocation6], 1 }
0x10ec   :  { %3450 = vsyncpa [#allocation4], 1 }

</bundles_post_ra>
